<compile_context>
chip_gen: v7x
topology: tpu7x:2x2x1
jax: 0.10.0
libtpu: 0.0.40
codegen_flags: <defaults>
</compile_context>

<pallas_src>
import functools
import math

import jax
import jax.numpy as jnp
from jax import lax
from jax.experimental import pallas as pl
from jax.experimental.pallas import tpu as pltpu


# ----------------------------------------------------------------------------
# In-kernel helpers (operate on traced values, never on refs)
# ----------------------------------------------------------------------------
def _layernorm(x, g, b, eps):
    m = jnp.mean(x, axis=-1, keepdims=True)
    c = x - m
    v = jnp.mean(c * c, axis=-1, keepdims=True)
    return c * lax.rsqrt(v + eps) * g + b


def _softmax_last(x):
    m = jnp.max(x, axis=-1, keepdims=True)
    e = jnp.exp(x - m)
    # divide on the EUP (approx reciprocal) instead of the VALU
    return e * pl.reciprocal(jnp.sum(e, axis=-1, keepdims=True), approx=True)


# ----------------------------------------------------------------------------
# Single fused forward kernel
# ----------------------------------------------------------------------------
def _fused_forward_kernel(
        # activations & constant layout matrices
        hid_ref, ft_ref, patch_ref, bias_ref, poolt_ref, pooli_ref,
        # text params
        pw_ref, pb_ref, tw_ref, tb_ref,
        # image params
        sw_ref, sb_ref, cwt_ref, hw_ref, hbe_ref, iw_ref, ib_ref,
        # encoder params
        wqkv_ref, bqkv_ref, wo_ref, bo_ref, g1_ref, b1_ref,
        w1_ref, fb1_ref, w2_ref, fb2_ref, g2_ref, b2_ref,
        # classifier params
        tw1_ref, tb1_ref, tw2_ref, tb2_ref, iw1_ref, ib1_ref, iw2_ref, ib2_ref,
        # output
        out_ref,
        *, B, H, D, hd, scale, eps, num_labels):
    f32 = jnp.float32

    # ---------------- text head (pooler + shared Linear+ReLU) ----------------
    tw = tw_ref[...]
    tb = tb_ref[...]
    pooler = jnp.tanh(
        jnp.dot(ft_ref[...], pw_ref[...], preferred_element_type=f32) + pb_ref[...])
    text_hidden = jnp.maximum(
        jnp.dot(hid_ref[...], tw, preferred_element_type=f32) + tb, 0.0)      # [B*L, D]
    text_feature = jnp.maximum(
        jnp.dot(pooler, tw, preferred_element_type=f32) + tb, 0.0)            # [B, D]

    # ---------------- image path ----------------
    # stem: [B*49, C] @ [C, Cf] + b, ReLU
    feat = jnp.maximum(
        jnp.dot(patch_ref[...], sw_ref[...], preferred_element_type=f32)
        + sb_ref[...], 0.0)                                                   # [B*49, Cf]
    # resnet_p (AdaptiveAvgPool + Flatten) as one block-diagonal averaging matmul
    feature = jnp.dot(pooli_ref[...], feat, preferred_element_type=f32)       # [B, Cf]
    img_feature = jnp.maximum(
        jnp.dot(feature, iw_ref[...], preferred_element_type=f32) + ib_ref[...], 0.0)

    # hidden_trans: per batch, re-associated cw^T @ (feat_b^T @ hw) + folded bias, ReLU
    hw = hw_ref[...]           # [49, D]
    cwt = cwt_ref[...]         # [S, Cf]
    hbe = hbe_ref[...]         # [S, D]  (hid_lin_b + conv_b^T @ colsum(hw), precomputed)
    img_blocks = []
    for b in range(B):
        feat_b = feat[b * 49:(b + 1) * 49, :]                                 # [49, Cf]
        m_b = lax.dot_general(feat_b, hw, (((0,), (0,)), ((), ())),
                              preferred_element_type=f32)                     # [Cf, D]
        img_blocks.append(jnp.maximum(
            jnp.dot(cwt, m_b, preferred_element_type=f32) + hbe, 0.0))        # [S, D]

    # fused sequence: [text rows (batch-major) ; image rows (batch-major)].
    # Attention mask / pooling matrices below encode the row->batch mapping, so this
    # ordering is mathematically identical to the PyTorch [T, B, D] layout.
    x = jnp.concatenate([text_hidden] + img_blocks, axis=0)                   # [BT, D]

    # ---------------- TransformerEncoderLayer (post-norm, ReLU, eval) ----------------
    qkv = jnp.dot(x, wqkv_ref[...], preferred_element_type=f32) + bqkv_ref[...]   # [BT, 3D]
    bias = bias_ref[...]                                                          # [BT, BT]
    wo = wo_ref[...]
    attn = None
    for h in range(H):
        qh = qkv[:, h * hd:(h + 1) * hd]
        kh = qkv[:, D + h * hd:D + (h + 1) * hd]
        vh = qkv[:, 2 * D + h * hd:2 * D + (h + 1) * hd]
        s = lax.dot_general(qh, kh, (((1,), (1,)), ((), ())),
                            preferred_element_type=f32) * scale + bias            # [BT, BT]
        p = _softmax_last(s)
        head = jnp.dot(p, vh, preferred_element_type=f32)                          # [BT, hd]
        contrib = jnp.dot(head, wo[h * hd:(h + 1) * hd, :],
                          preferred_element_type=f32)                              # [BT, D]
        attn = contrib if attn is None else attn + contrib
    attn = attn + bo_ref[...]

    x1 = _layernorm(x + attn, g1_ref[...], b1_ref[...], eps)
    # FFN: the [BT, 2048] intermediate never leaves VMEM
    hmid = jnp.maximum(
        jnp.dot(x1, w1_ref[...], preferred_element_type=f32) + fb1_ref[...], 0.0)
    ff = jnp.dot(hmid, w2_ref[...], preferred_element_type=f32) + fb2_ref[...]
    x2 = _layernorm(x1 + ff, g2_ref[...], b2_ref[...], eps)

    # torch.mean(attention_out, dim=0) as one block-averaging matmul
    attn_mean = jnp.dot(poolt_ref[...], x2, preferred_element_type=f32)             # [B, D]

    # ---------------- classifiers ----------------
    text_in = jnp.concatenate([text_feature, attn_mean], axis=1)                    # [B, 2D]
    img_in = jnp.concatenate([img_feature, attn_mean], axis=1)
    th = jnp.maximum(jnp.dot(text_in, tw1_ref[...], preferred_element_type=f32)
                     + tb1_ref[...], 0.0)
    tl = jnp.dot(th, tw2_ref[...], preferred_element_type=f32) + tb2_ref[...]
    ih = jnp.maximum(jnp.dot(img_in, iw1_ref[...], preferred_element_type=f32)
                     + ib1_ref[...], 0.0)
    il = jnp.dot(ih, iw2_ref[...], preferred_element_type=f32) + ib2_ref[...]

    # matches the PyTorch module: softmax(softmax(text) + softmax(img))
    prob = _softmax_last(_softmax_last(tl) + _softmax_last(il))                     # [B, NL]

    # argmax over labels (first occurrence on ties)
    idx = lax.broadcasted_iota(jnp.int32, prob.shape, 1)
    mx = jnp.max(prob, axis=-1, keepdims=True)
    pred = jnp.min(jnp.where(prob == mx, idx, num_labels),
                   axis=-1, keepdims=True).astype(f32)                              # [B, 1]

    # packed lane-dense [B, 128] output: cols [0:NL]=prob, col NL=pred, rest zero
    out_ref[...] = jnp.zeros_like(out_ref)
    out_ref[:, 0:num_labels] = prob
    out_ref[:, num_labels:num_labels + 1] = pred


# ----------------------------------------------------------------------------
# Config & deterministic parameter init
# ----------------------------------------------------------------------------
class Config:
    middle_hidden_size = 64
    attention_nhead = 2
    img_hidden_seq = 4
    out_hidden_size = 32
    num_labels = 3
    bert_hidden_size = 64          # stand-in BERT hidden size
    resnet_feat_channels = 128     # stand-in for resnet50 fc.in_features (2048)
    dim_feedforward = 2048         # PyTorch TransformerEncoderLayer default
    vocab_size = 100
    text_seq_len = 8


def _w(key, shape, scale=0.05):
    return scale * jax.random.normal(key, shape, dtype=jnp.float32)


def init_params(key, cfg):
    ks = iter(jax.random.split(key, 48))
    D = cfg.middle_hidden_size
    Hb = cfg.bert_hidden_size
    Cf = cfg.resnet_feat_channels
    p = {}
    # --- text backbone stand-in ---
    # TODO(synk): pretrained BERT has no Pallas equivalent; deterministic stand-in params.
    p["emb"] = _w(next(ks), (cfg.vocab_size, Hb))
    p["pool_w"] = _w(next(ks), (Hb, Hb))
    p["pool_b"] = _w(next(ks), (1, Hb))
    p["txt_trans_w"] = _w(next(ks), (Hb, D))
    p["txt_trans_b"] = _w(next(ks), (1, D))
    # --- image backbone stand-in ---
    p["stem_w"] = _w(next(ks), (3, Cf))
    p["stem_b"] = _w(next(ks), (1, Cf))
    p["conv_w"] = _w(next(ks), (Cf, cfg.img_hidden_seq))      # Conv2d(Cf, S, 1) as matmul
    p["conv_b"] = _w(next(ks), (1, cfg.img_hidden_seq))
    p["hid_lin_w"] = _w(next(ks), (49, D))                    # Linear(7*7, D)
    p["hid_lin_b"] = _w(next(ks), (1, D))
    p["img_trans_w"] = _w(next(ks), (Cf, D))
    p["img_trans_b"] = _w(next(ks), (1, D))
    # --- TransformerEncoderLayer (post-norm, ReLU, eval -> dropout = identity) ---
    p["wq"] = _w(next(ks), (D, D)); p["bq"] = _w(next(ks), (1, D))
    p["wk"] = _w(next(ks), (D, D)); p["bk"] = _w(next(ks), (1, D))
    p["wv"] = _w(next(ks), (D, D)); p["bv"] = _w(next(ks), (1, D))
    p["wo"] = _w(next(ks), (D, D)); p["bo"] = _w(next(ks), (1, D))
    p["ln1_g"] = jnp.ones((1, D), jnp.float32)
    p["ln1_b"] = jnp.zeros((1, D), jnp.float32)
    p["ff1_w"] = _w(next(ks), (D, cfg.dim_feedforward))
    p["ff1_b"] = _w(next(ks), (1, cfg.dim_feedforward))
    p["ff2_w"] = _w(next(ks), (cfg.dim_feedforward, D))
    p["ff2_b"] = _w(next(ks), (1, D))
    p["ln2_g"] = jnp.ones((1, D), jnp.float32)
    p["ln2_b"] = jnp.zeros((1, D), jnp.float32)
    # --- classifiers ---
    for name in ("text_cls", "img_cls"):
        p[f"{name}_w1"] = _w(next(ks), (2 * D, cfg.out_hidden_size))
        p[f"{name}_b1"] = _w(next(ks), (1, cfg.out_hidden_size))
        p[f"{name}_w2"] = _w(next(ks), (cfg.out_hidden_size, cfg.num_labels))
        p[f"{name}_b2"] = _w(next(ks), (1, cfg.num_labels))
    return p


# ----------------------------------------------------------------------------
# Model forward (everything after the backbone stand-ins runs in ONE pallas_call)
# ----------------------------------------------------------------------------
OUT_W = 128  # lane-dense packed output width


def model_forward(p, cfg, texts, texts_mask, imgs):
    B, L = texts.shape
    C = imgs.shape[1]
    D = cfg.middle_hidden_size
    S = cfg.img_hidden_seq
    H = cfg.attention_nhead
    hd = D // H
    T = L + S
    NL = cfg.num_labels

    # ---- backbone stand-ins (trace-time / XLA preprocessing) ----
    # TODO(synk): pretrained BERT backbone replaced by deterministic masked-embedding stand-in.
    hidden = jnp.take(p["emb"], texts, axis=0) * texts_mask[:, :, None]       # [B, L, Hb]
    hid_flat = hidden.reshape(B * L, -1)
    first_tok = hidden[:, 0, :]

    # TODO(synk): pretrained ResNet50 backbone replaced by 8x8 patch-average stand-in.
    ph, pw = imgs.shape[2] // 7, imgs.shape[3] // 7
    patches = imgs.reshape(B, C, 7, ph, 7, pw).mean(axis=(3, 5))              # [B, C, 7, 7]
    patches2d = patches.transpose(0, 2, 3, 1).reshape(B * 49, C)              # [B*49, C]

    # ---- constant layout matrices (row -> batch bookkeeping) ----
    ids = jnp.concatenate([jnp.repeat(jnp.arange(B), L),
                           jnp.repeat(jnp.arange(B), S)])                     # [B*T]
    attn_bias = jnp.where(ids[:, None] == ids[None, :], 0.0, -1e9).astype(jnp.float32)
    pool_t = (ids[None, :] == jnp.arange(B)[:, None]).astype(jnp.float32) / float(T)
    img_ids = jnp.repeat(jnp.arange(B), 49)
    pool_i = (img_ids[None, :] == jnp.arange(B)[:, None]).astype(jnp.float32) / 49.0

    # ---- parameter repacking (layout only, done at trace time) ----
    wqkv = jnp.concatenate([p["wq"], p["wk"], p["wv"]], axis=1)               # [D, 3D]
    bqkv = jnp.concatenate([p["bq"], p["bk"], p["bv"]], axis=1)               # [1, 3D]
    cw_t = p["conv_w"].T                                                      # [S, Cf]
    hb_eff = p["hid_lin_b"] + jnp.dot(
        p["conv_b"].T, jnp.sum(p["hid_lin_w"], axis=0, keepdims=True))        # [S, D]

    kernel = functools.partial(
        _fused_forward_kernel, B=B, H=H, D=D, hd=hd,
        scale=1.0 / math.sqrt(hd), eps=1e-5, num_labels=NL)

    args = (hid_flat, first_tok, patches2d, attn_bias, pool_t, pool_i,
            p["pool_w"], p["pool_b"], p["txt_trans_w"], p["txt_trans_b"],
            p["stem_w"], p["stem_b"], cw_t, p["hid_lin_w"], hb_eff,
            p["img_trans_w"], p["img_trans_b"],
            wqkv, bqkv, p["wo"], p["bo"], p["ln1_g"], p["ln1_b"],
            p["ff1_w"], p["ff1_b"], p["ff2_w"], p["ff2_b"], p["ln2_g"], p["ln2_b"],
            p["text_cls_w1"], p["text_cls_b1"], p["text_cls_w2"], p["text_cls_b2"],
            p["img_cls_w1"], p["img_cls_b1"], p["img_cls_w2"], p["img_cls_b2"])

    vmem_spec = pl.BlockSpec(memory_space=pltpu.MemorySpace.VMEM)
    out = pl.pallas_call(
        kernel,
        out_shape=jax.ShapeDtypeStruct((B, OUT_W), jnp.float32),
        in_specs=[vmem_spec] * len(args),
        out_specs=vmem_spec,
    )(*args)

    prob_vec = out[:, :NL]
    pred_labels = out[:, NL].astype(jnp.int32)
    # TODO(synk): labels / CrossEntropyLoss branch not implemented (inference path only).
    return pred_labels, prob_vec


# ----------------------------------------------------------------------------
if __name__ == "__main__":
    cfg = Config()
    key = jax.random.PRNGKey(0)
    kp, kt, km, ki = jax.random.split(key, 4)

    params = init_params(kp, cfg)

    B = 2
    texts = jax.random.randint(kt, (B, cfg.text_seq_len), 0, cfg.vocab_size, dtype=jnp.int32)
    texts_mask = (jax.random.uniform(km, (B, cfg.text_seq_len)) > 0.1).astype(jnp.float32)
    imgs = jax.random.normal(ki, (B, 3, 56, 56), dtype=jnp.float32)

    fwd = jax.jit(lambda p_, t_, m_, i_: model_forward(p_, cfg, t_, m_, i_))
    pred_labels, prob_vec = fwd(params, texts, texts_mask, imgs)
    jax.block_until_ready((pred_labels, prob_vec))

    assert pred_labels.shape == (B,)
    assert prob_vec.shape == (B, cfg.num_labels)
    assert bool(jnp.all(jnp.isfinite(prob_vec)))
    assert bool(jnp.all((pred_labels >= 0) & (pred_labels < cfg.num_labels)))
    print("KERNEL_OK")
</pallas_src>

<mosaic_0001>
module attributes {stable_mosaic.version = 11 : i64} {
  func.func @_fused_forward_kernel(%arg0: memref<16x64xf32, #tpu.memory_space<vmem>>, %arg1: memref<2x64xf32, #tpu.memory_space<vmem>>, %arg2: memref<98x3xf32, #tpu.memory_space<vmem>>, %arg3: memref<24x24xf32, #tpu.memory_space<vmem>>, %arg4: memref<2x24xf32, #tpu.memory_space<vmem>>, %arg5: memref<2x98xf32, #tpu.memory_space<vmem>>, %arg6: memref<64x64xf32, #tpu.memory_space<vmem>>, %arg7: memref<1x64xf32, #tpu.memory_space<vmem>>, %arg8: memref<64x64xf32, #tpu.memory_space<vmem>>, %arg9: memref<1x64xf32, #tpu.memory_space<vmem>>, %arg10: memref<3x128xf32, #tpu.memory_space<vmem>>, %arg11: memref<1x128xf32, #tpu.memory_space<vmem>>, %arg12: memref<4x128xf32, #tpu.memory_space<vmem>>, %arg13: memref<49x64xf32, #tpu.memory_space<vmem>>, %arg14: memref<4x64xf32, #tpu.memory_space<vmem>>, %arg15: memref<128x64xf32, #tpu.memory_space<vmem>>, %arg16: memref<1x64xf32, #tpu.memory_space<vmem>>, %arg17: memref<64x192xf32, #tpu.memory_space<vmem>>, %arg18: memref<1x192xf32, #tpu.memory_space<vmem>>, %arg19: memref<64x64xf32, #tpu.memory_space<vmem>>, %arg20: memref<1x64xf32, #tpu.memory_space<vmem>>, %arg21: memref<1x64xf32, #tpu.memory_space<vmem>>, %arg22: memref<1x64xf32, #tpu.memory_space<vmem>>, %arg23: memref<64x2048xf32, #tpu.memory_space<vmem>>, %arg24: memref<1x2048xf32, #tpu.memory_space<vmem>>, %arg25: memref<2048x64xf32, #tpu.memory_space<vmem>>, %arg26: memref<1x64xf32, #tpu.memory_space<vmem>>, %arg27: memref<1x64xf32, #tpu.memory_space<vmem>>, %arg28: memref<1x64xf32, #tpu.memory_space<vmem>>, %arg29: memref<128x32xf32, #tpu.memory_space<vmem>>, %arg30: memref<1x32xf32, #tpu.memory_space<vmem>>, %arg31: memref<32x3xf32, #tpu.memory_space<vmem>>, %arg32: memref<1x3xf32, #tpu.memory_space<vmem>>, %arg33: memref<128x32xf32, #tpu.memory_space<vmem>>, %arg34: memref<1x32xf32, #tpu.memory_space<vmem>>, %arg35: memref<32x3xf32, #tpu.memory_space<vmem>>, %arg36: memref<1x3xf32, #tpu.memory_space<vmem>>, %arg37: memref<2x128xf32, #tpu.memory_space<vmem>>) attributes {dimension_semantics = [], scalar_prefetch = 0 : i64, scratch_operands = 0 : i64, tpu.core_type = #tpu.core_type<tc>} {
    %c0 = arith.constant 0 : index
    %c0_0 = arith.constant 0 : index
    %0 = vector.load %arg8[%c0, %c0_0] : memref<64x64xf32, #tpu.memory_space<vmem>>, vector<64x64xf32>
    %c0_1 = arith.constant 0 : index
    %c0_2 = arith.constant 0 : index
    %1 = vector.load %arg9[%c0_1, %c0_2] : memref<1x64xf32, #tpu.memory_space<vmem>>, vector<1x64xf32>
    %c0_3 = arith.constant 0 : index
    %c0_4 = arith.constant 0 : index
    %2 = vector.load %arg1[%c0_3, %c0_4] : memref<2x64xf32, #tpu.memory_space<vmem>>, vector<2x64xf32>
    %c0_5 = arith.constant 0 : index
    %c0_6 = arith.constant 0 : index
    %3 = vector.load %arg6[%c0_5, %c0_6] : memref<64x64xf32, #tpu.memory_space<vmem>>, vector<64x64xf32>
    %cst = arith.constant dense<0.000000e+00> : vector<2x64xf32>
    %4 = tpu.matmul %2, %3, %cst {dimension_numbers = #tpu.dot_dimension_numbers<[1], [0], [0], [1], [0, 0, 1, 1], [], []>} : vector<2x64xf32>, vector<64x64xf32>, vector<2x64xf32> -> vector<2x64xf32>
    %c0_7 = arith.constant 0 : index
    %c0_8 = arith.constant 0 : index
    %5 = vector.load %arg7[%c0_7, %c0_8] : memref<1x64xf32, #tpu.memory_space<vmem>>, vector<1x64xf32>
    %6 = vector.broadcast %5 : vector<1x64xf32> to vector<2x64xf32>
    %7 = arith.addf %4, %6 : vector<2x64xf32>
    %8 = math.tanh %7 : vector<2x64xf32>
    %c0_9 = arith.constant 0 : index
    %c0_10 = arith.constant 0 : index
    %9 = vector.load %arg0[%c0_9, %c0_10] : memref<16x64xf32, #tpu.memory_space<vmem>>, vector<16x64xf32>
    %cst_11 = arith.constant dense<0.000000e+00> : vector<16x64xf32>
    %10 = tpu.matmul %9, %0, %cst_11 {dimension_numbers = #tpu.dot_dimension_numbers<[1], [0], [0], [1], [0, 0, 1, 1], [], []>} : vector<16x64xf32>, vector<64x64xf32>, vector<16x64xf32> -> vector<16x64xf32>
    %11 = vector.broadcast %1 : vector<1x64xf32> to vector<16x64xf32>
    %12 = arith.addf %10, %11 : vector<16x64xf32>
    %cst_12 = arith.constant 0.000000e+00 : f32
    %13 = vector.broadcast %cst_12 : f32 to vector<16x64xf32>
    %14 = arith.maximumf %12, %13 : vector<16x64xf32>
    %cst_13 = arith.constant dense<0.000000e+00> : vector<2x64xf32>
    %15 = tpu.matmul %8, %0, %cst_13 {dimension_numbers = #tpu.dot_dimension_numbers<[1], [0], [0], [1], [0, 0, 1, 1], [], []>} : vector<2x64xf32>, vector<64x64xf32>, vector<2x64xf32> -> vector<2x64xf32>
    %16 = vector.broadcast %1 : vector<1x64xf32> to vector<2x64xf32>
    %17 = arith.addf %15, %16 : vector<2x64xf32>
    %cst_14 = arith.constant 0.000000e+00 : f32
    %18 = vector.broadcast %cst_14 : f32 to vector<2x64xf32>
    %19 = arith.maximumf %17, %18 : vector<2x64xf32>
    %c0_15 = arith.constant 0 : index
    %c0_16 = arith.constant 0 : index
    %20 = vector.load %arg2[%c0_15, %c0_16] : memref<98x3xf32, #tpu.memory_space<vmem>>, vector<98x3xf32>
    %c0_17 = arith.constant 0 : index
    %c0_18 = arith.constant 0 : index
    %21 = vector.load %arg10[%c0_17, %c0_18] : memref<3x128xf32, #tpu.memory_space<vmem>>, vector<3x128xf32>
    %cst_19 = arith.constant dense<0.000000e+00> : vector<98x128xf32>
    %22 = tpu.matmul %20, %21, %cst_19 {dimension_numbers = #tpu.dot_dimension_numbers<[1], [0], [0], [1], [0, 0, 1, 1], [], []>} : vector<98x3xf32>, vector<3x128xf32>, vector<98x128xf32> -> vector<98x128xf32>
    %c0_20 = arith.constant 0 : index
    %c0_21 = arith.constant 0 : index
    %23 = vector.load %arg11[%c0_20, %c0_21] : memref<1x128xf32, #tpu.memory_space<vmem>>, vector<1x128xf32>
    %24 = vector.broadcast %23 : vector<1x128xf32> to vector<98x128xf32>
    %25 = arith.addf %22, %24 : vector<98x128xf32>
    %cst_22 = arith.constant 0.000000e+00 : f32
    %26 = vector.broadcast %cst_22 : f32 to vector<98x128xf32>
    %27 = arith.maximumf %25, %26 : vector<98x128xf32>
    %c0_23 = arith.constant 0 : index
    %c0_24 = arith.constant 0 : index
    %28 = vector.load %arg5[%c0_23, %c0_24] : memref<2x98xf32, #tpu.memory_space<vmem>>, vector<2x98xf32>
    %cst_25 = arith.constant dense<0.000000e+00> : vector<2x128xf32>
    %29 = tpu.matmul %28, %27, %cst_25 {dimension_numbers = #tpu.dot_dimension_numbers<[1], [0], [0], [1], [0, 0, 1, 1], [], []>} : vector<2x98xf32>, vector<98x128xf32>, vector<2x128xf32> -> vector<2x128xf32>
    %c0_26 = arith.constant 0 : index
    %c0_27 = arith.constant 0 : index
    %30 = vector.load %arg15[%c0_26, %c0_27] : memref<128x64xf32, #tpu.memory_space<vmem>>, vector<128x64xf32>
    %cst_28 = arith.constant dense<0.000000e+00> : vector<2x64xf32>
    %31 = tpu.matmul %29, %30, %cst_28 {dimension_numbers = #tpu.dot_dimension_numbers<[1], [0], [0], [1], [0, 0, 1, 1], [], []>} : vector<2x128xf32>, vector<128x64xf32>, vector<2x64xf32> -> vector<2x64xf32>
    %c0_29 = arith.constant 0 : index
    %c0_30 = arith.constant 0 : index
    %32 = vector.load %arg16[%c0_29, %c0_30] : memref<1x64xf32, #tpu.memory_space<vmem>>, vector<1x64xf32>
    %33 = vector.broadcast %32 : vector<1x64xf32> to vector<2x64xf32>
    %34 = arith.addf %31, %33 : vector<2x64xf32>
    %cst_31 = arith.constant 0.000000e+00 : f32
    %35 = vector.broadcast %cst_31 : f32 to vector<2x64xf32>
    %36 = arith.maximumf %34, %35 : vector<2x64xf32>
    %c0_32 = arith.constant 0 : index
    %c0_33 = arith.constant 0 : index
    %37 = vector.load %arg13[%c0_32, %c0_33] : memref<49x64xf32, #tpu.memory_space<vmem>>, vector<49x64xf32>
    %c0_34 = arith.constant 0 : index
    %c0_35 = arith.constant 0 : index
    %38 = vector.load %arg12[%c0_34, %c0_35] : memref<4x128xf32, #tpu.memory_space<vmem>>, vector<4x128xf32>
    %c0_36 = arith.constant 0 : index
    %c0_37 = arith.constant 0 : index
    %39 = vector.load %arg14[%c0_36, %c0_37] : memref<4x64xf32, #tpu.memory_space<vmem>>, vector<4x64xf32>
    %40 = vector.extract_strided_slice %27 {offsets = [0, 0], sizes = [49, 128], strides = [1, 1]} : vector<98x128xf32> to vector<49x128xf32>
    %cst_38 = arith.constant dense<0.000000e+00> : vector<128x64xf32>
    %41 = tpu.matmul %40, %37, %cst_38 {dimension_numbers = #tpu.dot_dimension_numbers<[0], [0], [1], [1], [0, 1, 1, 1], [], []>} : vector<49x128xf32>, vector<49x64xf32>, vector<128x64xf32> -> vector<128x64xf32>
    %cst_39 = arith.constant dense<0.000000e+00> : vector<4x64xf32>
    %42 = tpu.matmul %38, %41, %cst_39 {dimension_numbers = #tpu.dot_dimension_numbers<[1], [0], [0], [1], [0, 0, 1, 1], [], []>} : vector<4x128xf32>, vector<128x64xf32>, vector<4x64xf32> -> vector<4x64xf32>
    %43 = arith.addf %42, %39 : vector<4x64xf32>
    %cst_40 = arith.constant 0.000000e+00 : f32
    %44 = vector.broadcast %cst_40 : f32 to vector<4x64xf32>
    %45 = arith.maximumf %43, %44 : vector<4x64xf32>
    %46 = vector.extract_strided_slice %27 {offsets = [49, 0], sizes = [49, 128], strides = [1, 1]} : vector<98x128xf32> to vector<49x128xf32>
    %cst_41 = arith.constant dense<0.000000e+00> : vector<128x64xf32>
    %47 = tpu.matmul %46, %37, %cst_41 {dimension_numbers = #tpu.dot_dimension_numbers<[0], [0], [1], [1], [0, 1, 1, 1], [], []>} : vector<49x128xf32>, vector<49x64xf32>, vector<128x64xf32> -> vector<128x64xf32>
    %cst_42 = arith.constant dense<0.000000e+00> : vector<4x64xf32>
    %48 = tpu.matmul %38, %47, %cst_42 {dimension_numbers = #tpu.dot_dimension_numbers<[1], [0], [0], [1], [0, 0, 1, 1], [], []>} : vector<4x128xf32>, vector<128x64xf32>, vector<4x64xf32> -> vector<4x64xf32>
    %49 = arith.addf %48, %39 : vector<4x64xf32>
    %cst_43 = arith.constant 0.000000e+00 : f32
    %50 = vector.broadcast %cst_43 : f32 to vector<4x64xf32>
    %51 = arith.maximumf %49, %50 : vector<4x64xf32>
    %52 = tpu.concatenate %14, %45, %51 in 0 : vector<16x64xf32>, vector<4x64xf32>, vector<4x64xf32> -> vector<24x64xf32>
    %c0_44 = arith.constant 0 : index
    %c0_45 = arith.constant 0 : index
    %53 = vector.load %arg17[%c0_44, %c0_45] : memref<64x192xf32, #tpu.memory_space<vmem>>, vector<64x192xf32>
    %cst_46 = arith.constant dense<0.000000e+00> : vector<24x192xf32>
    %54 = tpu.matmul %52, %53, %cst_46 {dimension_numbers = #tpu.dot_dimension_numbers<[1], [0], [0], [1], [0, 0, 1, 1], [], []>} : vector<24x64xf32>, vector<64x192xf32>, vector<24x192xf32> -> vector<24x192xf32>
    %c0_47 = arith.constant 0 : index
    %c0_48 = arith.constant 0 : index
    %55 = vector.load %arg18[%c0_47, %c0_48] : memref<1x192xf32, #tpu.memory_space<vmem>>, vector<1x192xf32>
    %56 = vector.broadcast %55 : vector<1x192xf32> to vector<24x192xf32>
    %57 = arith.addf %54, %56 : vector<24x192xf32>
    %c0_49 = arith.constant 0 : index
    %c0_50 = arith.constant 0 : index
    %58 = vector.load %arg3[%c0_49, %c0_50] : memref<24x24xf32, #tpu.memory_space<vmem>>, vector<24x24xf32>
    %c0_51 = arith.constant 0 : index
    %c0_52 = arith.constant 0 : index
    %59 = vector.load %arg19[%c0_51, %c0_52] : memref<64x64xf32, #tpu.memory_space<vmem>>, vector<64x64xf32>
    %60 = vector.extract_strided_slice %57 {offsets = [0, 0], sizes = [24, 32], strides = [1, 1]} : vector<24x192xf32> to vector<24x32xf32>
    %61 = vector.extract_strided_slice %57 {offsets = [0, 64], sizes = [24, 32], strides = [1, 1]} : vector<24x192xf32> to vector<24x32xf32>
    %62 = vector.extract_strided_slice %57 {offsets = [0, 128], sizes = [24, 32], strides = [1, 1]} : vector<24x192xf32> to vector<24x32xf32>
    %cst_53 = arith.constant dense<0.000000e+00> : vector<24x24xf32>
    %63 = tpu.matmul %60, %61, %cst_53 {dimension_numbers = #tpu.dot_dimension_numbers<[1], [1], [0], [0], [0, 0, 1, 0], [], []>} : vector<24x32xf32>, vector<24x32xf32>, vector<24x24xf32> -> vector<24x24xf32>
    %cst_54 = arith.constant 0.176776692 : f32
    %64 = vector.broadcast %cst_54 : f32 to vector<24x24xf32>
    %65 = arith.mulf %63, %64 : vector<24x24xf32>
    %66 = arith.addf %65, %58 : vector<24x24xf32>
    %cst_55 = arith.constant dense<0xFF800000> : vector<24xf32>
    %67 = vector.multi_reduction <maximumf>, %66, %cst_55 [1] : vector<24x24xf32> to vector<24xf32>
    %68 = vector.shape_cast %67 : vector<24xf32> to vector<24x1xf32>
    %69 = vector.broadcast %68 : vector<24x1xf32> to vector<24x24xf32>
    %70 = arith.subf %66, %69 : vector<24x24xf32>
    %71 = math.exp %70 : vector<24x24xf32>
    %cst_56 = arith.constant dense<0.000000e+00> : vector<24xf32>
    %72 = vector.multi_reduction <add>, %71, %cst_56 [1] : vector<24x24xf32> to vector<24xf32>
    %73 = vector.shape_cast %72 : vector<24xf32> to vector<24x1xf32>
    %74 = tpu.reciprocal %73 {approx = true} : vector<24x1xf32> -> vector<24x1xf32>
    %75 = vector.broadcast %74 : vector<24x1xf32> to vector<24x24xf32>
    %76 = arith.mulf %71, %75 : vector<24x24xf32>
    %cst_57 = arith.constant dense<0.000000e+00> : vector<24x32xf32>
    %77 = tpu.matmul %76, %62, %cst_57 {dimension_numbers = #tpu.dot_dimension_numbers<[1], [0], [0], [1], [0, 0, 1, 1], [], []>} : vector<24x24xf32>, vector<24x32xf32>, vector<24x32xf32> -> vector<24x32xf32>
    %78 = vector.extract_strided_slice %59 {offsets = [0, 0], sizes = [32, 64], strides = [1, 1]} : vector<64x64xf32> to vector<32x64xf32>
    %cst_58 = arith.constant dense<0.000000e+00> : vector<24x64xf32>
    %79 = tpu.matmul %77, %78, %cst_58 {dimension_numbers = #tpu.dot_dimension_numbers<[1], [0], [0], [1], [0, 0, 1, 1], [], []>} : vector<24x32xf32>, vector<32x64xf32>, vector<24x64xf32> -> vector<24x64xf32>
    %80 = vector.extract_strided_slice %57 {offsets = [0, 32], sizes = [24, 32], strides = [1, 1]} : vector<24x192xf32> to vector<24x32xf32>
    %81 = vector.extract_strided_slice %57 {offsets = [0, 96], sizes = [24, 32], strides = [1, 1]} : vector<24x192xf32> to vector<24x32xf32>
    %82 = vector.extract_strided_slice %57 {offsets = [0, 160], sizes = [24, 32], strides = [1, 1]} : vector<24x192xf32> to vector<24x32xf32>
    %cst_59 = arith.constant dense<0.000000e+00> : vector<24x24xf32>
    %83 = tpu.matmul %80, %81, %cst_59 {dimension_numbers = #tpu.dot_dimension_numbers<[1], [1], [0], [0], [0, 0, 1, 0], [], []>} : vector<24x32xf32>, vector<24x32xf32>, vector<24x24xf32> -> vector<24x24xf32>
    %cst_60 = arith.constant 0.176776692 : f32
    %84 = vector.broadcast %cst_60 : f32 to vector<24x24xf32>
    %85 = arith.mulf %83, %84 : vector<24x24xf32>
    %86 = arith.addf %85, %58 : vector<24x24xf32>
    %cst_61 = arith.constant dense<0xFF800000> : vector<24xf32>
    %87 = vector.multi_reduction <maximumf>, %86, %cst_61 [1] : vector<24x24xf32> to vector<24xf32>
    %88 = vector.shape_cast %87 : vector<24xf32> to vector<24x1xf32>
    %89 = vector.broadcast %88 : vector<24x1xf32> to vector<24x24xf32>
    %90 = arith.subf %86, %89 : vector<24x24xf32>
    %91 = math.exp %90 : vector<24x24xf32>
    %cst_62 = arith.constant dense<0.000000e+00> : vector<24xf32>
    %92 = vector.multi_reduction <add>, %91, %cst_62 [1] : vector<24x24xf32> to vector<24xf32>
    %93 = vector.shape_cast %92 : vector<24xf32> to vector<24x1xf32>
    %94 = tpu.reciprocal %93 {approx = true} : vector<24x1xf32> -> vector<24x1xf32>
    %95 = vector.broadcast %94 : vector<24x1xf32> to vector<24x24xf32>
    %96 = arith.mulf %91, %95 : vector<24x24xf32>
    %cst_63 = arith.constant dense<0.000000e+00> : vector<24x32xf32>
    %97 = tpu.matmul %96, %82, %cst_63 {dimension_numbers = #tpu.dot_dimension_numbers<[1], [0], [0], [1], [0, 0, 1, 1], [], []>} : vector<24x24xf32>, vector<24x32xf32>, vector<24x32xf32> -> vector<24x32xf32>
    %98 = vector.extract_strided_slice %59 {offsets = [32, 0], sizes = [32, 64], strides = [1, 1]} : vector<64x64xf32> to vector<32x64xf32>
    %cst_64 = arith.constant dense<0.000000e+00> : vector<24x64xf32>
    %99 = tpu.matmul %97, %98, %cst_64 {dimension_numbers = #tpu.dot_dimension_numbers<[1], [0], [0], [1], [0, 0, 1, 1], [], []>} : vector<24x32xf32>, vector<32x64xf32>, vector<24x64xf32> -> vector<24x64xf32>
    %100 = arith.addf %79, %99 : vector<24x64xf32>
    %c0_65 = arith.constant 0 : index
    %c0_66 = arith.constant 0 : index
    %101 = vector.load %arg20[%c0_65, %c0_66] : memref<1x64xf32, #tpu.memory_space<vmem>>, vector<1x64xf32>
    %102 = vector.broadcast %101 : vector<1x64xf32> to vector<24x64xf32>
    %103 = arith.addf %100, %102 : vector<24x64xf32>
    %104 = arith.addf %52, %103 : vector<24x64xf32>
    %c0_67 = arith.constant 0 : index
    %c0_68 = arith.constant 0 : index
    %105 = vector.load %arg21[%c0_67, %c0_68] : memref<1x64xf32, #tpu.memory_space<vmem>>, vector<1x64xf32>
    %c0_69 = arith.constant 0 : index
    %c0_70 = arith.constant 0 : index
    %106 = vector.load %arg22[%c0_69, %c0_70] : memref<1x64xf32, #tpu.memory_space<vmem>>, vector<1x64xf32>
    %cst_71 = arith.constant dense<0.000000e+00> : vector<24xf32>
    %107 = vector.multi_reduction <add>, %104, %cst_71 [1] : vector<24x64xf32> to vector<24xf32>
    %108 = vector.shape_cast %107 : vector<24xf32> to vector<24x1xf32>
    %cst_72 = arith.constant 6.400000e+01 : f32
    %109 = vector.broadcast %cst_72 : f32 to vector<24x1xf32>
    %110 = arith.divf %108, %109 : vector<24x1xf32>
    %111 = vector.broadcast %110 : vector<24x1xf32> to vector<24x64xf32>
    %112 = arith.subf %104, %111 : vector<24x64xf32>
    %113 = arith.mulf %112, %112 : vector<24x64xf32>
    %cst_73 = arith.constant dense<0.000000e+00> : vector<24xf32>
    %114 = vector.multi_reduction <add>, %113, %cst_73 [1] : vector<24x64xf32> to vector<24xf32>
    %115 = vector.shape_cast %114 : vector<24xf32> to vector<24x1xf32>
    %cst_74 = arith.constant 6.400000e+01 : f32
    %116 = vector.broadcast %cst_74 : f32 to vector<24x1xf32>
    %117 = arith.divf %115, %116 : vector<24x1xf32>
    %cst_75 = arith.constant 9.99999974E-6 : f32
    %118 = vector.broadcast %cst_75 : f32 to vector<24x1xf32>
    %119 = arith.addf %117, %118 : vector<24x1xf32>
    %120 = math.rsqrt %119 : vector<24x1xf32>
    %121 = vector.broadcast %120 : vector<24x1xf32> to vector<24x64xf32>
    %122 = arith.mulf %112, %121 : vector<24x64xf32>
    %123 = vector.broadcast %105 : vector<1x64xf32> to vector<24x64xf32>
    %124 = arith.mulf %122, %123 : vector<24x64xf32>
    %125 = vector.broadcast %106 : vector<1x64xf32> to vector<24x64xf32>
    %126 = arith.addf %124, %125 : vector<24x64xf32>
    %c0_76 = arith.constant 0 : index
    %c0_77 = arith.constant 0 : index
    %127 = vector.load %arg23[%c0_76, %c0_77] : memref<64x2048xf32, #tpu.memory_space<vmem>>, vector<64x2048xf32>
    %cst_78 = arith.constant dense<0.000000e+00> : vector<24x2048xf32>
    %128 = tpu.matmul %126, %127, %cst_78 {dimension_numbers = #tpu.dot_dimension_numbers<[1], [0], [0], [1], [0, 0, 1, 1], [], []>} : vector<24x64xf32>, vector<64x2048xf32>, vector<24x2048xf32> -> vector<24x2048xf32>
    %c0_79 = arith.constant 0 : index
    %c0_80 = arith.constant 0 : index
    %129 = vector.load %arg24[%c0_79, %c0_80] : memref<1x2048xf32, #tpu.memory_space<vmem>>, vector<1x2048xf32>
    %130 = vector.broadcast %129 : vector<1x2048xf32> to vector<24x2048xf32>
    %131 = arith.addf %128, %130 : vector<24x2048xf32>
    %cst_81 = arith.constant 0.000000e+00 : f32
    %132 = vector.broadcast %cst_81 : f32 to vector<24x2048xf32>
    %133 = arith.maximumf %131, %132 : vector<24x2048xf32>
    %c0_82 = arith.constant 0 : index
    %c0_83 = arith.constant 0 : index
    %134 = vector.load %arg25[%c0_82, %c0_83] : memref<2048x64xf32, #tpu.memory_space<vmem>>, vector<2048x64xf32>
    %cst_84 = arith.constant dense<0.000000e+00> : vector<24x64xf32>
    %135 = tpu.matmul %133, %134, %cst_84 {dimension_numbers = #tpu.dot_dimension_numbers<[1], [0], [0], [1], [0, 0, 1, 1], [], []>} : vector<24x2048xf32>, vector<2048x64xf32>, vector<24x64xf32> -> vector<24x64xf32>
    %c0_85 = arith.constant 0 : index
    %c0_86 = arith.constant 0 : index
    %136 = vector.load %arg26[%c0_85, %c0_86] : memref<1x64xf32, #tpu.memory_space<vmem>>, vector<1x64xf32>
    %137 = vector.broadcast %136 : vector<1x64xf32> to vector<24x64xf32>
    %138 = arith.addf %135, %137 : vector<24x64xf32>
    %139 = arith.addf %126, %138 : vector<24x64xf32>
    %c0_87 = arith.constant 0 : index
    %c0_88 = arith.constant 0 : index
    %140 = vector.load %arg27[%c0_87, %c0_88] : memref<1x64xf32, #tpu.memory_space<vmem>>, vector<1x64xf32>
    %c0_89 = arith.constant 0 : index
    %c0_90 = arith.constant 0 : index
    %141 = vector.load %arg28[%c0_89, %c0_90] : memref<1x64xf32, #tpu.memory_space<vmem>>, vector<1x64xf32>
    %cst_91 = arith.constant dense<0.000000e+00> : vector<24xf32>
    %142 = vector.multi_reduction <add>, %139, %cst_91 [1] : vector<24x64xf32> to vector<24xf32>
    %143 = vector.shape_cast %142 : vector<24xf32> to vector<24x1xf32>
    %cst_92 = arith.constant 6.400000e+01 : f32
    %144 = vector.broadcast %cst_92 : f32 to vector<24x1xf32>
    %145 = arith.divf %143, %144 : vector<24x1xf32>
    %146 = vector.broadcast %145 : vector<24x1xf32> to vector<24x64xf32>
    %147 = arith.subf %139, %146 : vector<24x64xf32>
    %148 = arith.mulf %147, %147 : vector<24x64xf32>
    %cst_93 = arith.constant dense<0.000000e+00> : vector<24xf32>
    %149 = vector.multi_reduction <add>, %148, %cst_93 [1] : vector<24x64xf32> to vector<24xf32>
    %150 = vector.shape_cast %149 : vector<24xf32> to vector<24x1xf32>
    %cst_94 = arith.constant 6.400000e+01 : f32
    %151 = vector.broadcast %cst_94 : f32 to vector<24x1xf32>
    %152 = arith.divf %150, %151 : vector<24x1xf32>
    %cst_95 = arith.constant 9.99999974E-6 : f32
    %153 = vector.broadcast %cst_95 : f32 to vector<24x1xf32>
    %154 = arith.addf %152, %153 : vector<24x1xf32>
    %155 = math.rsqrt %154 : vector<24x1xf32>
    %156 = vector.broadcast %155 : vector<24x1xf32> to vector<24x64xf32>
    %157 = arith.mulf %147, %156 : vector<24x64xf32>
    %158 = vector.broadcast %140 : vector<1x64xf32> to vector<24x64xf32>
    %159 = arith.mulf %157, %158 : vector<24x64xf32>
    %160 = vector.broadcast %141 : vector<1x64xf32> to vector<24x64xf32>
    %161 = arith.addf %159, %160 : vector<24x64xf32>
    %c0_96 = arith.constant 0 : index
    %c0_97 = arith.constant 0 : index
    %162 = vector.load %arg4[%c0_96, %c0_97] : memref<2x24xf32, #tpu.memory_space<vmem>>, vector<2x24xf32>
    %cst_98 = arith.constant dense<0.000000e+00> : vector<2x64xf32>
    %163 = tpu.matmul %162, %161, %cst_98 {dimension_numbers = #tpu.dot_dimension_numbers<[1], [0], [0], [1], [0, 0, 1, 1], [], []>} : vector<2x24xf32>, vector<24x64xf32>, vector<2x64xf32> -> vector<2x64xf32>
    %164 = tpu.concatenate %19, %163 in 1 : vector<2x64xf32>, vector<2x64xf32> -> vector<2x128xf32>
    %165 = tpu.concatenate %36, %163 in 1 : vector<2x64xf32>, vector<2x64xf32> -> vector<2x128xf32>
    %c0_99 = arith.constant 0 : index
    %c0_100 = arith.constant 0 : index
    %166 = vector.load %arg29[%c0_99, %c0_100] : memref<128x32xf32, #tpu.memory_space<vmem>>, vector<128x32xf32>
    %cst_101 = arith.constant dense<0.000000e+00> : vector<2x32xf32>
    %167 = tpu.matmul %164, %166, %cst_101 {dimension_numbers = #tpu.dot_dimension_numbers<[1], [0], [0], [1], [0, 0, 1, 1], [], []>} : vector<2x128xf32>, vector<128x32xf32>, vector<2x32xf32> -> vector<2x32xf32>
    %c0_102 = arith.constant 0 : index
    %c0_103 = arith.constant 0 : index
    %168 = vector.load %arg30[%c0_102, %c0_103] : memref<1x32xf32, #tpu.memory_space<vmem>>, vector<1x32xf32>
    %169 = vector.broadcast %168 : vector<1x32xf32> to vector<2x32xf32>
    %170 = arith.addf %167, %169 : vector<2x32xf32>
    %cst_104 = arith.constant 0.000000e+00 : f32
    %171 = vector.broadcast %cst_104 : f32 to vector<2x32xf32>
    %172 = arith.maximumf %170, %171 : vector<2x32xf32>
    %c0_105 = arith.constant 0 : index
    %c0_106 = arith.constant 0 : index
    %173 = vector.load %arg31[%c0_105, %c0_106] : memref<32x3xf32, #tpu.memory_space<vmem>>, vector<32x3xf32>
    %cst_107 = arith.constant dense<0.000000e+00> : vector<2x3xf32>
    %174 = tpu.matmul %172, %173, %cst_107 {dimension_numbers = #tpu.dot_dimension_numbers<[1], [0], [0], [1], [0, 0, 1, 1], [], []>} : vector<2x32xf32>, vector<32x3xf32>, vector<2x3xf32> -> vector<2x3xf32>
    %c0_108 = arith.constant 0 : index
    %c0_109 = arith.constant 0 : index
    %175 = vector.load %arg32[%c0_108, %c0_109] : memref<1x3xf32, #tpu.memory_space<vmem>>, vector<1x3xf32>
    %176 = vector.broadcast %175 : vector<1x3xf32> to vector<2x3xf32>
    %177 = arith.addf %174, %176 : vector<2x3xf32>
    %c0_110 = arith.constant 0 : index
    %c0_111 = arith.constant 0 : index
    %178 = vector.load %arg33[%c0_110, %c0_111] : memref<128x32xf32, #tpu.memory_space<vmem>>, vector<128x32xf32>
    %cst_112 = arith.constant dense<0.000000e+00> : vector<2x32xf32>
    %179 = tpu.matmul %165, %178, %cst_112 {dimension_numbers = #tpu.dot_dimension_numbers<[1], [0], [0], [1], [0, 0, 1, 1], [], []>} : vector<2x128xf32>, vector<128x32xf32>, vector<2x32xf32> -> vector<2x32xf32>
    %c0_113 = arith.constant 0 : index
    %c0_114 = arith.constant 0 : index
    %180 = vector.load %arg34[%c0_113, %c0_114] : memref<1x32xf32, #tpu.memory_space<vmem>>, vector<1x32xf32>
    %181 = vector.broadcast %180 : vector<1x32xf32> to vector<2x32xf32>
    %182 = arith.addf %179, %181 : vector<2x32xf32>
    %cst_115 = arith.constant 0.000000e+00 : f32
    %183 = vector.broadcast %cst_115 : f32 to vector<2x32xf32>
    %184 = arith.maximumf %182, %183 : vector<2x32xf32>
    %c0_116 = arith.constant 0 : index
    %c0_117 = arith.constant 0 : index
    %185 = vector.load %arg35[%c0_116, %c0_117] : memref<32x3xf32, #tpu.memory_space<vmem>>, vector<32x3xf32>
    %cst_118 = arith.constant dense<0.000000e+00> : vector<2x3xf32>
    %186 = tpu.matmul %184, %185, %cst_118 {dimension_numbers = #tpu.dot_dimension_numbers<[1], [0], [0], [1], [0, 0, 1, 1], [], []>} : vector<2x32xf32>, vector<32x3xf32>, vector<2x3xf32> -> vector<2x3xf32>
    %c0_119 = arith.constant 0 : index
    %c0_120 = arith.constant 0 : index
    %187 = vector.load %arg36[%c0_119, %c0_120] : memref<1x3xf32, #tpu.memory_space<vmem>>, vector<1x3xf32>
    %188 = vector.broadcast %187 : vector<1x3xf32> to vector<2x3xf32>
    %189 = arith.addf %186, %188 : vector<2x3xf32>
    %cst_121 = arith.constant dense<0xFF800000> : vector<2xf32>
    %190 = vector.multi_reduction <maximumf>, %177, %cst_121 [1] : vector<2x3xf32> to vector<2xf32>
    %191 = vector.shape_cast %190 : vector<2xf32> to vector<2x1xf32>
    %192 = vector.broadcast %191 : vector<2x1xf32> to vector<2x3xf32>
    %193 = arith.subf %177, %192 : vector<2x3xf32>
    %194 = math.exp %193 : vector<2x3xf32>
    %cst_122 = arith.constant dense<0.000000e+00> : vector<2xf32>
    %195 = vector.multi_reduction <add>, %194, %cst_122 [1] : vector<2x3xf32> to vector<2xf32>
    %196 = vector.shape_cast %195 : vector<2xf32> to vector<2x1xf32>
    %197 = tpu.reciprocal %196 {approx = true} : vector<2x1xf32> -> vector<2x1xf32>
    %198 = vector.broadcast %197 : vector<2x1xf32> to vector<2x3xf32>
    %199 = arith.mulf %194, %198 : vector<2x3xf32>
    %cst_123 = arith.constant dense<0xFF800000> : vector<2xf32>
    %200 = vector.multi_reduction <maximumf>, %189, %cst_123 [1] : vector<2x3xf32> to vector<2xf32>
    %201 = vector.shape_cast %200 : vector<2xf32> to vector<2x1xf32>
    %202 = vector.broadcast %201 : vector<2x1xf32> to vector<2x3xf32>
    %203 = arith.subf %189, %202 : vector<2x3xf32>
    %204 = math.exp %203 : vector<2x3xf32>
    %cst_124 = arith.constant dense<0.000000e+00> : vector<2xf32>
    %205 = vector.multi_reduction <add>, %204, %cst_124 [1] : vector<2x3xf32> to vector<2xf32>
    %206 = vector.shape_cast %205 : vector<2xf32> to vector<2x1xf32>
    %207 = tpu.reciprocal %206 {approx = true} : vector<2x1xf32> -> vector<2x1xf32>
    %208 = vector.broadcast %207 : vector<2x1xf32> to vector<2x3xf32>
    %209 = arith.mulf %204, %208 : vector<2x3xf32>
    %210 = arith.addf %199, %209 : vector<2x3xf32>
    %cst_125 = arith.constant dense<0xFF800000> : vector<2xf32>
    %211 = vector.multi_reduction <maximumf>, %210, %cst_125 [1] : vector<2x3xf32> to vector<2xf32>
    %212 = vector.shape_cast %211 : vector<2xf32> to vector<2x1xf32>
    %213 = vector.broadcast %212 : vector<2x1xf32> to vector<2x3xf32>
    %214 = arith.subf %210, %213 : vector<2x3xf32>
    %215 = math.exp %214 : vector<2x3xf32>
    %cst_126 = arith.constant dense<0.000000e+00> : vector<2xf32>
    %216 = vector.multi_reduction <add>, %215, %cst_126 [1] : vector<2x3xf32> to vector<2xf32>
    %217 = vector.shape_cast %216 : vector<2xf32> to vector<2x1xf32>
    %218 = tpu.reciprocal %217 {approx = true} : vector<2x1xf32> -> vector<2x1xf32>
    %219 = vector.broadcast %218 : vector<2x1xf32> to vector<2x3xf32>
    %220 = arith.mulf %215, %219 : vector<2x3xf32>
    %221 = tpu.iota {dimensions = array<i32: 1>} : vector<2x3xi32>
    %cst_127 = arith.constant dense<0xFF800000> : vector<2xf32>
    %222 = vector.multi_reduction <maximumf>, %220, %cst_127 [1] : vector<2x3xf32> to vector<2xf32>
    %223 = vector.shape_cast %222 : vector<2xf32> to vector<2x1xf32>
    %224 = vector.broadcast %223 : vector<2x1xf32> to vector<2x3xf32>
    %225 = arith.cmpf oeq, %220, %224 : vector<2x3xf32>
    %c3_i32 = arith.constant 3 : i32
    %226 = vector.broadcast %c3_i32 : i32 to vector<2x3xi32>
    %227 = arith.select %225, %221, %226 : vector<2x3xi1>, vector<2x3xi32>
    %cst_128 = arith.constant dense<2147483647> : vector<2xi32>
    %228 = vector.multi_reduction <minsi>, %227, %cst_128 [1] : vector<2x3xi32> to vector<2xi32>
    %229 = vector.shape_cast %228 : vector<2xi32> to vector<2x1xi32>
    %230 = arith.sitofp %229 : vector<2x1xi32> to vector<2x1xf32>
    %cst_129 = arith.constant 0.000000e+00 : f32
    %231 = vector.broadcast %cst_129 : f32 to vector<2x128xf32>
    %c0_130 = arith.constant 0 : index
    %c0_131 = arith.constant 0 : index
    %232 = vector.load %arg37[%c0_130, %c0_131] : memref<2x128xf32, #tpu.memory_space<vmem>>, vector<2x128xf32>
    tpu.vector_store %arg37[%c0_130, %c0_131], %231 {strides = array<i32>} : memref<2x128xf32, #tpu.memory_space<vmem>>, vector<2x128xf32>,
    %c0_132 = arith.constant 0 : index
    %c0_133 = arith.constant 0 : index
    %233 = vector.load %arg37[%c0_132, %c0_133] : memref<2x128xf32, #tpu.memory_space<vmem>>, vector<2x3xf32>
    tpu.vector_store %arg37[%c0_132, %c0_133], %220 {strides = array<i32>} : memref<2x128xf32, #tpu.memory_space<vmem>>, vector<2x3xf32>,
    %c0_134 = arith.constant 0 : index
    %c3 = arith.constant 3 : index
    %234 = vector.load %arg37[%c0_134, %c3] : memref<2x128xf32, #tpu.memory_space<vmem>>, vector<2x1xf32>
    tpu.vector_store %arg37[%c0_134, %c3], %230 {strides = array<i32>} : memref<2x128xf32, #tpu.memory_space<vmem>>, vector<2x1xf32>,
    return
  }
}

</mosaic_0001>

<bundles_post_ra>
// kernel: eq.36
= control target key start
LH: loop header
LB: loop body
LE: loop exit
PB: predicated region body
PF: predicated region fallthrough
CT: control target
= control target key end

     0   :  { %vm7_vm0 = vcmask 400384   ;;  %vm13_vm1 = vcmask 802184   ;;  %s39_s0 = inlined_call_operand.vmem [shape: s32[2,49], index: 0, kind: input, shape index: {}]   ;;  %s40_s1 = inlined_call_operand.vmem [shape: s32[98], index: 1, kind: output, shape index: {}]  }
   0x1   :  { %v4_v0 = vld [vmem:[%s39_s0] sm:$0x3]  ;;  %s22_s0 = smov 49  }
   0x2   :  { %5 = vst [vmem:[#allocation1] sm:$0x3] %v4_v0 }
   0x9   :  { %v10_v1 = vld [vmem:[#allocation1 + $0x1] sm:$0x1]   ;;  %v6_v2 = vld [vmem:[#allocation1] sm:$0x1]  }
   0xa   :  { %11 = vrot.lane.b32.xlu0 %v10_v1, %s22_s0  ;;  %8 = vst.msk [vmem:[#allocation0] sm:$0x1] %vm7_vm0, %v6_v2  }
  0x7c   :  { %v12_v3 = vpop.permute.xlu0 %11  }
  0x7d   :  { %14 = vst.msk [vmem:[#allocation0] sm:$0x1] %vm13_vm1, %v12_v3  }
  0x84   :  { %v18_v4 = vld [vmem:[#allocation0] sm:$0x1] }
  0x85   :  { %20 = vst [vmem:[%s40_s1] sm:$0x1] %v18_v4 }

// kernel: _lambda_.1
= control target key start
LH: loop header
LB: loop body
LE: loop exit
PB: predicated region body
PF: predicated region fallthrough
CT: control target
= control target key end

     0   :  { %v6677_v0 = vmov 0.0|0.0   ;;  %s6678_s3 = smov 6   ;;  %vm6679_vm0 = vmmov 0   ;;  %v6680_v1 = vmov 0.0   ;;  %s6681_s7 = smov 8   ;;  %vm179_vm1 = vcmask 523264   ;;  %s8107_s0 = inlined_call_operand.smem [shape: u32[38], index: -1, kind: input, shape index: {}] }
   0x1   :  { %5924 = vmatprep.subr.bf16.mxu0 %v6677_v0  ;;  %s4700_s6 = sld [smem:[%s8107_s0 + %s6678_s3]]   ;;  %5437 = vmatprep.mubr.msk.f32.mxu0 %vm6679_vm0, %v6680_v1  ;;  %s6682_s11 = smov 1   ;;  %vm480_vm2 = vcmask 1042432   ;;  %vm440_vm3 = vcmask 23552   ;;  %vm1116_vm4 = vcmask 1046528   ;;  %vm632_vm5 = vcmask 1041408  }
   0x2   :  { %s6733_s10 = sld [smem:[%s8107_s0 + %s6681_s7]]   ;;  %s6683_s18 = smov 10   ;;  %vm628_vm6 = vcmask 801792   ;;  %vm890_vm7 = vcmask 1040384   ;;  %vm841_vm8 = vcmask 400384   ;;  %vm1436_vm9 = vcmask 1043456  }
   0x3   :  { %s4695_s14 = sld [smem:[%s8107_s0 + %s6682_s11]]   ;;  %s6684_s22 = smov 2   ;;  %vm1578_vm10 = vcmask 261120   ;;  %vm1677_vm12 = vcmask 195584   ;;  %vm4629_vm13 = vcmask 17408  }
   0x4   :  { %s1_s17 = sld [smem:[%s8107_s0]]   ;;  %s6685_s26 = smov 7   ;;  %vm7103_vm11 = vmpackc.low %vm1578_vm10, %vm1578_vm10 }
   0x5   :  { %s4704_s21 = sld [smem:[%s8107_s0 + %s6683_s18]]   ;;  %s6686_s30 = smov 11  }
   0x6   :  { %s6767_s25 = sld [smem:[%s8107_s0 + %s6684_s22]]   ;;  %s6687_s4 = smov 13  }
   0x7   :  { %v164_v2 = vld [vmem:[%s4700_s6] sm:$0xff]  ;;  %v165_v3 = vld [vmem:[%s4700_s6 + $0x8] sm:$0xff]  ;;  %v166_v4 = vld [vmem:[%s4700_s6 + $0x10] sm:$0xff]  ;;  %s4701_s29 = sld [smem:[%s8107_s0 + %s6685_s26]]   ;;  %s6688_s8 = smov 5  }
   0x8   :  { %v5925_v5 = vpack.c.bf16 %v165_v3, %v164_v2  ;;  %v167_v6 = vld [vmem:[%s4700_s6 + $0x18] sm:$0xff]  ;;  %v154_v8 = vld [vmem:[%s6733_s10] sm:$0xff]  ;;  %v155_v9 = vld [vmem:[%s6733_s10 + $0x8] sm:$0xff]  ;;  %s4705_s3 = sld [smem:[%s8107_s0 + %s6686_s30]]   ;;  %s6689_s12 = smov 15  }
   0x9   :  { %v5928_v7 = vpack.c.bf16 %v167_v6, %v166_v4  ;;  %v168_v10 = vld [vmem:[%s4700_s6 + $0x20] sm:$0xff]  ;;  %v169_v11 = vld [vmem:[%s4700_s6 + $0x28] sm:$0xff]  ;;  %v5936_v12 = vpack.c.bf16 %v155_v9, %v154_v8  ;;  %v170_v14 = vld [vmem:[%s4700_s6 + $0x30] sm:$0xff]  ;;  %s4707_s7 = sld [smem:[%s8107_s0 + %s6687_s4]]   ;;  %s6690_s16 = smov 17  }
   0xa   :  { %5926 = vmatpush3.bf16.msra.mxu0 %v5925_v5  ;;  %v5931_v13 = vpack.c.bf16 %v169_v11, %v168_v10  ;;  %v171_v15 = vld [vmem:[%s4700_s6 + $0x38] sm:$0xff]  ;;  %v163_v17 = vld [vmem:[%s4695_s14] sm:$0x3]  ;;  %v156_v18 = vld [vmem:[%s6733_s10 + $0x10] sm:$0xff]  ;;  %s4699_s11 = sld [smem:[%s8107_s0 + %s6688_s8]]   ;;  %s6691_s20 = smov 12  }
   0xb   :  { %5927 = vmatprep.subr.bf16.mxu0 %v6677_v0  ;;  %5937 = vmatprep.subr.bf16.mxu1 %v5936_v12  ;;  %v5934_v16 = vpack.c.bf16 %v171_v15, %v170_v14  ;;  %v157_v19 = vld [vmem:[%s6733_s10 + $0x18] sm:$0xff]  ;;  %v158_v21 = vld [vmem:[%s6733_s10 + $0x20] sm:$0xff]  ;;  %v159_v22 = vld [vmem:[%s6733_s10 + $0x28] sm:$0xff]  ;;  %s6924_s15 = sld [smem:[%s8107_s0 + %s6689_s12]]   ;;  %s6692_s24 = smov 9  }
   0xc   :  { %5939 = vmatpush3.bf16.msra.mxu1 %v5936_v12  ;;  %v5940_v20 = vpack.c.bf16 %v157_v19, %v156_v18  ;;  %v160_v23 = vld [vmem:[%s6733_s10 + $0x30] sm:$0xff]  ;;  %v5944_v24 = vpack.c.bf16 %v159_v22, %v158_v21  ;;  %v161_v25 = vld [vmem:[%s6733_s10 + $0x38] sm:$0xff]  ;;  %v254_v27 = vld [vmem:[%s1_s17] sm:$0xff]  ;;  %s7005_s19 = sld [smem:[%s8107_s0 + %s6690_s16]]   ;;  %s6693_s28 = smov 18  }
   0xd   :  { %v5948_v26 = vpack.c.bf16 %v161_v25, %v160_v23  ;;  %5456 = vmatprep.mubr.msk.f32.mxu1 %vm179_vm1, %v254_v27  ;;  %v255_v28 = vld [vmem:[%s1_s17 + $0x8] sm:$0xff]  ;;  %v432_v29 = vld [vmem:[%s4704_s21] sm:$0x7]  ;;  %v425_v31 = vld [vmem:[%s6767_s25 + $0x30] sm:$0xff]  ;;  %s4706_s23 = sld [smem:[%s8107_s0 + %s6691_s20]]   ;;  %s6694_s2 = smov 64  }
   0xe   :  { %5929 = vmatpush3.bf16.msra.mxu0 %v5928_v7  ;;  %5941 = vmatprep.subr.bf16.mxu1 %v5940_v20  ;;  %v424_v30 = vld [vmem:[%s6767_s25 + $0x28] sm:$0xff]  ;;  %v426_v32 = vld [vmem:[%s6767_s25 + $0x38] sm:$0xff]  ;;  %v427_v33 = vld [vmem:[%s6767_s25 + $0x40] sm:$0xff]  ;;  %s7027_s27 = sld [smem:[%s8107_s0 + %s6692_s24]]   ;;  %s6696_s4 = smov 14  }
   0xf   :  { %5930 = vmatprep.subr.bf16.mxu0 %v6677_v0  ;;  %v428_v34 = vld [vmem:[%s6767_s25 + $0x48] sm:$0xff]  ;;  %v429_v35 = vld [vmem:[%s6767_s25 + $0x50] sm:$0xff]  ;;  %v430_v36 = vld [vmem:[%s6767_s25 + $0x58] sm:$0xff]  ;;  %s4712_s1 = sld [smem:[%s8107_s0 + %s6693_s28]]   ;;  %s6697_s8 = smov 32  }
  0x10   :  { %5943 = vmatpush3.bf16.msra.mxu1 %v5940_v20  ;;  %v431_v37 = vld [vmem:[%s6767_s25 + $0x60] sm:$0x3]  ;;  %v420_v44 = vld [vmem:[%s6767_s25 + $0x8] sm:$0xff]  ;;  %v421_v45 = vld [vmem:[%s6767_s25 + $0x10] sm:$0xff]  ;;  %s6698_s9 = smov 3   ;;  %s6699_s13 = smov 19  }
  0x11   :  { %5945 = vmatprep.subr.bf16.mxu1 %v5944_v24  ;;  %v4732_v38 = vld [vmem:[%s4701_s29] ss:$0 sm:$0xff]  ;;  %v422_v46 = vld [vmem:[%s6767_s25 + $0x18] sm:$0xff]  ;;  %s4697_s12 = sld [smem:[%s8107_s0 + %s6698_s9]]   ;;  %s6700_s17 = smov 20  }
  0x12   :  { %5932 = vmatpush3.bf16.msra.mxu0 %v5931_v13  ;;  %v419_v43 = vld [vmem:[%s6767_s25] sm:$0xff]  ;;  %s7171_s16 = sld [smem:[%s8107_s0 + %s6699_s13]]   ;;  %s6701_s21 = smov 23  }
  0x13   :  { %5933 = vmatprep.subr.bf16.mxu0 %v6677_v0  ;;  %v423_v47 = vld [vmem:[%s6767_s25 + $0x20] sm:$0xff]  ;;  %s4714_s20 = sld [smem:[%s8107_s0 + %s6700_s17]]   ;;  %s6702_s25 = smov 21  }
  0x14   :  { %5947 = vmatpush3.bf16.msra.mxu1 %v5944_v24  ;;  %v6844_v54 = vld [vmem:[%s4705_s3] ss:$0 sm:$0xff]  ;;  %s6695_s3 = smov 96   ;;  %s7243_s24 = sld [smem:[%s8107_s0 + %s6701_s21]]  }
  0x15   :  { %5949 = vmatprep.subr.bf16.mxu1 %v5948_v26  ;;  %s4715_s29 = sld [smem:[%s8107_s0 + %s6702_s25]]   ;;  %s6703_s30 = smov 22  }
  0x16   :  { %5935 = vmatpush3.bf16.msra.mxu0 %v5934_v16  ;;  %s6704_s5 = smov 25   ;;  %s6705_s10 = smov 24  }
  0x17   :  { %5952 = vmatprep.subr.bf16.mxu0 %v6677_v0  ;;  %s7427_s9 = sld [smem:[%s8107_s0 + %s6704_s5]]   ;;  %s6706_s14 = smov 26  }
  0x18   :  { %5951 = vmatpush3.bf16.msra.mxu1 %v5948_v26  ;;  %s7550_s13 = sld [smem:[%s8107_s0 + %s6705_s10]]   ;;  %s6707_s18 = smov 27  }
  0x19   :  { %5438 = vmatmul.mubr.msk.f32.vlgmr.msra.gmra.mrb[0].mxu0 %vm179_vm1, %v163_v17  ;;  %6567 = vmatprep.subr.mxu1 %v6680_v1  ;;  %s4720_s17 = sld [smem:[%s8107_s0 + %s6706_s14]]   ;;  %s6708_s22 = smov 28  }
  0x1a   :  { %5954 = vmatpush3.bf16.msra.mxu0 %v5936_v12  ;;  %5475 = vmatprep.mubr.msk.f32.mxu0 %vm6679_vm0, %v6680_v1  ;;  %s4721_s21 = sld [smem:[%s8107_s0 + %s6707_s18]]   ;;  %s6709_s26 = smov 4  }
  0x1b   :  { %5955 = vmatprep.subr.bf16.mxu0 %v6677_v0  ;;  %5457 = vmatmul.mubr.msk.f32.vlgmr.msra.gmra.mrb[0].mxu1 %vm179_vm1, %v255_v28  ;;  %s4722_s25 = sld [smem:[%s8107_s0 + %s6708_s22]]   ;;  %s6711_s6 = smov 31  }
  0x1c   :  { %5495 = vmatprep.mubr.msk.f32.mxu1 %vm6679_vm0, %v6680_v1  ;;  %6568 = vmatpush3.msk.msra.mxu1 %vm480_vm2, %v432_v29  ;;  %s4725_s10 = sld [smem:[%s8107_s0 + %s6711_s6]]  }
  0x1d   :  { %5982 = vmatprep.subr.bf16.mxu1 %v6677_v0  ;;  %s4726_s28 = sld [smem:[%s8107_s0 + %s6697_s8]]  }
  0x1e   :  { %5957 = vmatpush3.bf16.msra.mxu0 %v5940_v20 }
  0x1f   :  { %5958 = vmatprep.subr.bf16.mxu0 %v6677_v0  ;;  %5496 = vmatmul.mubr.msk.f32.vlgmr.msra.gmra.mrb[2].mxu1 %vm440_vm3, %v424_v30 }
  0x20   :  { %5498 = vmatprep.mubr.msk.f32.mxu1 %vm6679_vm0, %v6680_v1 }
  0x22   :  { %5960 = vmatpush3.bf16.msra.mxu0 %v5944_v24 }
  0x23   :  { %5961 = vmatprep.subr.bf16.mxu0 %v6677_v0  ;;  %5499 = vmatmul.mubr.msk.f32.gmra.mrb[4].mxu1 %vm440_vm3, %v425_v31 }
  0x24   :  { %5501 = vmatprep.mubr.msk.f32.mxu1 %vm6679_vm0, %v6680_v1 }
  0x26   :  { %5963 = vmatpush3.bf16.msra.mxu0 %v5948_v26 }
  0x27   :  { %5478 = vmatprep.subr.mxu0 %v6680_v1  ;;  %5502 = vmatmul.mubr.msk.f32.gmra.mrb[6].mxu1 %vm440_vm3, %v426_v32 }
  0x28   :  { %5504 = vmatprep.mubr.msk.f32.mxu1 %vm6679_vm0, %v6680_v1 }
  0x2b   :  { %5505 = vmatmul.mubr.msk.f32.gmra.mrb[8].mxu1 %vm440_vm3, %v427_v33 }
  0x2c   :  { %5507 = vmatprep.mubr.msk.f32.mxu1 %vm6679_vm0, %v6680_v1 }
  0x2f   :  { %5508 = vmatmul.mubr.msk.f32.gmra.mrb[10].mxu1 %vm440_vm3, %v428_v34 }
  0x30   :  { %5510 = vmatprep.mubr.msk.f32.mxu1 %vm6679_vm0, %v6680_v1 }
  0x33   :  { %5511 = vmatmul.mubr.msk.f32.gmra.mrb[12].mxu1 %vm440_vm3, %v429_v35 }
  0x34   :  { %5513 = vmatprep.mubr.msk.f32.mxu1 %vm6679_vm0, %v6680_v1 }
  0x37   :  { %5514 = vmatmul.mubr.msk.f32.gmra.mrb[14].mxu1 %vm440_vm3, %v430_v36 }
  0x38   :  { %5516 = vmatprep.mubr.msk.f32.mxu1 %vm6679_vm0, %v6680_v1 }
  0x3b   :  { %5517 = vmatmul.mubr.msk.f32.gmra.mrb[16].mxu1 %vm440_vm3, %v431_v37 }
  0x3c   :  { %5580 = vmatprep.mubr.msk.f32.mxu1 %vm6679_vm0, %v6680_v1 }
  0xec   :  { %v249_v39 = vpop.f32.mrb[0].mxu0 }
  0xed   :  { %v250_v40 = vadd.f32 %v4732_v38, %v249_v39  ;;  %v5439_v41 = vpop.f32.mrb[1].mxu0 }
  0xee   :  { %v6835_v48 = vpop.f32.mrb[0].mxu1 }
  0xef   :  { %6626 = vtanh.f32 %v250_v40  ;;  %v6837_v49 = vpop.f32.mrb[1].mxu1 }
  0xf2   :  { %v6842_v50 = vpop.f32.mrb[2].mxu1 }
  0xf3   :  { %v5497_v51 = vpop.f32.mrb[3].mxu1 }
  0xf6   :  { %v580_v52 = vpop.f32.mrb[4].mxu1 }
  0xf7   :  { %v5500_v53 = vpop.f32.mrb[5].mxu1  ;;  %v581_v56 = vadd.f32 %v6844_v54, %v580_v52 }
  0xf9   :  { %v6627_v42 = vpop.eup %6626  ;;  %v6850_v59 = vmax.f32 %v581_v56, 0.0  ;;  %v576_v56 = vadd.f32 %v6844_v54, %v6842_v50 }
  0xfa   :  { %5476 = vmatmul.mubr.msk.f32.vlgmr.msra.gmra.mrb[2].mxu0 %vm179_vm1, %v6627_v42  ;;  %v585_v55 = vpop.f32.mrb[6].mxu1 }
  0xfb   :  { %5479 = vmatpush3.msk.msra.mxu0 %vm480_vm2, %v432_v29  ;;  %5480 = vmatprep.mubr.msk.f32.mxu0 %vm6679_vm0, %v6680_v1  ;;  %v6848_v57 = vadd.f32 %v6844_v54, %v585_v55  ;;  %v5503_v58 = vpop.f32.mrb[7].mxu1  ;;  %v1117_v3 = vrot.slane %v6850_v59, 1 }
  0xfc   :  { %5964 = vmatprep.subr.bf16.mxu0 %v6677_v0 }
  0xfd   :  { %v621_v60 = vmax.f32 %v6848_v57, 0.0  ;;  %v801_v57 = vld [vmem:[%s4707_s7 + $0x8] sm:$0xff] }
  0xfe   :  { %5481 = vmatmul.mubr.msk.f32.vlgmr.msra.gmra.mrb[4].mxu0 %vm440_vm3, %v419_v43  ;;  %v590_v61 = vpop.f32.mrb[8].mxu1 }
  0xff   :  { %5483 = vmatprep.mubr.msk.f32.mxu0 %vm6679_vm0, %v6680_v1  ;;  %v1118_v62 = vrot.slane %v621_v60, 1  ;;  %v591_v63 = vadd.f32 %v6844_v54, %v590_v61  ;;  %v5506_v2 = vpop.f32.mrb[9].mxu1  ;;  %v5974_v50 = vpack.c.bf16 %v621_v60, %v6850_v59  ;;  %v802_v60 = vld [vmem:[%s4707_s7 + $0x10] sm:$0xff] }
 0x101   :  { %v622_v4 = vmax.f32 %v591_v63, 0.0  ;;  %v1119_v5 = vsel %vm1116_vm4, %v1117_v3, %v1118_v62  ;;  %v619_v3 = vmax.f32 %v576_v56, 0.0 }
 0x102   :  { %5484 = vmatmul.mubr.msk.f32.gmra.mrb[6].mxu0 %vm440_vm3, %v420_v44  ;;  %1137 = vxpose.xlu0.b32.start [1/7] (short) %v1119_v5, 128  ;;  %v595_v6 = vpop.f32.mrb[10].mxu1 }
 0x103   :  { %5486 = vmatprep.mubr.msk.f32.mxu0 %vm6679_vm0, %v6680_v1  ;;  %v1120_v7 = vrot.slane %v622_v4, 1  ;;  %v596_v8 = vadd.f32 %v6844_v54, %v595_v6  ;;  %v5509_v9 = vpop.f32.mrb[11].mxu1  ;;  %v803_v6 = vld [vmem:[%s4707_s7 + $0x18] sm:$0xff] }
 0x104   :  { %v804_v9 = vld [vmem:[%s4707_s7 + $0x20] sm:$0xff] }
 0x105   :  { %v623_v10 = vmax.f32 %v596_v8, 0.0  ;;  %v1121_v11 = vsel %vm1116_vm4, %v1118_v62, %v1120_v7  ;;  %v6902_v8 = vpack.c.bf16 %v803_v6, %v802_v60 }
 0x106   :  { %5487 = vmatmul.mubr.msk.f32.gmra.mrb[8].mxu0 %vm440_vm3, %v421_v45  ;;  %1138 = vxpose.xlu0.b32.cont [2/7] (short) %v1121_v11, 128  ;;  %v600_v12 = vpop.f32.mrb[12].mxu1 }
 0x107   :  { %5489 = vmatprep.mubr.msk.f32.mxu0 %vm6679_vm0, %v6680_v1  ;;  %v6860_v13 = vpack.c.bf16 %v623_v10, %v622_v4  ;;  %v1122_v14 = vrot.slane %v623_v10, 1  ;;  %v601_v15 = vadd.f32 %v6844_v54, %v600_v12  ;;  %v5512_v16 = vpop.f32.mrb[13].mxu1  ;;  %v805_v10 = vld [vmem:[%s4707_s7 + $0x28] sm:$0xff]  ;;  %v6913_v12 = vld [vmem:[%s4707_s7 + $0x30] sm:$0x1] }
 0x108   :  { %v6909_v11 = vpack.c.bf16 %v805_v10, %v804_v9 }
 0x109   :  { %v624_v17 = vmax.f32 %v601_v15, 0.0  ;;  %v1123_v18 = vsel %vm1116_vm4, %v1120_v7, %v1122_v14  ;;  %v708_v15 = vld [vmem:[%s6924_s15 + $0x10] sm:$0xff] }
 0x10a   :  { %5490 = vmatmul.mubr.msk.f32.gmra.mrb[10].mxu0 %vm440_vm3, %v422_v46  ;;  %1139 = vxpose.xlu0.b32.cont [3/7] (short) %v1123_v18, 128  ;;  %v605_v19 = vpop.f32.mrb[14].mxu1 }
 0x10b   :  { %5492 = vmatprep.mubr.msk.f32.mxu0 %vm6679_vm0, %v6680_v1  ;;  %v1124_v20 = vrot.slane %v624_v17, 1  ;;  %v606_v21 = vadd.f32 %v6844_v54, %v605_v19  ;;  %v5515_v22 = vpop.f32.mrb[15].mxu1  ;;  %v710_v19 = vld [vmem:[%s6924_s15 + $0x20] sm:$0xff] }
 0x10c   :  { %v712_v22 = vld [vmem:[%s6924_s15 + $0x30] sm:$0xff] }
 0x10d   :  { %v625_v23 = vmax.f32 %v606_v21, 0.0  ;;  %v1125_v24 = vsel %vm1116_vm4, %v1122_v14, %v1124_v20  ;;  %v707_v14 = vld [vmem:[%s6924_s15 + $0x8] sm:$0xff] }
 0x10e   :  { %5493 = vmatmul.mubr.msk.f32.gmra.mrb[12].mxu0 %vm440_vm3, %v423_v47  ;;  %1140 = vxpose.xlu0.b32.cont [4/7] (short) %v1125_v24, 128  ;;  %v610_v25 = vpop.f32.mrb[16].mxu1 }
 0x10f   :  { %5545 = vmatprep.mubr.msk.f32.mxu0 %vm6679_vm0, %v6680_v1  ;;  %v5980_v26 = vpack.c.bf16 %v625_v23, %v624_v17  ;;  %v1126_v27 = vrot.slane %v625_v23, 1  ;;  %v6867_v28 = vadd.f32 %v6844_v54, %v610_v25  ;;  %v5518_v29 = vpop.f32.mrb[17].mxu1  ;;  %v709_v17 = vld [vmem:[%s6924_s15 + $0x18] sm:$0xff]  ;;  %v714_v25 = vld [vmem:[%s6924_s15 + $0x40] sm:$0xff] }
 0x110   :  { %v5986_v18 = vpack.c.bf16 %v709_v17, %v708_v15  ;;  %v713_v23 = vld [vmem:[%s6924_s15 + $0x38] sm:$0xff] }
 0x111   :  { %v626_v30 = vmax.f32 %v6867_v28, 0.0  ;;  %v1127_v31 = vsel %vm1116_vm4, %v1124_v20, %v1126_v27  ;;  %v711_v20 = vld [vmem:[%s6924_s15 + $0x28] sm:$0xff]  ;;  %v5992_v24 = vpack.c.bf16 %v713_v23, %v712_v22  ;;  %v716_v28 = vld [vmem:[%s6924_s15 + $0x50] sm:$0xff]  ;;  %v717_v29 = vld [vmem:[%s6924_s15 + $0x58] sm:$0xff] }
 0x112   :  { %1141 = vxpose.xlu0.b32.cont [5/7] (short) %v1127_v31, 128  ;;  %v5989_v21 = vpack.c.bf16 %v711_v20, %v710_v19  ;;  %v718_v31 = vld [vmem:[%s6924_s15 + $0x60] sm:$0xff] }
 0x113   :  { %v1128_v32 = vrot.slane %v626_v30, 1 }
 0x115   :  { %v1129_v33 = vsel %vm1116_vm4, %v1126_v27, %v1128_v32 }
 0x116   :  { %1142 = vxpose.xlu0.b32.cont [6/7] (short) %v1129_v33, 128 }
 0x11a   :  { %1143 = vxpose.xlu0.b32.end [7/7] (short) %v1128_v32, 128  ;;  %v719_v32 = vld [vmem:[%s6924_s15 + $0x68] sm:$0xff] }
 0x11b   :  { %v6001_v33 = vpack.c.bf16 %v719_v32, %v718_v31 }
 0x1cd   :  { %v6874_v34 = vpop.f32.mrb[2].mxu0 }
 0x1ce   :  { %v5477_v35 = vpop.f32.mrb[3].mxu0 }
 0x1cf   :  { %v720_v35 = vld [vmem:[%s6924_s15 + $0x70] sm:$0xff] }
 0x1d1   :  { %v550_v36 = vpop.f32.mrb[4].mxu0 }
 0x1d2   :  { %v551_v37 = vadd.f32 %v6844_v54, %v550_v36  ;;  %v5482_v38 = vpop.f32.mrb[5].mxu0  ;;  %v721_v36 = vld [vmem:[%s6924_s15 + $0x78] sm:$0xff] }
 0x1d4   :  { %v614_v39 = vmax.f32 %v551_v37, 0.0  ;;  %v6004_v37 = vpack.c.bf16 %v721_v36, %v720_v35  ;;  %v1441_v35 = vld [vmem:[%s7005_s19 + $0x18] sm:$0xff] }
 0x1d5   :  { %v555_v40 = vpop.f32.mrb[6].mxu0 }
 0x1d6   :  { %v556_v41 = vadd.f32 %v6844_v54, %v555_v40  ;;  %809 = vxpose.xlu1.b32.start [1/7] (short) %v614_v39, 128  ;;  %v5485_v42 = vpop.f32.mrb[7].mxu0 }
 0x1d8   :  { %v615_v43 = vmax.f32 %v556_v41, 0.0 }
 0x1d9   :  { %v560_v44 = vpop.f32.mrb[8].mxu0 }
 0x1da   :  { %v5965_v45 = vpack.c.bf16 %v615_v43, %v614_v39  ;;  %v561_v46 = vadd.f32 %v6844_v54, %v560_v44  ;;  %810 = vxpose.xlu1.b32.cont [2/7] (short) %v615_v43, 128  ;;  %v5488_v47 = vpop.f32.mrb[9].mxu0 }
 0x1dc   :  { %v616_v51 = vmax.f32 %v561_v46, 0.0  ;;  %5966 = vmatpush3.bf16.msra.mxu0 %v5965_v45 }
 0x1dd   :  { %v565_v52 = vpop.f32.mrb[10].mxu0  ;;  %5967 = vmatprep.subr.bf16.mxu0 %v6677_v0 }
 0x1de   :  { %v566_v53 = vadd.f32 %v6844_v54, %v565_v52  ;;  %811 = vxpose.xlu1.b32.cont [3/7] (short) %v616_v51, 128  ;;  %v5491_v55 = vpop.f32.mrb[11].mxu0 }
 0x1e0   :  { %v617_v58 = vmax.f32 %v566_v53, 0.0 }
 0x1e1   :  { %v570_v61 = vpop.f32.mrb[12].mxu0 }
 0x1e2   :  { %v5968_v62 = vpack.c.bf16 %v617_v58, %v616_v51  ;;  %v571_v63 = vadd.f32 %v6844_v54, %v570_v61  ;;  %812 = vxpose.xlu1.b32.cont [4/7] (short) %v617_v58, 128  ;;  %v5494_v2 = vpop.f32.mrb[13].mxu0  ;;  %v800_v54 = vld [vmem:[%s4707_s7] sm:$0xff]  ;;  %v1153_v61 = vpop.trf.xlu0  ;;  %s4708_s7 = sld [smem:[%s8107_s0 + %s6696_s4]]  }
 0x1e3   :  { %v6900_v7 = vpack.c.bf16 %v801_v57, %v800_v54  ;;  %s4716_s4 = sld [smem:[%s8107_s0 + %s6703_s30]]  }
 0x1e4   :  { %v618_v4 = vmax.f32 %v571_v63, 0.0  ;;  %5969 = vmatpush3.bf16.msra.mxu0 %v5968_v62  ;;  %s4698_s30 = sld [smem:[%s8107_s0 + %s6709_s26]]  }
 0x1e5   :  { %5970 = vmatprep.subr.bf16.mxu0 %v6677_v0 }
 0x1e6   :  { %v5971_v5 = vpack.c.bf16 %v619_v3, %v618_v4  ;;  %813 = vxpose.xlu1.b32.cont [5/7] (short) %v618_v4, 128  ;;  %v1154_v62 = vpop.trf.xlu0 }
 0x1e8   :  { %5972 = vmatpush3.bf16.msra.mxu0 %v5971_v5 }
 0x1e9   :  { %5973 = vmatprep.subr.bf16.mxu0 %v6677_v0 }
 0x1ea   :  { %814 = vxpose.xlu1.b32.cont [6/7] (short) %v619_v3, 128  ;;  %v1155_v63 = vpop.trf.xlu0 }
 0x1ec   :  { %5975 = vmatpush3.bf16.msra.mxu0 %v5974_v50 }
 0x1ed   :  { %5976 = vmatprep.subr.bf16.mxu0 %v6677_v0 }
 0x1ee   :  { %815 = vxpose.xlu1.b32.end [7/7] (short) %v6850_v59, 128  ;;  %v627_v59 = vld [vmem:[%s4699_s11] sm:$0x3]  ;;  %v1156_v2 = vpop.trf.xlu0  ;;  %s6712_s11 = smov 30  }
 0x1f0   :  { %5978 = vmatpush3.bf16.msra.mxu0 %v6860_v13  ;;  %v706_v13 = vld [vmem:[%s6924_s15] sm:$0xff] }
 0x1f1   :  { %5979 = vmatprep.subr.bf16.mxu0 %v6677_v0  ;;  %v5983_v16 = vpack.c.bf16 %v707_v14, %v706_v13 }
 0x1f2   :  { %v1157_v3 = vpop.trf.xlu0 }
 0x1f3   :  { %5984 = vmatpush3.bf16.msra.mxu1 %v5983_v16 }
 0x1f4   :  { %5981 = vmatpush3.bf16.msra.mxu0 %v5980_v26  ;;  %5985 = vmatprep.subr.bf16.mxu1 %v6677_v0  ;;  %v715_v26 = vld [vmem:[%s6924_s15 + $0x48] sm:$0xff] }
 0x1f5   :  { %5543 = vmatprep.subr.mxu0 %v6680_v1  ;;  %v5995_v27 = vpack.c.bf16 %v715_v26, %v714_v25 }
 0x1f6   :  { %v1158_v4 = vpop.trf.xlu0 }
 0x1f7   :  { %5987 = vmatpush3.bf16.msra.mxu1 %v5986_v18 }
 0x1f8   :  { %5544 = vmatpush3.msk.msra.mxu0 %vm632_vm5, %v626_v30  ;;  %5988 = vmatprep.subr.bf16.mxu1 %v6677_v0  ;;  %v5998_v30 = vpack.c.bf16 %v717_v29, %v716_v28 }
 0x1f9   :  { %5546 = vmatmul.mubr.msk.f32.vlgmr.msra.gmra.mrb[14].mxu0 %vm628_vm6, %v627_v59  ;;  %6007 = vmatprep.subr.bf16.mxu0 %v6900_v7 }
 0x1fa   :  { %6009 = vmatpush3.bf16.msra.mxu0 %v6900_v7  ;;  %v1159_v5 = vpop.trf.xlu0 }
 0x1fb   :  { %6011 = vmatprep.subr.bf16.mxu0 %v6902_v8  ;;  %5990 = vmatpush3.bf16.msra.mxu1 %v5989_v21 }
 0x1fc   :  { %5991 = vmatprep.subr.bf16.mxu1 %v6677_v0 }
 0x1fe   :  { %6013 = vmatpush3.bf16.msra.mxu0 %v6902_v8  ;;  %v1160_v50 = vpop.trf.xlu0 }
 0x1ff   :  { %6015 = vmatprep.subr.bf16.mxu0 %v6909_v11  ;;  %5993 = vmatpush3.bf16.msra.mxu1 %v5992_v24 }
 0x200   :  { %5994 = vmatprep.subr.bf16.mxu1 %v6677_v0 }
 0x202   :  { %6017 = vmatpush3.bf16.msra.mxu0 %v6909_v11  ;;  %v1161_v54 = vpop.trf.xlu0 }
 0x203   :  { %5595 = vmatprep.subr.msk.mxu0 %vm890_vm7, %v6913_v12  ;;  %5996 = vmatpush3.bf16.msra.mxu1 %v5995_v27 }
 0x204   :  { %5997 = vmatprep.subr.bf16.mxu1 %v6677_v0 }
 0x206   :  { %5596 = vmatpush3.msk.msra.mxu0 %vm890_vm7, %v6913_v12  ;;  %v1162_v6 = vpop.trf.xlu0 }
 0x207   :  { %6018 = vmatprep.subr.bf16.mxu0 %v6677_v0  ;;  %5999 = vmatpush3.bf16.msra.mxu1 %v5998_v30 }
 0x208   :  { %6000 = vmatprep.subr.bf16.mxu1 %v6677_v0 }
 0x20a   :  { %v1163_v59 = vpop.trf.xlu0 }
 0x20b   :  { %6002 = vmatpush3.bf16.msra.mxu1 %v6001_v33  ;;  %v1439_v33 = vld [vmem:[%s7005_s19 + $0x8] sm:$0xff] }
 0x20c   :  { %6003 = vmatprep.subr.bf16.mxu1 %v6677_v0 }
 0x20f   :  { %6005 = vmatpush3.bf16.msra.mxu1 %v6004_v37 }
 0x210   :  { %6043 = vmatprep.subr.bf16.mxu1 %v6900_v7 }
 0x256   :  { %v825_v38 = vpop.trf.xlu1 }
 0x257   :  { %5597 = vmatprep.mubr.msk.f32.mxu0 %vm841_vm8, %v825_v38  ;;  %v6078_v38 = vpack.c.bf16 %v1441_v35, %v1439_v33  ;;  %v1456_v33 = vlaneseq }
 0x259   :  { %v7071_v35 = vshrl.u32 %v1456_v33, 7 }
 0x25a   :  { %v826_v39 = vpop.trf.xlu1 }
 0x25b   :  { %5598 = vmatmul.mubr.msk.f32.vlgmr.msra.gmra.mrb[16].mxu0 %vm841_vm8, %v826_v39  ;;  %v1438_v39 = vld [vmem:[%s7005_s19] sm:$0xff] }
 0x25e   :  { %v827_v40 = vpop.trf.xlu1 }
 0x25f   :  { %5600 = vmatprep.mubr.msk.f32.mxu0 %vm841_vm8, %v827_v40  ;;  %v1440_v40 = vld [vmem:[%s7005_s19 + $0x10] sm:$0xff] }
 0x262   :  { %v828_v41 = vpop.trf.xlu1 }
 0x263   :  { %5601 = vmatmul.mubr.msk.f32.gmra.mrb[18].mxu0 %vm841_vm8, %v828_v41 }
 0x266   :  { %v829_v42 = vpop.trf.xlu1 }
 0x267   :  { %5603 = vmatprep.mubr.msk.f32.mxu0 %vm841_vm8, %v829_v42  ;;  %v1443_v42 = vld [vmem:[%s7005_s19 + $0x28] sm:$0xff] }
 0x26a   :  { %v830_v43 = vpop.trf.xlu1 }
 0x26b   :  { %5604 = vmatmul.mubr.msk.f32.gmra.mrb[20].mxu0 %vm841_vm8, %v830_v43  ;;  %v1445_v43 = vld [vmem:[%s7005_s19 + $0x38] sm:$0xff] }
 0x26e   :  { %v831_v44 = vpop.trf.xlu1 }
 0x26f   :  { %5606 = vmatprep.mubr.msk.f32.mxu0 %vm841_vm8, %v831_v44  ;;  %v7017_v44 = vld [vmem:[%s4706_s23] sm:$0xf] }
 0x272   :  { %v832_v45 = vpop.trf.xlu1 }
 0x273   :  { %5607 = vmatmul.mubr.msk.f32.gmra.mrb[22].mxu0 %vm841_vm8, %v832_v45  ;;  %v6080_v45 = vpack.c.bf16 %v1440_v40, %v1438_v39 }
 0x276   :  { %v833_v46 = vpop.trf.xlu1 }
 0x277   :  { %5609 = vmatprep.mubr.msk.f32.mxu0 %vm841_vm8, %v833_v46  ;;  %v6082_v46 = vpack.c.bf16 %v1445_v43, %v1443_v42 }
 0x27a   :  { %v834_v47 = vpop.trf.xlu1 }
 0x27b   :  { %5610 = vmatmul.mubr.msk.f32.gmra.mrb[24].mxu0 %vm841_vm8, %v834_v47  ;;  %v1442_v47 = vld [vmem:[%s7005_s19 + $0x20] sm:$0xff] }
 0x27e   :  { %v835_v51 = vpop.trf.xlu1 }
 0x27f   :  { %5612 = vmatprep.mubr.msk.f32.mxu0 %vm841_vm8, %v835_v51  ;;  %v1444_v51 = vld [vmem:[%s7005_s19 + $0x30] sm:$0xff] }
 0x282   :  { %v836_v52 = vpop.trf.xlu1 }
 0x283   :  { %5613 = vmatmul.mubr.msk.f32.gmra.mrb[26].mxu0 %vm841_vm8, %v836_v52  ;;  %v1447_v52 = vld [vmem:[%s7005_s19 + $0x48] sm:$0xff] }
 0x286   :  { %v837_v53 = vpop.trf.xlu1 }
 0x287   :  { %5615 = vmatprep.mubr.msk.f32.mxu0 %vm841_vm8, %v837_v53  ;;  %v1449_v53 = vld [vmem:[%s7005_s19 + $0x58] sm:$0xff] }
 0x28a   :  { %v838_v55 = vpop.trf.xlu1 }
 0x28b   :  { %5616 = vmatmul.mubr.msk.f32.gmra.mrb[28].mxu0 %vm841_vm8, %v838_v55  ;;  %v6084_v55 = vpack.c.bf16 %v1444_v51, %v1442_v47 }
 0x28e   :  { %v839_v56 = vpop.trf.xlu1 }
 0x28f   :  { %5618 = vmatprep.mubr.msk.f32.mxu0 %vm841_vm8, %v839_v56  ;;  %v6086_v56 = vpack.c.bf16 %v1449_v53, %v1447_v52 }
 0x292   :  { %v840_v58 = vpop.trf.xlu1 }
 0x293   :  { %5619 = vmatmul.mubr.msk.f32.gmra.mrb[30].mxu0 %vm841_vm8, %v840_v58  ;;  %v1446_v58 = vld [vmem:[%s7005_s19 + $0x40] sm:$0xff] }
 0x294   :  { %5653 = vmatprep.mubr.msk.f32.mxu0 %vm6679_vm0, %v6680_v1 }
 0x2cc   :  { %v702_v57 = vpop.f32.mrb[14].mxu0 }
 0x2cd   :  { %v5547_v60 = vpop.f32.mrb[15].mxu0  ;;  %5581 = vmatmul.mubr.f32.vlgmr.msra.gmra.mrb[18].mxu1 %v702_v57 }
 0x2ce   :  { %6045 = vmatpush3.bf16.msra.mxu1 %v6900_v7  ;;  %5670 = vmatprep.mubr.msk.f32.mxu1 %vm841_vm8, %v1153_v61  ;;  %v1164_v7 = vpop.trf.xlu0  ;;  %v1448_v61 = vld [vmem:[%s7005_s19 + $0x50] sm:$0xff] }
 0x2cf   :  { %6047 = vmatprep.subr.bf16.mxu1 %v6902_v8 }
 0x2d2   :  { %6049 = vmatpush3.bf16.msra.mxu1 %v6902_v8  ;;  %v1165_v8 = vpop.trf.xlu0 }
 0x2d3   :  { %6051 = vmatprep.subr.bf16.mxu1 %v6909_v11 }
 0x2d6   :  { %6053 = vmatpush3.bf16.msra.mxu1 %v6909_v11  ;;  %v1166_v9 = vpop.trf.xlu0 }
 0x2d7   :  { %5668 = vmatprep.subr.msk.mxu1 %vm890_vm7, %v6913_v12 }
 0x2da   :  { %5669 = vmatpush3.msk.msra.mxu1 %vm890_vm7, %v6913_v12  ;;  %v1167_v10 = vpop.trf.xlu0 }
 0x2db   :  { %5671 = vmatmul.mubr.msk.f32.vlgmr.msra.gmra.mrb[20].mxu1 %vm841_vm8, %v1154_v62  ;;  %6054 = vmatprep.subr.bf16.mxu1 %v6677_v0  ;;  %v1451_v62 = vld [vmem:[%s7005_s19 + $0x68] sm:$0xff] }
 0x2dc   :  { %5673 = vmatprep.mubr.msk.f32.mxu1 %vm841_vm8, %v1155_v63  ;;  %v1453_v63 = vld [vmem:[%s7005_s19 + $0x78] sm:$0xff] }
 0x2de   :  { %v1168_v11 = vpop.trf.xlu0 }
 0x2df   :  { %5674 = vmatmul.mubr.msk.f32.gmra.mrb[22].mxu1 %vm841_vm8, %v1156_v2  ;;  %v6088_v2 = vpack.c.bf16 %v1448_v61, %v1446_v58 }
 0x2e0   :  { %5676 = vmatprep.mubr.msk.f32.mxu1 %vm841_vm8, %v1157_v3  ;;  %v6090_v3 = vpack.c.bf16 %v1453_v63, %v1451_v62 }
 0x2e3   :  { %5677 = vmatmul.mubr.msk.f32.gmra.mrb[24].mxu1 %vm841_vm8, %v1158_v4  ;;  %v1450_v4 = vld [vmem:[%s7005_s19 + $0x60] sm:$0xff] }
 0x2e4   :  { %5679 = vmatprep.mubr.msk.f32.mxu1 %vm841_vm8, %v1159_v5  ;;  %v1452_v5 = vld [vmem:[%s7005_s19 + $0x70] sm:$0xff] }
 0x2e7   :  { %5680 = vmatmul.mubr.msk.f32.gmra.mrb[26].mxu1 %vm841_vm8, %v1160_v50  ;;  %v4734_v50 = vld [vmem:[%s7027_s27] ss:$0 sm:$0xff] }
 0x2e8   :  { %5682 = vmatprep.mubr.msk.f32.mxu1 %vm841_vm8, %v1161_v54  ;;  %v6092_v54 = vpack.c.bf16 %v1452_v5, %v1450_v4  ;;  %v7038_v57 = vadd.f32 %v4734_v50, %v6837_v49  ;;  %v7041_v60 = vadd.f32 %v6835_v48, %v4734_v50 }
 0x2eb   :  { %5683 = vmatmul.mubr.msk.f32.gmra.mrb[28].mxu1 %vm841_vm8, %v1162_v6  ;;  %v343_v6 = vmax.f32 %v7038_v57, 0.0 }
 0x2ec   :  { %5685 = vmatprep.mubr.msk.f32.mxu1 %vm841_vm8, %v1163_v59  ;;  %v344_v59 = vmax.f32 %v7041_v60, 0.0 }
 0x2ef   :  { %5686 = vmatmul.mubr.msk.f32.gmra.mrb[30].mxu1 %vm841_vm8, %v1164_v7 }
 0x2f0   :  { %5688 = vmatprep.mubr.msk.f32.mxu1 %vm841_vm8, %v1165_v8 }
 0x2f3   :  { %5689 = vmatmul.mubr.msk.f32.gmra.mrb[32].mxu1 %vm841_vm8, %v1166_v9 }
 0x2f4   :  { %5691 = vmatprep.mubr.msk.f32.mxu1 %vm841_vm8, %v1167_v10 }
 0x2f7   :  { %5692 = vmatmul.mubr.msk.f32.gmra.mrb[34].mxu1 %vm841_vm8, %v1168_v11 }
 0x2f8   :  { %5726 = vmatprep.mubr.msk.f32.mxu1 %vm6679_vm0, %v6680_v1 }
 0x32e   :  { %v5599_v12 = vpop.f32.mrb[16].mxu0 }
 0x32f   :  { %v960_v13 = vpop.f32.mrb[17].mxu0 }
 0x330   :  { %v6019_v14 = vpack.c.bf16 %v5599_v12, %v960_v13 }
 0x332   :  { %6020 = vmatpush3.bf16.msra.mxu0 %v6019_v14 }
 0x333   :  { %6021 = vmatprep.subr.bf16.mxu0 %v6677_v0 }
 0x336   :  { %v5602_v15 = vpop.f32.mrb[18].mxu0 }
 0x337   :  { %v970_v16 = vpop.f32.mrb[19].mxu0 }
 0x338   :  { %v6022_v17 = vpack.c.bf16 %v5602_v15, %v970_v16 }
 0x33a   :  { %6023 = vmatpush3.bf16.msra.mxu0 %v6022_v17 }
 0x33b   :  { %6024 = vmatprep.subr.bf16.mxu0 %v6677_v0 }
 0x33e   :  { %v5605_v18 = vpop.f32.mrb[20].mxu0 }
 0x33f   :  { %v980_v19 = vpop.f32.mrb[21].mxu0 }
 0x340   :  { %v6025_v20 = vpack.c.bf16 %v5605_v18, %v980_v19 }
 0x342   :  { %6026 = vmatpush3.bf16.msra.mxu0 %v6025_v20 }
 0x343   :  { %6027 = vmatprep.subr.bf16.mxu0 %v6677_v0 }
 0x346   :  { %v5608_v21 = vpop.f32.mrb[22].mxu0 }
 0x347   :  { %v990_v22 = vpop.f32.mrb[23].mxu0 }
 0x348   :  { %v6028_v23 = vpack.c.bf16 %v5608_v21, %v990_v22 }
 0x34a   :  { %6029 = vmatpush3.bf16.msra.mxu0 %v6028_v23 }
 0x34b   :  { %6030 = vmatprep.subr.bf16.mxu0 %v6677_v0 }
 0x34e   :  { %v5611_v24 = vpop.f32.mrb[24].mxu0 }
 0x34f   :  { %v1000_v25 = vpop.f32.mrb[25].mxu0 }
 0x350   :  { %v6031_v26 = vpack.c.bf16 %v5611_v24, %v1000_v25 }
 0x352   :  { %6032 = vmatpush3.bf16.msra.mxu0 %v6031_v26 }
 0x353   :  { %6033 = vmatprep.subr.bf16.mxu0 %v6677_v0 }
 0x356   :  { %v5614_v27 = vpop.f32.mrb[26].mxu0 }
 0x357   :  { %v1010_v28 = vpop.f32.mrb[27].mxu0 }
 0x358   :  { %v6034_v29 = vpack.c.bf16 %v5614_v27, %v1010_v28 }
 0x35a   :  { %6035 = vmatpush3.bf16.msra.mxu0 %v6034_v29 }
 0x35b   :  { %6036 = vmatprep.subr.bf16.mxu0 %v6677_v0 }
 0x35e   :  { %v5617_v30 = vpop.f32.mrb[28].mxu0 }
 0x35f   :  { %v1020_v31 = vpop.f32.mrb[29].mxu0 }
 0x360   :  { %v6037_v32 = vpack.c.bf16 %v5617_v30, %v1020_v31 }
 0x362   :  { %6038 = vmatpush3.bf16.msra.mxu0 %v6037_v32 }
 0x363   :  { %6039 = vmatprep.subr.bf16.mxu0 %v6677_v0 }
 0x366   :  { %v5620_v36 = vpop.f32.mrb[30].mxu0 }
 0x367   :  { %v1030_v37 = vpop.f32.mrb[31].mxu0 }
 0x368   :  { %v6040_v41 = vpack.c.bf16 %v5620_v36, %v1030_v37  ;;  %v7074_v36 = vsub.s32 0, %v7071_v35  ;;  %v1454_v37 = vld [vmem:[%s4712_s1] sm:$0x3]  ;;  %s6710_s1 = smov 29  }
 0x369   :  { %s7998_s5 = sld [smem:[%s8107_s0 + %s6710_s1]]  }
 0x36a   :  { %6041 = vmatpush3.bf16.msra.mxu0 %v6040_v41  ;;  %v1459_v40 = vrot.slane %v1454_v37, %v7074_v36 }
 0x36b   :  { %6079 = vmatprep.subr.bf16.mxu0 %v6078_v38  ;;  %v7077_v38 = vsub.s32 1, %v7071_v35 }
 0x36d   :  { %5654 = vmatmul.mubr.f32.vlgmr.msra.gmra.mrb[32].mxu0 %v7017_v44  ;;  %v1463_v42 = vrot.slane %v1454_v37, %v7077_v38 }
 0x36e   :  { %6081 = vmatpush1.bf16.msra.mxu0 %v6080_v45  ;;  %1539 = vmatprep.mubr.f32.mxu0 %v6680_v1 }
 0x36f   :  { %6083 = vmatprep.subr.bf16.mxu0 %v6082_v46 }
 0x372   :  { %6085 = vmatpush1.bf16.msra.mxu0 %v6084_v55 }
 0x373   :  { %6087 = vmatprep.subr.bf16.mxu0 %v6086_v56  ;;  %v808_v56 = vld [vmem:[%s4708_s7] sm:$0xf]  ;;  %s6718_s7 = smov 37  }
 0x376   :  { %6089 = vmatpush1.bf16.msra.mxu0 %v6088_v2 }
 0x377   :  { %6091 = vmatprep.subr.bf16.mxu0 %v6090_v3 }
 0x37a   :  { %6093 = vmatpush1.bf16.msra.mxu0 %v6092_v54 }
 0x37b   :  { %6098 = vmatprep.subr.bf16.mxu0 %v6677_v0 }
 0x37d   :  { %4790 = vmatmul.mubr.msk.f32.vlgmr.msra.gmra.mrb[34].mxu0 %vm179_vm1, %v343_v6 }
 0x37e   :  { %1545 = vmatprep.mubr.f32.mxu0 %v6680_v1 }
 0x381   :  { %4791 = vmatmul.mubr.msk.f32.gmra.mrb[36].mxu0 %vm179_vm1, %v344_v59 }
 0x382   :  { %1551 = vmatprep.mubr.f32.mxu0 %v6680_v1 }
 0x3a0   :  { %v7054_v48 = vpop.f32.mrb[18].mxu1 }
 0x3a1   :  { %v5582_v49 = vpop.f32.mrb[19].mxu1 }
 0x3ae   :  { %v5672_v7 = vpop.f32.mrb[20].mxu1 }
 0x3af   :  { %v1283_v8 = vpop.f32.mrb[21].mxu1 }
 0x3b0   :  { %v6055_v9 = vpack.c.bf16 %v5672_v7, %v1283_v8 }
 0x3b2   :  { %v5675_v10 = vpop.f32.mrb[22].mxu1  ;;  %6056 = vmatpush3.bf16.msra.mxu1 %v6055_v9 }
 0x3b3   :  { %v1293_v11 = vpop.f32.mrb[23].mxu1  ;;  %6057 = vmatprep.subr.bf16.mxu1 %v6677_v0 }
 0x3b4   :  { %v6058_v12 = vpack.c.bf16 %v5675_v10, %v1293_v11 }
 0x3b6   :  { %v5678_v13 = vpop.f32.mrb[24].mxu1  ;;  %6059 = vmatpush3.bf16.msra.mxu1 %v6058_v12 }
 0x3b7   :  { %v1303_v14 = vpop.f32.mrb[25].mxu1  ;;  %6060 = vmatprep.subr.bf16.mxu1 %v6677_v0 }
 0x3b8   :  { %v6061_v15 = vpack.c.bf16 %v5678_v13, %v1303_v14 }
 0x3ba   :  { %v5681_v16 = vpop.f32.mrb[26].mxu1  ;;  %6062 = vmatpush3.bf16.msra.mxu1 %v6061_v15 }
 0x3bb   :  { %v1313_v17 = vpop.f32.mrb[27].mxu1  ;;  %6063 = vmatprep.subr.bf16.mxu1 %v6677_v0 }
 0x3bc   :  { %v6064_v18 = vpack.c.bf16 %v5681_v16, %v1313_v17 }
 0x3be   :  { %v5684_v19 = vpop.f32.mrb[28].mxu1  ;;  %6065 = vmatpush3.bf16.msra.mxu1 %v6064_v18 }
 0x3bf   :  { %v1323_v20 = vpop.f32.mrb[29].mxu1  ;;  %6066 = vmatprep.subr.bf16.mxu1 %v6677_v0 }
 0x3c0   :  { %v6067_v21 = vpack.c.bf16 %v5684_v19, %v1323_v20 }
 0x3c2   :  { %v5687_v22 = vpop.f32.mrb[30].mxu1  ;;  %6068 = vmatpush3.bf16.msra.mxu1 %v6067_v21 }
 0x3c3   :  { %v1333_v23 = vpop.f32.mrb[31].mxu1  ;;  %6069 = vmatprep.subr.bf16.mxu1 %v6677_v0 }
 0x3c4   :  { %v6070_v24 = vpack.c.bf16 %v5687_v22, %v1333_v23  ;;  %v1558_v23 = vld [vmem:[%s4697_s12] sm:$0xff] }
 0x3c6   :  { %v5690_v25 = vpop.f32.mrb[32].mxu1  ;;  %6071 = vmatpush3.bf16.msra.mxu1 %v6070_v24 }
 0x3c7   :  { %v1343_v26 = vpop.f32.mrb[33].mxu1  ;;  %6072 = vmatprep.subr.bf16.mxu1 %v6677_v0 }
 0x3c8   :  { %v6073_v27 = vpack.c.bf16 %v5690_v25, %v1343_v26 }
 0x3ca   :  { %v5693_v28 = vpop.f32.mrb[34].mxu1  ;;  %6074 = vmatpush3.bf16.msra.mxu1 %v6073_v27 }
 0x3cb   :  { %v1353_v29 = vpop.f32.mrb[35].mxu1  ;;  %6075 = vmatprep.subr.bf16.mxu1 %v6677_v0 }
 0x3cc   :  { %v6076_v30 = vpack.c.bf16 %v5693_v28, %v1353_v29  ;;  %v1559_v28 = vld [vmem:[%s4697_s12 + $0x8] sm:$0xff] }
 0x3ce   :  { %6077 = vmatpush3.bf16.msra.mxu1 %v6076_v30 }
 0x3cf   :  { %6094 = vmatprep.subr.bf16.mxu1 %v6677_v0 }
 0x3d1   :  { %5727 = vmatmul.mubr.f32.vlgmr.msra.gmra.mrb[36].mxu1 %v7017_v44 }
 0x3d2   :  { %5735 = vmatprep.mubr.msk.f32.mxu1 %vm6679_vm0, %v6680_v1 }
 0x440   :  { %v1105_v31 = vpop.f32.mrb[32].mxu0 }
 0x441   :  { %v5655_v32 = vpop.f32.mrb[33].mxu0  ;;  %v1106_v58 = vadd.f32 %v1105_v31, %v808_v56 }
 0x443   :  { %v1109_v2 = vmax.f32 %v1106_v58, 0.0 }
 0x450   :  { %v1541_v39 = vpop.f32.mrb[34].mxu0 }
 0x451   :  { %v1543_v41 = vpop.f32.mrb[35].mxu0  ;;  %v1542_v44 = vadd.f32 %v1541_v39, %v1459_v40  ;;  %v1560_v39 = vld [vmem:[%s4697_s12 + $0x10] sm:$0xff] }
 0x452   :  { %v7081_v47 = vadd.f32 %v1543_v41, %v1463_v42 }
 0x454   :  { %v1547_v43 = vpop.f32.mrb[36].mxu0 }
 0x455   :  { %v1548_v45 = vadd.f32 %v1547_v43, %v1459_v40  ;;  %v1549_v46 = vpop.f32.mrb[37].mxu0 }
 0x456   :  { %v7083_v51 = vadd.f32 %v1549_v46, %v1463_v42 }
 0x457   :  { %v6611_v52 = vpack.i.bf16 %v1548_v45, %v1542_v44 }
 0x458   :  { %v6621_v53 = vpack.i.bf16 %v7083_v51, %v7081_v47  ;;  %v6099_v55 = vpack.c.bf16 %v7083_v51, %v7081_v47 }
 0x459   :  { %6612 = vrot.lane.b32.xlu0 %v6611_v52, %s6694_s2 }
 0x45a   :  { %6100 = vmatpush3.bf16.msra.mxu0 %v6099_v55 }
 0x45b   :  { %5748 = vmatprep.subr.mxu0 %v6680_v1 }
 0x45d   :  { %1802 = vrot.lane.b32.xlu0 %v1548_v45, %s6695_s3 }
 0x4a4   :  { %v1428_v61 = vpop.f32.mrb[36].mxu1 }
 0x4a5   :  { %v1429_v62 = vadd.f32 %v1428_v61, %v808_v56  ;;  %v5728_v63 = vpop.f32.mrb[37].mxu1 }
 0x4a7   :  { %v1432_v3 = vmax.f32 %v1429_v62, 0.0 }
 0x4a9   :  { %v1434_v4 = vrot.slane %v1432_v3, 4 }
 0x4ab   :  { %v7095_v5 = vsel %vm1436_vm9, %v1109_v2, %v1434_v4 }
 0x4ac   :  { %4792 = vmatmul.mubr.msk.f32.gmra.mrb[38].mxu0 %vm179_vm1, %v7095_v5 }
 0x4ad   :  { %5750 = vmatprep.mubr.msk.f32.mxu0 %vm6679_vm0, %v6680_v1 }
 0x4cb   :  { %v6613_v50 = vpop.permute.xlu0 %6612 }
 0x4cc   :  { %v6615_v54 = vunpack.i.h.bf16 %v6613_v50  ;;  %v6614_v49 = vunpack.i.l.bf16 %v6613_v50 }
 0x4ce   :  { %v6095_v8 = vpack.c.bf16 %v6615_v54, %v6614_v49 }
 0x4cf   :  { %v1803_v20 = vpop.permute.xlu0 %1802 }
 0x4d0   :  { %6097 = vmatpush3.bf16.xpose.msk.msra.mxu1 %vm7103_vm11, %v6095_v8 }
 0x4d1   :  { %5733 = vmatprep.subr.mxu1 %v6680_v1 }
 0x57f   :  { %v1553_v9 = vpop.f32.mrb[38].mxu0 }
 0x580   :  { %v1554_v10 = vadd.f32 %v1553_v9, %v1459_v40  ;;  %v1555_v11 = vpop.f32.mrb[39].mxu0 }
 0x581   :  { %v7110_v12 = vadd.f32 %v1555_v11, %v1463_v42 }
 0x582   :  { %1576 = vrot.lane.b32.xlu1 %v1554_v10, %s6694_s2 }
 0x583   :  { %5749 = vmatpush3.msra.mxu0 %v7110_v12 }
 0x584   :  { %6105 = vmatprep.subr.bf16.mxu0 %v6677_v0 }
 0x586   :  { %6617 = vrot.lane.b32.xlu1 %v6611_v52, %s6697_s8 }
 0x58a   :  { %1810 = vrot.lane.b32.xlu1 %v1554_v10, %s6697_s8  ;;  %s6717_s8 = smov 36  }
 0x58b   :  { %s4730_s6 = sld [smem:[%s8107_s0 + %s6717_s8]]  }
 0x58e   :  { %1800 = vrot.lane.b32.xlu1 %v1542_v44, %s6695_s3 }
 0x592   :  { %1804 = vrot.lane.b32.xlu1 %v1554_v10, %s6695_s3 }
 0x5f4   :  { %v1577_v13 = vpop.permute.xlu1 %1576 }
 0x5f5   :  { %5734 = vmatpush3.xpose.msk.msra.mxu1 %vm1578_vm10, %v1577_v13 }
 0x5f6   :  { %6101 = vmatprep.subr.bf16.mxu1 %v6677_v0 }
 0x5f8   :  { %v6618_v14 = vpop.permute.xlu1 %6617  ;;  %5736 = vmatmul.mubr.msk.f32.vlgmr.msra.gmra.mrb[38].mxu1 %vm1578_vm10, %v1542_v44 }
 0x5f9   :  { %v6620_v15 = vunpack.i.h.bf16 %v6618_v14  ;;  %v6619_v16 = vunpack.i.l.bf16 %v6618_v14  ;;  %5738 = vmatprep.mubr.msk.f32.mxu1 %vm6679_vm0, %v6680_v1 }
 0x5fb   :  { %v6102_v17 = vpack.c.bf16 %v6620_v15, %v6619_v16 }
 0x5fc   :  { %5739 = vmatmul.mubr.msk.f32.gmra.mrb[40].mxu1 %vm1578_vm10, %v1548_v45  ;;  %v1811_v18 = vpop.permute.xlu1 %1810 }
 0x5fd   :  { %6104 = vmatpush3.bf16.xpose.msk.msra.mxu1 %vm7103_vm11, %v6102_v17  ;;  %5741 = vmatprep.mubr.msk.f32.mxu1 %vm6679_vm0, %v6680_v1 }
 0x5fe   :  { %5763 = vmatprep.subr.mxu1 %v6680_v1 }
 0x600   :  { %5742 = vmatmul.mubr.msk.f32.gmra.mrb[42].mxu1 %vm1578_vm10, %v1554_v10  ;;  %v1801_v19 = vpop.permute.xlu1 %1800 }
 0x601   :  { %5765 = vmatprep.mubr.msk.f32.mxu1 %vm6679_vm0, %v6680_v1 }
 0x604   :  { %v1805_v21 = vpop.permute.xlu1 %1804 }
 0x605   :  { %5764 = vmatpush3.xpose.msk.msra.mxu1 %vm1578_vm10, %v1811_v18 }
 0x606   :  { %6108 = vmatprep.subr.bf16.mxu1 %v6677_v0 }
 0x608   :  { %5766 = vmatmul.mubr.msk.f32.vlgmr.msra.gmra.mrb[44].mxu1 %vm1578_vm10, %v1801_v19 }
 0x609   :  { %5768 = vmatprep.mubr.msk.f32.mxu1 %vm6679_vm0, %v6680_v1 }
 0x60c   :  { %5769 = vmatmul.mubr.msk.f32.gmra.mrb[46].mxu1 %vm1578_vm10, %v1803_v20 }
 0x60d   :  { %5771 = vmatprep.mubr.msk.f32.mxu1 %vm6679_vm0, %v6680_v1 }
 0x610   :  { %5772 = vmatmul.mubr.msk.f32.gmra.mrb[48].mxu1 %vm1578_vm10, %v1805_v21 }
 0x611   :  { %5797 = vmatprep.mubr.msk.f32.mxu1 %vm6679_vm0, %v6680_v1 }
 0x6cb   :  { %v1657_v22 = vpop.f32.mrb[38].mxu1 }
 0x6cc   :  { %v1671_v24 = vmul.f32 0.17677669, %v1657_v22  ;;  %v5737_v25 = vpop.f32.mrb[39].mxu1 }
 0x6ce   :  { %v1674_v26 = vadd.f32 %v1671_v24, %v1558_v23 }
 0x6cf   :  { %v1662_v27 = vpop.f32.mrb[40].mxu1 }
 0x6d0   :  { %v1672_v29 = vmul.f32 0.17677669, %v1662_v27  ;;  %v5740_v30 = vpop.f32.mrb[41].mxu1  ;;  %v1678_v31 = vsel %vm1677_vm12, %v1674_v26, -inf }
 0x6d1   :  { %1679 = vmax.xlane.f32.xlu0 %v1678_v31 }
 0x6d2   :  { %v1675_v32 = vadd.f32 %v1672_v29, %v1559_v28 }
 0x6d3   :  { %v1667_v37 = vpop.f32.mrb[42].mxu1 }
 0x6d4   :  { %v1673_v40 = vmul.f32 0.17677669, %v1667_v37  ;;  %v5743_v41 = vpop.f32.mrb[43].mxu1  ;;  %v1681_v42 = vsel %vm1677_vm12, %v1675_v32, -inf }
 0x6d5   :  { %1682 = vmax.xlane.f32.xlu1 %v1681_v42 }
 0x6d6   :  { %v1676_v43 = vadd.f32 %v1673_v40, %v1560_v39 }
 0x6d8   :  { %v1684_v44 = vsel %vm1677_vm12, %v1676_v43, -inf }
 0x6d9   :  { %1685 = vmax.xlane.f32.xlu0 %v1684_v44 }
 0x6db   :  { %v1890_v45 = vpop.f32.mrb[44].mxu1 }
 0x6dc   :  { %v1904_v46 = vmul.f32 0.17677669, %v1890_v45  ;;  %v5767_v52 = vpop.f32.mrb[45].mxu1 }
 0x6de   :  { %v1907_v55 = vadd.f32 %v1904_v46, %v1558_v23 }
 0x6df   :  { %v1895_v56 = vpop.f32.mrb[46].mxu1 }
 0x6e0   :  { %v1905_v58 = vmul.f32 0.17677669, %v1895_v56  ;;  %v5770_v61 = vpop.f32.mrb[47].mxu1  ;;  %v1910_v62 = vsel %vm1677_vm12, %v1907_v55, -inf }
 0x6e1   :  { %1911 = vmax.xlane.f32.xlu0 %v1910_v62 }
 0x6e2   :  { %v1908_v63 = vadd.f32 %v1905_v58, %v1559_v28 }
 0x6e3   :  { %v1900_v2 = vpop.f32.mrb[48].mxu1 }
 0x6e4   :  { %v1906_v3 = vmul.f32 0.17677669, %v1900_v2  ;;  %v5773_v4 = vpop.f32.mrb[49].mxu1  ;;  %v1913_v50 = vsel %vm1677_vm12, %v1908_v63, -inf }
 0x6e5   :  { %1914 = vmax.xlane.f32.xlu1 %v1913_v50  ;;  %v1562_v4 = vld [vmem:[%s7171_s16 + $0x8] sm:$0xff] }
 0x6e6   :  { %v1909_v54 = vadd.f32 %v1906_v3, %v1560_v39  ;;  %v1561_v3 = vld [vmem:[%s7171_s16] sm:$0xff] }
 0x6e8   :  { %v1916_v49 = vsel %vm1677_vm12, %v1909_v54, -inf }
 0x6e9   :  { %1917 = vmax.xlane.f32.xlu0 %v1916_v49 }
 0x75e   :  { %v1680_v7 = vpop.xlane.xlu0 %1679 }
 0x75f   :  { %v1687_v8 = vsub.f32 %v1674_v26, %v1680_v7  ;;  %v1563_v7 = vld [vmem:[%s7171_s16 + $0x10] sm:$0xff] }
 0x761   :  { %v1690_v9 = vmul.f32 1.442695, %v1687_v8  ;;  %v1564_v8 = vld [vmem:[%s7171_s16 + $0x18] sm:$0xff] }
 0x762   :  { %v1683_v10 = vpop.xlane.xlu1 %1682 }
 0x763   :  { %6628 = vpow2.f32 %v1690_v9  ;;  %v1688_v11 = vsub.f32 %v1675_v32, %v1683_v10  ;;  %v6118_v10 = vpack.c.bf16 %v1564_v8, %v1563_v7 }
 0x765   :  { %v1692_v13 = vmul.f32 1.442695, %v1688_v11 }
 0x766   :  { %v1686_v14 = vpop.xlane.xlu0 %1685 }
 0x767   :  { %6630 = vpow2.f32 %v1692_v13  ;;  %v1689_v15 = vsub.f32 %v1676_v43, %v1686_v14 }
 0x769   :  { %v1694_v16 = vmul.f32 1.442695, %v1689_v15 }
 0x76b   :  { %6632 = vpow2.f32 %v1694_v16  ;;  %v1565_v16 = vld [vmem:[%s7171_s16 + $0x20] sm:$0xff] }
 0x76d   :  { %v6629_v17 = vpop.eup %6628 }
 0x76e   :  { %v1912_v18 = vpop.xlane.xlu0 %1911  ;;  %v1696_v19 = vsel %vm1677_vm12, %v6629_v17, 0.0 }
 0x76f   :  { %v1919_v20 = vsub.f32 %v1907_v55, %v1912_v18  ;;  %1697 = vadd.xlane.f32.xlu1 %v1696_v19  ;;  %v1567_v19 = vld [vmem:[%s7171_s16 + $0x30] sm:$0xff] }
 0x771   :  { %v6631_v21 = vpop.eup %6630  ;;  %v1922_v22 = vmul.f32 1.442695, %v1919_v20  ;;  %v1568_v20 = vld [vmem:[%s7171_s16 + $0x38] sm:$0xff] }
 0x772   :  { %v1915_v23 = vpop.xlane.xlu1 %1914  ;;  %v1699_v24 = vsel %vm1677_vm12, %v6631_v21, 0.0 }
 0x773   :  { %6634 = vpow2.f32 %v1922_v22  ;;  %v1920_v25 = vsub.f32 %v1908_v63, %v1915_v23  ;;  %1700 = vadd.xlane.f32.xlu0 %v1699_v24 }
 0x775   :  { %v6633_v26 = vpop.eup %6632  ;;  %v1924_v27 = vmul.f32 1.442695, %v1920_v25 }
 0x776   :  { %v1702_v28 = vsel %vm1677_vm12, %v6633_v26, 0.0  ;;  %v1918_v37 = vpop.xlane.xlu0 %1917 }
 0x777   :  { %6636 = vpow2.f32 %v1924_v27  ;;  %1703 = vadd.xlane.f32.xlu1 %v1702_v28  ;;  %v1921_v39 = vsub.f32 %v1909_v54, %v1918_v37  ;;  %v6115_v54 = vpack.c.bf16 %v1562_v4, %v1561_v3 }
 0x779   :  { %v1926_v40 = vmul.f32 1.442695, %v1921_v39 }
 0x77b   :  { %6638 = vpow2.f32 %v1926_v40 }
 0x77d   :  { %v6635_v29 = vpop.eup %6634 }
 0x77e   :  { %v1928_v30 = vsel %vm1677_vm12, %v6635_v29, 0.0 }
 0x77f   :  { %1929 = vadd.xlane.f32.xlu0 %v1928_v30 }
 0x781   :  { %v6637_v31 = vpop.eup %6636 }
 0x782   :  { %v1931_v32 = vsel %vm1677_vm12, %v6637_v31, 0.0 }
 0x783   :  { %1932 = vadd.xlane.f32.xlu0 %v1931_v32 }
 0x785   :  { %v6639_v41 = vpop.eup %6638 }
 0x786   :  { %v1934_v42 = vsel %vm1677_vm12, %v6639_v41, 0.0 }
 0x788   :  { %6622 = vrot.lane.b32.xlu1 %v6621_v53, %s6695_s3 }
 0x799   :  { %1950 = vrot.lane.b32.xlu0 %v7110_v12, %s6695_s3 }
 0x7ac   :  { %1935 = vadd.xlane.f32.xlu1 %v1934_v42 }
 0x7fc   :  { %v1698_v43 = vpop.xlane.xlu1 %1697 }
 0x7fd   :  { %6640 = vrcp.f32 %v1698_v43 }
 0x800   :  { %v1701_v44 = vpop.xlane.xlu0 %1700 }
 0x801   :  { %6642 = vrcp.f32 %v1701_v44 }
 0x804   :  { %v1704_v45 = vpop.xlane.xlu1 %1703 }
 0x805   :  { %6644 = vrcp.f32 %v1704_v45 }
 0x807   :  { %v6641_v46 = vpop.eup %6640 }
 0x808   :  { %v1708_v47 = vmul.f32 %v6641_v46, %v6629_v17  ;;  %v6623_v51 = vpop.permute.xlu1 %6622  ;;  %v1566_v17 = vld [vmem:[%s7171_s16 + $0x28] sm:$0xff]  ;;  %v4817_v46 = vld [vmem:[%s4714_s20] ss:$0 sm:$0xff] }
 0x809   :  { %v6625_v53 = vunpack.i.h.bf16 %v6623_v51  ;;  %v6624_v52 = vunpack.i.l.bf16 %v6623_v51  ;;  %v6109_v18 = vpack.c.bf16 %v1566_v17, %v1565_v16  ;;  %v2314_v17 = vld [vmem:[%s7243_s24 + $0x98] sm:$0xff] }
 0x80a   :  { %5751 = vmatmul.mubr.msk.f32.vlgmr.msra.gmra.mrb[40].mxu0 %vm1677_vm12, %v1708_v47 }
 0x80b   :  { %v6643_v12 = vpop.eup %6642  ;;  %v6106_v55 = vpack.c.bf16 %v6625_v53, %v6624_v52  ;;  %5753 = vmatprep.mubr.msk.f32.mxu0 %vm6679_vm0, %v6680_v1  ;;  %6110 = vmatpush3.bf16.msra.mxu1 %v6109_v18  ;;  %v2295_v18 = vld [vmem:[%s7243_s24] sm:$0xff] }
 0x80c   :  { %v1930_v56 = vpop.xlane.xlu0 %1929  ;;  %v1709_v58 = vmul.f32 %v6643_v12, %v6631_v21  ;;  %v6112_v21 = vpack.c.bf16 %v1568_v20, %v1567_v19  ;;  %6111 = vmatprep.subr.bf16.mxu1 %v6677_v0  ;;  %v2311_v19 = vld [vmem:[%s7243_s24 + $0x80] sm:$0xff] }
 0x80d   :  { %6646 = vrcp.f32 %v1930_v56  ;;  %6107 = vmatpush3.bf16.msra.mxu0 %v6106_v55 }
 0x80e   :  { %5754 = vmatmul.mubr.msk.f32.gmra.mrb[42].mxu0 %vm1677_vm12, %v1709_v58  ;;  %5778 = vmatprep.subr.mxu0 %v6680_v1 }
 0x80f   :  { %v6645_v61 = vpop.eup %6644  ;;  %5756 = vmatprep.mubr.msk.f32.mxu0 %vm6679_vm0, %v6680_v1  ;;  %6113 = vmatpush3.bf16.msra.mxu1 %v6112_v21  ;;  %v6122_v21 = vpack.c.bf16 %v2311_v19, %v2295_v18 }
 0x810   :  { %v1933_v62 = vpop.xlane.xlu0 %1932  ;;  %v1710_v63 = vmul.f32 %v6645_v61, %v6633_v26 }
 0x811   :  { %6648 = vrcp.f32 %v1933_v62 }
 0x812   :  { %5757 = vmatmul.mubr.msk.f32.gmra.mrb[44].mxu0 %vm1677_vm12, %v1710_v63 }
 0x813   :  { %5780 = vmatprep.mubr.msk.f32.mxu0 %vm6679_vm0, %v6680_v1 }
 0x814   :  { %v1951_v2 = vpop.permute.xlu0 %1950 }
 0x815   :  { %5779 = vmatpush3.msra.mxu0 %v1951_v2 }
 0x816   :  { %6114 = vmatprep.subr.bf16.mxu0 %v6677_v0 }
 0x817   :  { %v6647_v50 = vpop.eup %6646 }
 0x818   :  { %v1940_v49 = vmul.f32 %v6647_v50, %v6635_v29 }
 0x81a   :  { %5781 = vmatmul.mubr.msk.f32.vlgmr.msra.gmra.mrb[46].mxu0 %vm1677_vm12, %v1940_v49 }
 0x81b   :  { %v6649_v9 = vpop.eup %6648  ;;  %5783 = vmatprep.mubr.msk.f32.mxu0 %vm6679_vm0, %v6680_v1  ;;  %6116 = vmatpush3.bf16.msra.mxu0 %v6115_v54 }
 0x81c   :  { %v1941_v11 = vmul.f32 %v6649_v9, %v6637_v31  ;;  %6117 = vmatprep.subr.bf16.mxu0 %v6677_v0 }
 0x81e   :  { %5784 = vmatmul.mubr.msk.f32.gmra.mrb[48].mxu0 %vm1677_vm12, %v1941_v11 }
 0x81f   :  { %5786 = vmatprep.mubr.msk.f32.mxu0 %vm6679_vm0, %v6680_v1  ;;  %6119 = vmatpush3.bf16.msra.mxu0 %v6118_v10 }
 0x839   :  { %v1936_v13 = vpop.xlane.xlu1 %1935 }
 0x83a   :  { %6650 = vrcp.f32 %v1936_v13  ;;  %v2296_v13 = vld [vmem:[%s7243_s24 + $0x8] sm:$0xff] }
 0x844   :  { %v6651_v14 = vpop.eup %6650 }
 0x845   :  { %v1942_v15 = vmul.f32 %v6651_v14, %v6639_v41  ;;  %v2312_v14 = vld [vmem:[%s7243_s24 + $0x88] sm:$0xff] }
 0x846   :  { %v6120_v16 = vpack.c.bf16 %v2312_v14, %v2296_v13  ;;  %v2300_v13 = vld [vmem:[%s7243_s24 + $0x28] sm:$0xff] }
 0x847   :  { %5787 = vmatmul.mubr.msk.f32.gmra.mrb[50].mxu0 %vm1677_vm12, %v1942_v15  ;;  %v2298_v15 = vld [vmem:[%s7243_s24 + $0x18] sm:$0xff]  ;;  %v2316_v14 = vld [vmem:[%s7243_s24 + $0xa8] sm:$0xff] }
 0x848   :  { %5814 = vmatprep.mubr.msk.f32.mxu0 %vm6679_vm0, %v6680_v1  ;;  %v6136_v20 = vpack.c.bf16 %v2314_v17, %v2298_v15  ;;  %6121 = vmatprep.subr.bf16.mxu1 %v6120_v16  ;;  %v2302_v15 = vld [vmem:[%s7243_s24 + $0x38] sm:$0xff]  ;;  %v6152_v16 = vpack.c.bf16 %v2316_v14, %v2300_v13  ;;  %v2395_v14 = vld [vmem:[%s7243_s24 + $0x320] sm:$0xff] }
 0x849   :  { %v2318_v17 = vld [vmem:[%s7243_s24 + $0xb8] sm:$0xff] }
 0x84a   :  { %6137 = vmatprep.subr.bf16.mxu0 %v6136_v20  ;;  %v6168_v18 = vpack.c.bf16 %v2318_v17, %v2302_v15  ;;  %v2411_v15 = vld [vmem:[%s7243_s24 + $0x3a0] sm:$0xff] }
 0x8dd   :  { %v1786_v22 = vpop.f32.mrb[40].mxu0 }
 0x8de   :  { %v5752_v23 = vpop.f32.mrb[41].mxu0  ;;  %5815 = vmatmul.mubr.msk.f32.vlgmr.msra.gmra.mrb[52].mxu0 %vm1578_vm10, %v1786_v22  ;;  %v2297_v22 = vld [vmem:[%s7243_s24 + $0x10] sm:$0xff] }
 0x8df   :  { %5817 = vmatprep.mubr.msk.f32.mxu0 %vm6679_vm0, %v6680_v1  ;;  %v2313_v23 = vld [vmem:[%s7243_s24 + $0x90] sm:$0xff] }
 0x8e1   :  { %v1791_v24 = vpop.f32.mrb[42].mxu0 }
 0x8e2   :  { %v5755_v25 = vpop.f32.mrb[43].mxu0  ;;  %5818 = vmatmul.mubr.msk.f32.gmra.mrb[54].mxu0 %vm1578_vm10, %v1791_v24  ;;  %v6138_v24 = vpack.c.bf16 %v2313_v23, %v2297_v22 }
 0x8e3   :  { %5820 = vmatprep.mubr.msk.f32.mxu0 %vm6679_vm0, %v6680_v1  ;;  %v2328_v25 = vld [vmem:[%s7243_s24 + $0x108] sm:$0xff] }
 0x8e4   :  { %6139 = vmatpush1.bf16.msra.mxu0 %v6138_v24 }
 0x8e5   :  { %v1796_v26 = vpop.f32.mrb[44].mxu0 }
 0x8e6   :  { %v5758_v27 = vpop.f32.mrb[45].mxu0  ;;  %5821 = vmatmul.mubr.msk.f32.gmra.mrb[56].mxu0 %vm1578_vm10, %v1796_v26  ;;  %v2344_v26 = vld [vmem:[%s7243_s24 + $0x188] sm:$0xff] }
 0x8e7   :  { %2663 = vmatprep.mubr.f32.mxu0 %v6680_v1  ;;  %v2330_v27 = vld [vmem:[%s7243_s24 + $0x118] sm:$0xff] }
 0x8ed   :  { %v2030_v28 = vpop.f32.mrb[46].mxu0 }
 0x8ee   :  { %v5782_v29 = vpop.f32.mrb[47].mxu0  ;;  %5798 = vmatmul.mubr.msk.f32.vlgmr.msra.gmra.mrb[50].mxu1 %vm1578_vm10, %v2030_v28  ;;  %v6124_v28 = vpack.c.bf16 %v2344_v26, %v2328_v25  ;;  %v7293_v25 = vld [vmem:[%s4715_s29] ss:$0 sm:$0xff]  ;;  %s6716_s29 = smov 34  }
 0x8ef   :  { %5800 = vmatprep.mubr.msk.f32.mxu1 %vm6679_vm0, %v6680_v1  ;;  %6123 = vmatpush1.bf16.msra.mxu1 %v6122_v21  ;;  %v2346_v29 = vld [vmem:[%s7243_s24 + $0x198] sm:$0xff]  ;;  %v7295_v26 = vld [vmem:[%s4716_s4] ss:$0 sm:$0xff]  ;;  %s4728_s3 = sld [smem:[%s8107_s0 + %s6716_s29]]  }
 0x8f0   :  { %6125 = vmatprep.subr.bf16.mxu1 %v6124_v28  ;;  %v2299_v28 = vld [vmem:[%s7243_s24 + $0x20] sm:$0xff] }
 0x8f1   :  { %v2035_v30 = vpop.f32.mrb[48].mxu0 }
 0x8f2   :  { %v5785_v31 = vpop.f32.mrb[49].mxu0  ;;  %5801 = vmatmul.mubr.msk.f32.gmra.mrb[52].mxu1 %vm1578_vm10, %v2035_v30  ;;  %v2327_v30 = vld [vmem:[%s7243_s24 + $0x100] sm:$0xff] }
 0x8f3   :  { %5803 = vmatprep.mubr.msk.f32.mxu1 %vm6679_vm0, %v6680_v1  ;;  %v2343_v31 = vld [vmem:[%s7243_s24 + $0x180] sm:$0xff] }
 0x91a   :  { %v2040_v32 = vpop.f32.mrb[50].mxu0 }
 0x91b   :  { %v5788_v37 = vpop.f32.mrb[51].mxu0  ;;  %5804 = vmatmul.mubr.msk.f32.gmra.mrb[54].mxu1 %vm1578_vm10, %v2040_v32  ;;  %v6140_v32 = vpack.c.bf16 %v2346_v29, %v2330_v27  ;;  %v2315_v29 = vld [vmem:[%s7243_s24 + $0xa0] sm:$0xff] }
 0x91c   :  { %2580 = vmatprep.mubr.f32.mxu1 %v6680_v1  ;;  %v6126_v37 = vpack.c.bf16 %v2343_v31, %v2327_v30  ;;  %v2301_v30 = vld [vmem:[%s7243_s24 + $0x30] sm:$0xff] }
 0x91d   :  { %6141 = vmatprep.subr.bf16.mxu0 %v6140_v32  ;;  %v2317_v31 = vld [vmem:[%s7243_s24 + $0xb0] sm:$0xff]  ;;  %v2332_v32 = vld [vmem:[%s7243_s24 + $0x128] sm:$0xff] }
 0x91e   :  { %6127 = vmatpush1.bf16.msra.mxu1 %v6126_v37 }
 0x9b1   :  { %v2208_v39 = vpop.f32.mrb[52].mxu0 }
 0x9b2   :  { %v5816_v40 = vpop.f32.mrb[53].mxu0 }
 0x9b3   :  { %v2345_v40 = vld [vmem:[%s7243_s24 + $0x190] sm:$0xff] }
 0x9b5   :  { %v2213_v41 = vpop.f32.mrb[54].mxu0 }
 0x9b6   :  { %v5819_v42 = vpop.f32.mrb[55].mxu0 }
 0x9b7   :  { %v2360_v42 = vld [vmem:[%s7243_s24 + $0x208] sm:$0xff] }
 0x9b9   :  { %v2218_v43 = vpop.f32.mrb[56].mxu0 }
 0x9ba   :  { %v5822_v44 = vpop.f32.mrb[57].mxu0 }
 0x9bb   :  { %v2362_v44 = vld [vmem:[%s7243_s24 + $0x218] sm:$0xff] }
 0x9c1   :  { %v2119_v45 = vpop.f32.mrb[50].mxu1 }
 0x9c2   :  { %v2209_v47 = vadd.f32 %v2208_v39, %v2119_v45  ;;  %v5799_v51 = vpop.f32.mrb[51].mxu1  ;;  %v2329_v39 = vld [vmem:[%s7243_s24 + $0x110] sm:$0xff] }
 0x9c3   :  { %v2375_v51 = vld [vmem:[%s7243_s24 + $0x280] sm:$0xff] }
 0x9c4   :  { %v2229_v53 = vadd.f32 %v4817_v46, %v2209_v47  ;;  %v2359_v47 = vld [vmem:[%s7243_s24 + $0x200] sm:$0xff] }
 0x9c5   :  { %v2124_v52 = vpop.f32.mrb[52].mxu1 }
 0x9c6   :  { %v2214_v12 = vadd.f32 %v2213_v41, %v2124_v52  ;;  %v5802_v55 = vpop.f32.mrb[53].mxu1  ;;  %v2232_v56 = vadd.f32 %v2229_v53, %v343_v6  ;;  %v6142_v41 = vpack.c.bf16 %v2345_v40, %v2329_v39  ;;  %v6130_v52 = vpack.c.bf16 %v2375_v51, %v2359_v47  ;;  %v2348_v39 = vld [vmem:[%s7243_s24 + $0x1a8] sm:$0xff]  ;;  %v2334_v40 = vld [vmem:[%s7243_s24 + $0x138] sm:$0xff]  ;;  %v2347_v47 = vld [vmem:[%s7243_s24 + $0x1a0] sm:$0xff] }
 0x9c7   :  { %v2377_v55 = vld [vmem:[%s7243_s24 + $0x290] sm:$0xff]  ;;  %v6156_v51 = vpack.c.bf16 %v2348_v39, %v2332_v32 }
 0x9c8   :  { %v2230_v58 = vadd.f32 %v4817_v46, %v2214_v12  ;;  %v2237_v61 = vsel %vm179_vm1, %v2232_v56, 0.0  ;;  %6143 = vmatpush1.bf16.msra.mxu0 %v6142_v41  ;;  %v2361_v12 = vld [vmem:[%s7243_s24 + $0x210] sm:$0xff]  ;;  %v2350_v41 = vld [vmem:[%s7243_s24 + $0x1b8] sm:$0xff] }
 0x9c9   :  { %2238 = vadd.xlane.f32.xlu0 %v2237_v61  ;;  %v2408_v61 = vld [vmem:[%s7243_s24 + $0x388] sm:$0xff] }
 0x9ca   :  { %v2233_v62 = vadd.f32 %v2230_v58, %v344_v59  ;;  %v2392_v58 = vld [vmem:[%s7243_s24 + $0x308] sm:$0xff] }
 0x9cc   :  { %v2240_v63 = vsel %vm179_vm1, %v2233_v62, 0.0 }
 0x9cd   :  { %2241 = vadd.xlane.f32.xlu1 %v2240_v63  ;;  %v6132_v63 = vpack.c.bf16 %v2408_v61, %v2392_v58  ;;  %v2366_v58 = vld [vmem:[%s7243_s24 + $0x238] sm:$0xff] }
 0x9ce   :  { %v2382_v61 = vld [vmem:[%s7243_s24 + $0x2b8] sm:$0xff] }
 0x9ee   :  { %v2129_v2 = vpop.f32.mrb[54].mxu1 }
 0x9ef   :  { %v2219_v3 = vadd.f32 %v2218_v43, %v2129_v2  ;;  %v5805_v4 = vpop.f32.mrb[55].mxu1  ;;  %v2376_v43 = vld [vmem:[%s7243_s24 + $0x288] sm:$0xff]  ;;  %v2410_v2 = vld [vmem:[%s7243_s24 + $0x398] sm:$0xff] }
 0x9f0   :  { %v6128_v45 = vpack.c.bf16 %v2376_v43, %v2360_v42  ;;  %v2407_v4 = vld [vmem:[%s7243_s24 + $0x380] sm:$0xff] }
 0x9f1   :  { %v2231_v50 = vadd.f32 %v4817_v46, %v2219_v3  ;;  %v2378_v46 = vld [vmem:[%s7243_s24 + $0x298] sm:$0xff]  ;;  %v2391_v3 = vld [vmem:[%s7243_s24 + $0x300] sm:$0xff] }
 0x9f2   :  { %v6144_v53 = vpack.c.bf16 %v2378_v46, %v2362_v44  ;;  %6129 = vmatprep.subr.bf16.mxu1 %v6128_v45  ;;  %v6154_v44 = vpack.c.bf16 %v2315_v29, %v2299_v28  ;;  %v6170_v45 = vpack.c.bf16 %v2317_v31, %v2301_v30  ;;  %v2331_v46 = vld [vmem:[%s7243_s24 + $0x120] sm:$0xff] }
 0x9f3   :  { %v7226_v54 = vadd.f32 %v2231_v50, %v7095_v5  ;;  %6131 = vmatpush1.bf16.msra.mxu1 %v6130_v52  ;;  %v2333_v52 = vld [vmem:[%s7243_s24 + $0x130] sm:$0xff] }
 0x9f4   :  { %6145 = vmatprep.subr.bf16.mxu0 %v6144_v53  ;;  %6133 = vmatprep.subr.bf16.mxu1 %v6132_v63  ;;  %v6172_v53 = vpack.c.bf16 %v2350_v41, %v2334_v40  ;;  %v6158_v63 = vpack.c.bf16 %v2347_v47, %v2331_v46  ;;  %v2303_v40 = vld [vmem:[%s7243_s24 + $0x40] sm:$0xff]  ;;  %v2354_v46 = vld [vmem:[%s7243_s24 + $0x1d8] sm:$0xff] }
 0x9f5   :  { %v2243_v57 = vsel %vm179_vm1, %v7226_v54, 0.0 }
 0x9f6   :  { %2244 = vadd.xlane.f32.xlu1 %v2243_v57  ;;  %v6134_v57 = vpack.c.bf16 %v2407_v4, %v2391_v3  ;;  %v2363_v3 = vld [vmem:[%s7243_s24 + $0x220] sm:$0xff] }
 0x9f7   :  { %v2379_v4 = vld [vmem:[%s7243_s24 + $0x2a0] sm:$0xff] }
 0x9f8   :  { %6135 = vmatpush1.bf16.msra.mxu1 %v6134_v57  ;;  %v6176_v57 = vpack.c.bf16 %v2382_v61, %v2366_v58  ;;  %v2384_v58 = vld [vmem:[%s7243_s24 + $0x2c8] sm:$0xff]  ;;  %v2370_v61 = vld [vmem:[%s7243_s24 + $0x258] sm:$0xff] }
 0x9f9   :  { %6153 = vmatprep.subr.bf16.mxu1 %v6152_v16 }
 0xa56   :  { %v2239_v6 = vpop.xlane.xlu0 %2238 }
 0xa57   :  { %v2247_v49 = vmul.f32 0.015625, %v2239_v6  ;;  %v2393_v6 = vld [vmem:[%s7243_s24 + $0x310] sm:$0xff] }
 0xa59   :  { %v7230_v7 = vsub.f32 %v2232_v56, %v2247_v49  ;;  %v6146_v56 = vpack.c.bf16 %v2377_v55, %v2361_v12  ;;  %v2409_v49 = vld [vmem:[%s7243_s24 + $0x390] sm:$0xff]  ;;  %v2364_v55 = vld [vmem:[%s7243_s24 + $0x228] sm:$0xff] }
 0xa5a   :  { %v2242_v60 = vpop.xlane.xlu1 %2241  ;;  %v2349_v12 = vld [vmem:[%s7243_s24 + $0x1b0] sm:$0xff] }
 0xa5b   :  { %v2248_v59 = vmul.f32 0.015625, %v2242_v60  ;;  %v2253_v8 = vmul.f32 %v7230_v7, %v7230_v7  ;;  %6147 = vmatpush1.bf16.msra.mxu0 %v6146_v56  ;;  %v6150_v60 = vpack.c.bf16 %v2409_v49, %v2393_v6  ;;  %v2365_v6 = vld [vmem:[%s7243_s24 + $0x230] sm:$0xff] }
 0xa5c   :  { %v2381_v49 = vld [vmem:[%s7243_s24 + $0x2b0] sm:$0xff] }
 0xa5d   :  { %v7234_v9 = vsub.f32 %v2233_v62, %v2248_v59  ;;  %v2256_v10 = vsel %vm179_vm1, %v2253_v8, 0.0  ;;  %v2394_v62 = vld [vmem:[%s7243_s24 + $0x318] sm:$0xff]  ;;  %v6178_v13 = vpack.c.bf16 %v2381_v49, %v2365_v6  ;;  %v2385_v6 = vld [vmem:[%s7243_s24 + $0x2d0] sm:$0xff]  ;;  %v2400_v49 = vld [vmem:[%s7243_s24 + $0x348] sm:$0xff] }
 0xa5e   :  { %2257 = vadd.xlane.f32.xlu0 %v2256_v10  ;;  %v6148_v50 = vpack.c.bf16 %v2410_v2, %v2394_v62  ;;  %v6174_v2 = vpack.c.bf16 %v2349_v12, %v2333_v52  ;;  %v2337_v52 = vld [vmem:[%s7243_s24 + $0x150] sm:$0xff] }
 0xa5f   :  { %v2254_v5 = vmul.f32 %v7234_v9, %v7234_v9  ;;  %v2353_v12 = vld [vmem:[%s7243_s24 + $0x1d0] sm:$0xff] }
 0xa60   :  { %6149 = vmatprep.subr.bf16.mxu0 %v6148_v50 }
 0xa61   :  { %v2259_v11 = vsel %vm179_vm1, %v2254_v5, 0.0  ;;  %6151 = vmatpush1.bf16.msra.mxu0 %v6150_v60  ;;  %v2396_v60 = vld [vmem:[%s7243_s24 + $0x328] sm:$0xff] }
 0xa62   :  { %2260 = vadd.xlane.f32.xlu1 %v2259_v11  ;;  %6169 = vmatprep.subr.bf16.mxu0 %v6168_v18  ;;  %v2397_v18 = vld [vmem:[%s7243_s24 + $0x330] sm:$0xff] }
 0xa83   :  { %v2245_v59 = vpop.xlane.xlu1 %2244 }
 0xa84   :  { %v2249_v8 = vmul.f32 0.015625, %v2245_v59  ;;  %v2412_v59 = vld [vmem:[%s7243_s24 + $0x3a8] sm:$0xff] }
 0xa85   :  { %v6164_v16 = vpack.c.bf16 %v2412_v59, %v2396_v60 }
 0xa86   :  { %v7278_v10 = vsub.f32 %v7226_v54, %v2249_v8  ;;  %v2398_v8 = vld [vmem:[%s7243_s24 + $0x338] sm:$0xff] }
 0xa88   :  { %v2255_v5 = vmul.f32 %v7278_v10, %v7278_v10 }
 0xa8a   :  { %v2262_v11 = vsel %vm179_vm1, %v2255_v5, 0.0  ;;  %v2414_v5 = vld [vmem:[%s7243_s24 + $0x3b8] sm:$0xff] }
 0xa8b   :  { %2263 = vadd.xlane.f32.xlu0 %v2262_v11  ;;  %v6162_v11 = vpack.c.bf16 %v2379_v4, %v2363_v3  ;;  %v6180_v17 = vpack.c.bf16 %v2414_v5, %v2398_v8  ;;  %v6206_v3 = vpack.c.bf16 %v2353_v12, %v2337_v52  ;;  %v2367_v4 = vld [vmem:[%s7243_s24 + $0x240] sm:$0xff]  ;;  %v2416_v8 = vld [vmem:[%s7243_s24 + $0x3c8] sm:$0xff]  ;;  %v2402_v5 = vld [vmem:[%s7243_s24 + $0x358] sm:$0xff] }
 0xa8c   :  { %v2388_v52 = vld [vmem:[%s7243_s24 + $0x2e8] sm:$0xff]  ;;  %v2374_v12 = vld [vmem:[%s7243_s24 + $0x278] sm:$0xff] }
 0xaeb   :  { %v2258_v19 = vpop.xlane.xlu0 %2257 }
 0xaec   :  { %v2265_v20 = vmul.f32 0.015625, %v2258_v19  ;;  %v2413_v19 = vld [vmem:[%s7243_s24 + $0x3b0] sm:$0xff] }
 0xaee   :  { %v2268_v54 = vadd.f32 1e-05, %v2265_v20  ;;  %v2304_v20 = vld [vmem:[%s7243_s24 + $0x48] sm:$0xff] }
 0xaef   :  { %v2261_v21 = vpop.xlane.xlu1 %2260 }
 0xaf0   :  { %6652 = vrsqrt.f32 %v2268_v54  ;;  %v2266_v22 = vmul.f32 0.015625, %v2261_v21  ;;  %v2320_v54 = vld [vmem:[%s7243_s24 + $0xc8] sm:$0xff]  ;;  %v2306_v21 = vld [vmem:[%s7243_s24 + $0x58] sm:$0xff] }
 0xaf2   :  { %v2269_v23 = vadd.f32 1e-05, %v2266_v22  ;;  %v2322_v22 = vld [vmem:[%s7243_s24 + $0xd8] sm:$0xff] }
 0xaf3   :  { %v6200_v28 = vpack.c.bf16 %v2322_v22, %v2306_v21  ;;  %v2324_v21 = vld [vmem:[%s7243_s24 + $0xe8] sm:$0xff]  ;;  %v2310_v22 = vld [vmem:[%s7243_s24 + $0x78] sm:$0xff] }
 0xaf4   :  { %6654 = vrsqrt.f32 %v2269_v23  ;;  %v6166_v23 = vpack.c.bf16 %v2411_v15, %v2395_v14  ;;  %v2399_v15 = vld [vmem:[%s7243_s24 + $0x340] sm:$0xff] }
 0xafa   :  { %v6653_v24 = vpop.eup %6652 }
 0xafb   :  { %v2274_v27 = vmul.f32 %v6653_v24, %v7230_v7  ;;  %v6182_v24 = vpack.c.bf16 %v2413_v19, %v2397_v18  ;;  %v2401_v19 = vld [vmem:[%s7243_s24 + $0x350] sm:$0xff] }
 0xafd   :  { %v2283_v37 = vmul.f32 %v7293_v25, %v2274_v27  ;;  %v6184_v27 = vpack.c.bf16 %v2320_v54, %v2304_v20  ;;  %v2417_v20 = vld [vmem:[%s7243_s24 + $0x3d0] sm:$0xff]  ;;  %v2308_v54 = vld [vmem:[%s7243_s24 + $0x68] sm:$0xff] }
 0xafe   :  { %v6655_v42 = vpop.eup %6654 }
 0xaff   :  { %v7308_v43 = vadd.f32 %v7295_v26, %v2283_v37  ;;  %v2275_v7 = vmul.f32 %v6655_v42, %v7234_v9  ;;  %v2380_v9 = vld [vmem:[%s7243_s24 + $0x2a8] sm:$0xff]  ;;  %v2319_v42 = vld [vmem:[%s7243_s24 + $0xc0] sm:$0xff] }
 0xb00   :  { %v6160_v50 = vpack.c.bf16 %v2380_v9, %v2364_v55  ;;  %v2368_v9 = vld [vmem:[%s7243_s24 + $0x248] sm:$0xff] }
 0xb01   :  { %v2284_v56 = vmul.f32 %v7293_v25, %v2275_v7  ;;  %4820 = vmatmul.mubr.msk.f32.vlgmr.msra.gmra.mrb[56].mxu1 %vm179_vm1, %v7308_v43  ;;  %4823 = vmatmul.mubr.msk.f32.vlgmr.msra.gmra.mrb[58].mxu0 %vm179_vm1, %v7308_v43  ;;  %v2305_v7 = vld [vmem:[%s7243_s24 + $0x50] sm:$0xff]  ;;  %v6192_v60 = vpack.c.bf16 %v2384_v58, %v2368_v9  ;;  %v2371_v58 = vld [vmem:[%s7243_s24 + $0x260] sm:$0xff] }
 0xb02   :  { %2586 = vmatprep.mubr.f32.mxu1 %v6680_v1  ;;  %2669 = vmatprep.mubr.f32.mxu0 %v6680_v1 }
 0xb03   :  { %v7327_v62 = vadd.f32 %v7295_v26, %v2284_v56  ;;  %6155 = vmatpush1.bf16.msra.mxu1 %v6154_v44  ;;  %6171 = vmatpush1.bf16.msra.mxu0 %v6170_v45  ;;  %v2321_v44 = vld [vmem:[%s7243_s24 + $0xd0] sm:$0xff]  ;;  %v2336_v45 = vld [vmem:[%s7243_s24 + $0x148] sm:$0xff] }
 0xb04   :  { %6157 = vmatprep.subr.bf16.mxu1 %v6156_v51  ;;  %6173 = vmatprep.subr.bf16.mxu0 %v6172_v53  ;;  %v6202_v47 = vpack.c.bf16 %v2321_v44, %v2305_v7  ;;  %v2335_v51 = vld [vmem:[%s7243_s24 + $0x140] sm:$0xff]  ;;  %v2358_v7 = vld [vmem:[%s7243_s24 + $0x1f8] sm:$0xff] }
 0xb05   :  { %4821 = vmatmul.mubr.msk.f32.gmra.mrb[58].mxu1 %vm179_vm1, %v7327_v62  ;;  %4824 = vmatmul.mubr.msk.f32.gmra.mrb[60].mxu0 %vm179_vm1, %v7327_v62  ;;  %v2351_v53 = vld [vmem:[%s7243_s24 + $0x1c0] sm:$0xff] }
 0xb06   :  { %2592 = vmatprep.mubr.f32.mxu1 %v6680_v1  ;;  %2675 = vmatprep.mubr.f32.mxu0 %v6680_v1 }
 0xb07   :  { %6159 = vmatpush1.bf16.msra.mxu1 %v6158_v63  ;;  %6175 = vmatpush1.bf16.msra.mxu0 %v6174_v2  ;;  %v2386_v63 = vld [vmem:[%s7243_s24 + $0x2d8] sm:$0xff]  ;;  %v6190_v2 = vpack.c.bf16 %v2351_v53, %v2335_v51  ;;  %v2372_v53 = vld [vmem:[%s7243_s24 + $0x268] sm:$0xff] }
 0xb08   :  { %6161 = vmatprep.subr.bf16.mxu1 %v6160_v50  ;;  %6177 = vmatprep.subr.bf16.mxu0 %v6176_v57  ;;  %v2383_v50 = vld [vmem:[%s7243_s24 + $0x2c0] sm:$0xff]  ;;  %v2369_v57 = vld [vmem:[%s7243_s24 + $0x250] sm:$0xff]  ;;  %v6208_v59 = vpack.c.bf16 %v2386_v63, %v2370_v61 }
 0xb09   :  { %v6210_v14 = vpack.c.bf16 %v2385_v6, %v2369_v57  ;;  %v2387_v61 = vld [vmem:[%s7243_s24 + $0x2e0] sm:$0xff]  ;;  %v2373_v63 = vld [vmem:[%s7243_s24 + $0x270] sm:$0xff]  ;;  %v2420_v57 = vld [vmem:[%s7243_s24 + $0x3e8] sm:$0xff] }
 0xb0a   :  { %v2406_v6 = vld [vmem:[%s7243_s24 + $0x378] sm:$0xff] }
 0xb0b   :  { %6163 = vmatpush1.bf16.msra.mxu1 %v6162_v11  ;;  %6179 = vmatpush1.bf16.msra.mxu0 %v6178_v13  ;;  %v2418_v11 = vld [vmem:[%s7243_s24 + $0x3d8] sm:$0xff]  ;;  %v6194_v13 = vpack.c.bf16 %v2383_v50, %v2367_v4  ;;  %v6224_v4 = vpack.c.bf16 %v2388_v52, %v2372_v53  ;;  %v3232_v52 = vld [vmem:[%s7427_s9 + $0x20] sm:$0xff] }
 0xb0c   :  { %6165 = vmatprep.subr.bf16.mxu1 %v6164_v16  ;;  %6181 = vmatprep.subr.bf16.mxu0 %v6180_v17  ;;  %v2415_v16 = vld [vmem:[%s7243_s24 + $0x3c0] sm:$0xff]  ;;  %v6196_v17 = vpack.c.bf16 %v2416_v8, %v2400_v49  ;;  %v6212_v18 = vpack.c.bf16 %v2418_v11, %v2402_v5  ;;  %v2422_v49 = vld [vmem:[%s7243_s24 + $0x3f8] sm:$0xff] }
 0xb0d   :  { %v2403_v8 = vld [vmem:[%s7243_s24 + $0x360] sm:$0xff] }
 0xb0e   :  { %v2419_v5 = vld [vmem:[%s7243_s24 + $0x3e0] sm:$0xff] }
 0xb0f   :  { %6167 = vmatpush1.bf16.msra.mxu1 %v6166_v23  ;;  %6183 = vmatpush1.bf16.msra.mxu0 %v6182_v24  ;;  %v2326_v23 = vld [vmem:[%s7243_s24 + $0xf8] sm:$0xff]  ;;  %v6198_v24 = vpack.c.bf16 %v2415_v16, %v2399_v15  ;;  %v2421_v15 = vld [vmem:[%s7243_s24 + $0x3f0] sm:$0xff]  ;;  %v3244_v16 = vld [vmem:[%s7427_s9 + $0x80] sm:$0xff] }
 0xb10   :  { %6185 = vmatprep.subr.bf16.mxu1 %v6184_v27  ;;  %6201 = vmatprep.subr.bf16.mxu0 %v6200_v28  ;;  %v6214_v27 = vpack.c.bf16 %v2417_v20, %v2401_v19  ;;  %v2307_v28 = vld [vmem:[%s7243_s24 + $0x60] sm:$0xff]  ;;  %v3277_v19 = vld [vmem:[%s7427_s9 + $0x188] sm:$0xff]  ;;  %v6230_v20 = vpack.c.bf16 %v2419_v5, %v2403_v8  ;;  %v3267_v8 = vld [vmem:[%s7427_s9 + $0x138] sm:$0xff] }
 0xb11   :  { %v3252_v5 = vld [vmem:[%s7427_s9 + $0xc0] sm:$0xff] }
 0xb18   :  { %v2264_v29 = vpop.xlane.xlu0 %2263 }
 0xb19   :  { %v2267_v30 = vmul.f32 0.015625, %v2264_v29  ;;  %v6216_v29 = vpack.c.bf16 %v2324_v21, %v2308_v54 }
 0xb1b   :  { %v2270_v31 = vadd.f32 1e-05, %v2267_v30  ;;  %v6232_v30 = vpack.c.bf16 %v2326_v23, %v2310_v22  ;;  %v3228_v23 = vld [vmem:[%s7427_s9] sm:$0xff] }
 0xb1d   :  { %6656 = vrsqrt.f32 %v2270_v31  ;;  %v2323_v31 = vld [vmem:[%s7243_s24 + $0xe0] sm:$0xff] }
 0xb1e   :  { %v6218_v44 = vpack.c.bf16 %v2323_v31, %v2307_v28  ;;  %v3261_v28 = vld [vmem:[%s7427_s9 + $0x108] sm:$0xff]  ;;  %v3278_v31 = vld [vmem:[%s7427_s9 + $0x190] sm:$0xff] }
 0xb27   :  { %v6657_v32 = vpop.eup %6656 }
 0xb28   :  { %v2276_v37 = vmul.f32 %v6657_v32, %v7278_v10  ;;  %v2352_v10 = vld [vmem:[%s7243_s24 + $0x1c8] sm:$0xff]  ;;  %v2309_v32 = vld [vmem:[%s7243_s24 + $0x70] sm:$0xff] }
 0xb29   :  { %v6188_v55 = vpack.c.bf16 %v2352_v10, %v2336_v45  ;;  %v2339_v10 = vld [vmem:[%s7243_s24 + $0x160] sm:$0xff] }
 0xb2a   :  { %v2285_v39 = vmul.f32 %v7293_v25, %v2276_v37  ;;  %v2338_v25 = vld [vmem:[%s7243_s24 + $0x158] sm:$0xff]  ;;  %v2325_v37 = vld [vmem:[%s7243_s24 + $0xf0] sm:$0xff] }
 0xb2b   :  { %v6204_v56 = vpack.c.bf16 %v2354_v46, %v2338_v25  ;;  %v6234_v45 = vpack.c.bf16 %v2325_v37, %v2309_v32  ;;  %v2355_v25 = vld [vmem:[%s7243_s24 + $0x1e0] sm:$0xff]  ;;  %v2341_v46 = vld [vmem:[%s7243_s24 + $0x170] sm:$0xff]  ;;  %v3279_v32 = vld [vmem:[%s7427_s9 + $0x198] sm:$0xff] }
 0xb2c   :  { %v7355_v41 = vadd.f32 %v7295_v26, %v2285_v39  ;;  %v6186_v26 = vpack.c.bf16 %v2319_v42, %v2303_v40  ;;  %v2340_v39 = vld [vmem:[%s7243_s24 + $0x168] sm:$0xff]  ;;  %v2342_v42 = vld [vmem:[%s7243_s24 + $0x178] sm:$0xff] }
 0xb2d   :  { %v2356_v40 = vld [vmem:[%s7243_s24 + $0x1e8] sm:$0xff]  ;;  %v6236_v51 = vpack.c.bf16 %v2358_v7, %v2342_v42  ;;  %v3231_v42 = vld [vmem:[%s7427_s9 + $0x18] sm:$0xff] }
 0xb2e   :  { %4822 = vmatmul.mubr.msk.f32.gmra.mrb[60].mxu1 %vm179_vm1, %v7355_v41  ;;  %4825 = vmatmul.mubr.msk.f32.gmra.mrb[62].mxu0 %vm179_vm1, %v7355_v41 }
 0xb2f   :  { %2746 = vmatprep.mubr.f32.mxu1 %v6680_v1  ;;  %2829 = vmatprep.mubr.f32.mxu0 %v6680_v1 }
 0xb32   :  { %4826 = vmatmul.mubr.msk.f32.vlgmr.msra.gmra.mrb[62].mxu1 %vm179_vm1, %v7308_v43  ;;  %4829 = vmatmul.mubr.msk.f32.vlgmr.msra.gmra.mrb[64].mxu0 %vm179_vm1, %v7308_v43 }
 0xb33   :  { %6187 = vmatpush1.bf16.msra.mxu1 %v6186_v26  ;;  %6203 = vmatpush1.bf16.msra.mxu0 %v6202_v47  ;;  %v2357_v26 = vld [vmem:[%s7243_s24 + $0x1f0] sm:$0xff]  ;;  %v6220_v47 = vpack.c.bf16 %v2356_v40, %v2340_v39 }
 0xb34   :  { %2752 = vmatprep.mubr.f32.mxu1 %v6680_v1  ;;  %2835 = vmatprep.mubr.f32.mxu0 %v6680_v1  ;;  %v6238_v9 = vpack.c.bf16 %v2357_v26, %v2341_v46  ;;  %v3230_v40 = vld [vmem:[%s7427_s9 + $0x10] sm:$0xff]  ;;  %v3249_v46 = vld [vmem:[%s7427_s9 + $0xa8] sm:$0xff]  ;;  %v3280_v26 = vld [vmem:[%s7427_s9 + $0x1a0] sm:$0xff] }
 0xb35   :  { %6189 = vmatprep.subr.bf16.mxu1 %v6188_v55  ;;  %6205 = vmatprep.subr.bf16.mxu0 %v6204_v56  ;;  %v2390_v55 = vld [vmem:[%s7243_s24 + $0x2f8] sm:$0xff]  ;;  %v6222_v56 = vpack.c.bf16 %v2355_v25, %v2339_v10  ;;  %v3248_v25 = vld [vmem:[%s7427_s9 + $0xa0] sm:$0xff] }
 0xb36   :  { %4827 = vmatmul.mubr.msk.f32.gmra.mrb[64].mxu1 %vm179_vm1, %v7327_v62  ;;  %4830 = vmatmul.mubr.msk.f32.gmra.mrb[66].mxu0 %vm179_vm1, %v7327_v62  ;;  %v6240_v50 = vpack.c.bf16 %v2390_v55, %v2374_v12  ;;  %v3263_v10 = vld [vmem:[%s7427_s9 + $0x118] sm:$0xff]  ;;  %v3233_v12 = vld [vmem:[%s7427_s9 + $0x28] sm:$0xff]  ;;  %v6256_v55 = vpack.c.bf16 %v3249_v46, %v3248_v25  ;;  %v3240_v46 = vld [vmem:[%s7427_s9 + $0x60] sm:$0xff] }
 0xb37   :  { %6191 = vmatpush1.bf16.msra.mxu1 %v6190_v2  ;;  %6207 = vmatpush1.bf16.msra.mxu0 %v6206_v3  ;;  %v2389_v2 = vld [vmem:[%s7243_s24 + $0x2f0] sm:$0xff]  ;;  %v2404_v3 = vld [vmem:[%s7243_s24 + $0x368] sm:$0xff] }
 0xb38   :  { %2758 = vmatprep.mubr.f32.mxu1 %v6680_v1  ;;  %2841 = vmatprep.mubr.f32.mxu0 %v6680_v1  ;;  %v6228_v11 = vpack.c.bf16 %v2420_v57, %v2404_v3  ;;  %v3283_v3 = vld [vmem:[%s7427_s9 + $0x1b8] sm:$0xff]  ;;  %v3234_v57 = vld [vmem:[%s7427_s9 + $0x30] sm:$0xff] }
 0xb39   :  { %6193 = vmatprep.subr.bf16.mxu1 %v6192_v60  ;;  %6209 = vmatprep.subr.bf16.mxu0 %v6208_v59  ;;  %v6226_v60 = vpack.c.bf16 %v2387_v61, %v2371_v58  ;;  %v6242_v59 = vpack.c.bf16 %v2389_v2, %v2373_v63  ;;  %v3265_v58 = vld [vmem:[%s7427_s9 + $0x128] sm:$0xff]  ;;  %v3250_v61 = vld [vmem:[%s7427_s9 + $0xb0] sm:$0xff]  ;;  %v3251_v63 = vld [vmem:[%s7427_s9 + $0xb8] sm:$0xff] }
 0xb3a   :  { %4828 = vmatmul.mubr.msk.f32.gmra.mrb[66].mxu1 %vm179_vm1, %v7355_v41  ;;  %4831 = vmatmul.mubr.msk.f32.gmra.mrb[68].mxu0 %vm179_vm1, %v7355_v41  ;;  %v3282_v2 = vld [vmem:[%s7427_s9 + $0x1b0] sm:$0xff] }
 0xb3b   :  { %6195 = vmatpush1.bf16.msra.mxu1 %v6194_v13  ;;  %6211 = vmatpush1.bf16.msra.mxu0 %v6210_v14  ;;  %v6244_v13 = vpack.c.bf16 %v2422_v49, %v2406_v6  ;;  %v2405_v14 = vld [vmem:[%s7243_s24 + $0x370] sm:$0xff]  ;;  %v3235_v6 = vld [vmem:[%s7427_s9 + $0x38] sm:$0xff]  ;;  %v6260_v49 = vpack.c.bf16 %v3251_v63, %v3250_v61 }
 0xb3c   :  { %6197 = vmatprep.subr.bf16.mxu1 %v6196_v17  ;;  %6213 = vmatprep.subr.bf16.mxu0 %v6212_v18  ;;  %v3245_v17 = vld [vmem:[%s7427_s9 + $0x88] sm:$0xff]  ;;  %v3276_v18 = vld [vmem:[%s7427_s9 + $0x180] sm:$0xff]  ;;  %v6246_v54 = vpack.c.bf16 %v2421_v15, %v2405_v14  ;;  %v6262_v15 = vpack.c.bf16 %v3235_v6, %v3234_v57  ;;  %v3242_v63 = vld [vmem:[%s7427_s9 + $0x70] sm:$0xff] }
 0xb3d   :  { %2912 = vmatprep.mubr.f32.mxu1 %v6680_v1  ;;  %2995 = vmatprep.mubr.f32.mxu0 %v6680_v1  ;;  %v6248_v21 = vpack.c.bf16 %v3245_v17, %v3244_v16  ;;  %v6280_v22 = vpack.c.bf16 %v3277_v19, %v3276_v18  ;;  %v3285_v14 = vld [vmem:[%s7427_s9 + $0x1c8] sm:$0xff]  ;;  %v3236_v17 = vld [vmem:[%s7427_s9 + $0x40] sm:$0xff]  ;;  %v3275_v57 = vld [vmem:[%s7427_s9 + $0x178] sm:$0xff] }
 0xb3e   :  { %v3237_v18 = vld [vmem:[%s7427_s9 + $0x48] sm:$0xff]  ;;  %v3308_v6 = vld [vmem:[%s7427_s9 + $0x280] sm:$0xff] }
 0xb3f   :  { %6199 = vmatpush1.bf16.msra.mxu1 %v6198_v24  ;;  %6215 = vmatpush1.bf16.msra.mxu0 %v6214_v27  ;;  %v3229_v24 = vld [vmem:[%s7427_s9 + $0x8] sm:$0xff]  ;;  %v3260_v27 = vld [vmem:[%s7427_s9 + $0x100] sm:$0xff] }
 0xb40   :  { %6217 = vmatprep.subr.bf16.mxu1 %v6216_v29  ;;  %6233 = vmatprep.subr.bf16.mxu0 %v6232_v30  ;;  %v3246_v29 = vld [vmem:[%s7427_s9 + $0x90] sm:$0xff]  ;;  %v3247_v30 = vld [vmem:[%s7427_s9 + $0x98] sm:$0xff]  ;;  %v6250_v37 = vpack.c.bf16 %v3229_v24, %v3228_v23  ;;  %v6282_v39 = vpack.c.bf16 %v3261_v28, %v3260_v27  ;;  %v6266_v28 = vpack.c.bf16 %v3237_v18, %v3236_v17 }
 0xb41   :  { %v6252_v7 = vpack.c.bf16 %v3247_v30, %v3246_v29  ;;  %v3255_v23 = vld [vmem:[%s7427_s9 + $0xd8] sm:$0xff]  ;;  %v3286_v24 = vld [vmem:[%s7427_s9 + $0x1d0] sm:$0xff] }
 0xb42   :  { %4832 = vmatmul.mubr.msk.f32.vlgmr.msra.gmra.mrb[68].mxu1 %vm179_vm1, %v7308_v43  ;;  %4835 = vmatmul.mubr.msk.f32.vlgmr.msra.gmra.mrb[70].mxu0 %vm179_vm1, %v7308_v43  ;;  %v3287_v27 = vld [vmem:[%s7427_s9 + $0x1d8] sm:$0xff]  ;;  %v3238_v30 = vld [vmem:[%s7427_s9 + $0x50] sm:$0xff] }
 0xb43   :  { %6219 = vmatpush1.bf16.msra.mxu1 %v6218_v44  ;;  %6235 = vmatpush1.bf16.msra.mxu0 %v6234_v45  ;;  %v6284_v44 = vpack.c.bf16 %v3279_v32, %v3278_v31  ;;  %v3262_v45 = vld [vmem:[%s7427_s9 + $0x110] sm:$0xff]  ;;  %v3239_v31 = vld [vmem:[%s7427_s9 + $0x58] sm:$0xff] }
 0xb44   :  { %2918 = vmatprep.mubr.f32.mxu1 %v6680_v1  ;;  %3001 = vmatprep.mubr.f32.mxu0 %v6680_v1  ;;  %v6286_v53 = vpack.c.bf16 %v3263_v10, %v3262_v45  ;;  %v3289_v45 = vld [vmem:[%s7427_s9 + $0x1e8] sm:$0xff]  ;;  %v6270_v10 = vpack.c.bf16 %v3239_v31, %v3238_v30 }
 0xb45   :  { %6221 = vmatprep.subr.bf16.mxu1 %v6220_v47  ;;  %6237 = vmatprep.subr.bf16.mxu0 %v6236_v51  ;;  %v3281_v47 = vld [vmem:[%s7427_s9 + $0x1a8] sm:$0xff]  ;;  %v6254_v51 = vpack.c.bf16 %v3231_v42, %v3230_v40  ;;  %v3271_v40 = vld [vmem:[%s7427_s9 + $0x158] sm:$0xff]  ;;  %v3256_v42 = vld [vmem:[%s7427_s9 + $0xe0] sm:$0xff] }
 0xb46   :  { %4833 = vmatmul.mubr.msk.f32.gmra.mrb[70].mxu1 %vm179_vm1, %v7327_v62  ;;  %4836 = vmatmul.mubr.msk.f32.gmra.mrb[72].mxu0 %vm179_vm1, %v7327_v62 }
 0xb47   :  { %6223 = vmatpush1.bf16.msra.mxu1 %v6222_v56  ;;  %6239 = vmatpush1.bf16.msra.mxu0 %v6238_v9  ;;  %v6288_v56 = vpack.c.bf16 %v3281_v47, %v3280_v26  ;;  %v3264_v9 = vld [vmem:[%s7427_s9 + $0x120] sm:$0xff]  ;;  %v3241_v26 = vld [vmem:[%s7427_s9 + $0x68] sm:$0xff] }
 0xb48   :  { %2924 = vmatprep.mubr.f32.mxu1 %v6680_v1  ;;  %3007 = vmatprep.mubr.f32.mxu0 %v6680_v1 }
 0xb49   :  { %6225 = vmatprep.subr.bf16.mxu1 %v6224_v4  ;;  %6241 = vmatprep.subr.bf16.mxu0 %v6240_v50  ;;  %v6258_v4 = vpack.c.bf16 %v3233_v12, %v3232_v52  ;;  %v6290_v50 = vpack.c.bf16 %v3265_v58, %v3264_v9  ;;  %v3273_v52 = vld [vmem:[%s7427_s9 + $0x168] sm:$0xff]  ;;  %v3258_v12 = vld [vmem:[%s7427_s9 + $0xf0] sm:$0xff]  ;;  %v3291_v9 = vld [vmem:[%s7427_s9 + $0x1f8] sm:$0xff]  ;;  %v6274_v58 = vpack.c.bf16 %v3241_v26, %v3240_v46 }
 0xb4a   :  { %4834 = vmatmul.mubr.msk.f32.gmra.mrb[72].mxu1 %vm179_vm1, %v7355_v41  ;;  %4837 = vmatmul.mubr.msk.f32.gmra.mrb[74].mxu0 %vm179_vm1, %v7355_v41 }
 0xb4b   :  { %6227 = vmatpush1.bf16.msra.mxu1 %v6226_v60  ;;  %6243 = vmatpush1.bf16.msra.mxu0 %v6242_v59  ;;  %v6292_v60 = vpack.c.bf16 %v3283_v3, %v3282_v2  ;;  %v3266_v59 = vld [vmem:[%s7427_s9 + $0x130] sm:$0xff]  ;;  %v3243_v2 = vld [vmem:[%s7427_s9 + $0x78] sm:$0xff] }
 0xb4c   :  { %6229 = vmatprep.subr.bf16.mxu1 %v6228_v11  ;;  %6245 = vmatprep.subr.bf16.mxu0 %v6244_v13  ;;  %v3253_v11 = vld [vmem:[%s7427_s9 + $0xc8] sm:$0xff]  ;;  %v3284_v13 = vld [vmem:[%s7427_s9 + $0x1c0] sm:$0xff]  ;;  %v6294_v16 = vpack.c.bf16 %v3267_v8, %v3266_v59  ;;  %v6278_v8 = vpack.c.bf16 %v3243_v2, %v3242_v63  ;;  %v3327_v2 = vld [vmem:[%s7427_s9 + $0x318] sm:$0xff] }
 0xb4d   :  { %3078 = vmatprep.mubr.f32.mxu1 %v6680_v1  ;;  %3161 = vmatprep.mubr.f32.mxu0 %v6680_v1  ;;  %v6264_v19 = vpack.c.bf16 %v3253_v11, %v3252_v5  ;;  %v3341_v59 = vld [vmem:[%s7427_s9 + $0x388] sm:$0xff] }
 0xb4f   :  { %6231 = vmatpush1.bf16.msra.mxu1 %v6230_v20  ;;  %6247 = vmatpush1.bf16.msra.mxu0 %v6246_v54  ;;  %v6296_v20 = vpack.c.bf16 %v3285_v14, %v3284_v13  ;;  %v3268_v54 = vld [vmem:[%s7427_s9 + $0x140] sm:$0xff]  ;;  %v2437_v14 = vsub.s32 2, %v7071_v35 }
 0xb50   :  { %6249 = vmatprep.subr.bf16.mxu1 %v6248_v21  ;;  %6281 = vmatprep.subr.bf16.mxu0 %v6280_v22  ;;  %v3269_v21 = vld [vmem:[%s7427_s9 + $0x148] sm:$0xff]  ;;  %v3254_v22 = vld [vmem:[%s7427_s9 + $0xd0] sm:$0xff] }
 0xb51   :  { %v6298_v29 = vpack.c.bf16 %v3269_v21, %v3268_v54  ;;  %v6268_v32 = vpack.c.bf16 %v3255_v23, %v3254_v22  ;;  %v3292_v54 = vld [vmem:[%s7427_s9 + $0x200] sm:$0xff]  ;;  %v3293_v21 = vld [vmem:[%s7427_s9 + $0x208] sm:$0xff] }
 0xb52   :  { %4838 = vmatmul.mubr.msk.f32.vlgmr.msra.gmra.mrb[74].mxu1 %vm179_vm1, %v7308_v43  ;;  %4841 = vmatmul.mubr.msk.f32.vlgmr.msra.gmra.mrb[76].mxu0 %vm179_vm1, %v7308_v43 }
 0xb53   :  { %3084 = vmatprep.mubr.f32.mxu1 %v6680_v1  ;;  %3167 = vmatprep.mubr.f32.mxu0 %v6680_v1 }
 0xb54   :  { %6251 = vmatpush3.bf16.msra.mxu1 %v6250_v37  ;;  %6283 = vmatpush3.bf16.msra.mxu0 %v6282_v39  ;;  %v6300_v37 = vpack.c.bf16 %v3287_v27, %v3286_v24  ;;  %v3270_v39 = vld [vmem:[%s7427_s9 + $0x150] sm:$0xff]  ;;  %v3324_v24 = vld [vmem:[%s7427_s9 + $0x300] sm:$0xff]  ;;  %v3325_v27 = vld [vmem:[%s7427_s9 + $0x308] sm:$0xff] }
 0xb55   :  { %6253 = vmatprep.subr.bf16.mxu1 %v6252_v7  ;;  %6285 = vmatprep.subr.bf16.mxu0 %v6284_v44  ;;  %v3257_v7 = vld [vmem:[%s7427_s9 + $0xe8] sm:$0xff]  ;;  %v3288_v44 = vld [vmem:[%s7427_s9 + $0x1e0] sm:$0xff]  ;;  %v6302_v25 = vpack.c.bf16 %v3271_v40, %v3270_v39  ;;  %v3342_v39 = vld [vmem:[%s7427_s9 + $0x390] sm:$0xff] }
 0xb56   :  { %4839 = vmatmul.mubr.msk.f32.gmra.mrb[76].mxu1 %vm179_vm1, %v7327_v62  ;;  %4842 = vmatmul.mubr.msk.f32.gmra.mrb[78].mxu0 %vm179_vm1, %v7327_v62  ;;  %v6272_v47 = vpack.c.bf16 %v3257_v7, %v3256_v42  ;;  %v3343_v40 = vld [vmem:[%s7427_s9 + $0x398] sm:$0xff] }
 0xb57   :  { %3090 = vmatprep.mubr.f32.mxu1 %v6680_v1  ;;  %3173 = vmatprep.mubr.f32.mxu0 %v6680_v1 }
 0xb58   :  { %6255 = vmatpush3.bf16.msra.mxu1 %v6254_v51  ;;  %6287 = vmatpush3.bf16.msra.mxu0 %v6286_v53  ;;  %v6304_v51 = vpack.c.bf16 %v3289_v45, %v3288_v44  ;;  %v3272_v53 = vld [vmem:[%s7427_s9 + $0x160] sm:$0xff]  ;;  %v6314_v44 = vpack.c.bf16 %v3293_v21, %v3292_v54  ;;  %v6346_v45 = vpack.c.bf16 %v3325_v27, %v3324_v24  ;;  %v3329_v27 = vld [vmem:[%s7427_s9 + $0x328] sm:$0xff] }
 0xb59   :  { %6257 = vmatprep.subr.bf16.mxu1 %v6256_v55  ;;  %6289 = vmatprep.subr.bf16.mxu0 %v6288_v56  ;;  %v3259_v55 = vld [vmem:[%s7427_s9 + $0xf8] sm:$0xff]  ;;  %v3290_v56 = vld [vmem:[%s7427_s9 + $0x1f0] sm:$0xff]  ;;  %v6306_v61 = vpack.c.bf16 %v3273_v52, %v3272_v53  ;;  %v6348_v53 = vpack.c.bf16 %v3343_v40, %v3342_v39  ;;  %v3328_v24 = vld [vmem:[%s7427_s9 + $0x320] sm:$0xff] }
 0xb5a   :  { %4840 = vmatmul.mubr.msk.f32.gmra.mrb[78].mxu1 %vm179_vm1, %v7355_v41  ;;  %4843 = vmatmul.mubr.msk.f32.gmra.mrb[80].mxu0 %vm179_vm1, %v7355_v41  ;;  %v6276_v3 = vpack.c.bf16 %v3259_v55, %v3258_v12  ;;  %v3295_v52 = vld [vmem:[%s7427_s9 + $0x218] sm:$0xff]  ;;  %v3326_v12 = vld [vmem:[%s7427_s9 + $0x310] sm:$0xff] }
 0xb5b   :  { %v3298_v39 = vld [vmem:[%s7427_s9 + $0x230] sm:$0xff]  ;;  %v3299_v40 = vld [vmem:[%s7427_s9 + $0x238] sm:$0xff] }
 0xb5c   :  { %6259 = vmatpush3.bf16.msra.mxu1 %v6258_v4  ;;  %6291 = vmatpush3.bf16.msra.mxu0 %v6290_v50  ;;  %v6308_v4 = vpack.c.bf16 %v3291_v9, %v3290_v56  ;;  %v3274_v50 = vld [vmem:[%s7427_s9 + $0x170] sm:$0xff] }
 0xb5d   :  { %6261 = vmatprep.subr.bf16.mxu1 %v6260_v49  ;;  %6293 = vmatprep.subr.bf16.mxu0 %v6292_v60  ;;  %v3309_v49 = vld [vmem:[%s7427_s9 + $0x288] sm:$0xff]  ;;  %v3340_v60 = vld [vmem:[%s7427_s9 + $0x380] sm:$0xff]  ;;  %v6310_v5 = vpack.c.bf16 %v3275_v57, %v3274_v50 }
 0xb5e   :  { %v6312_v11 = vpack.c.bf16 %v3309_v49, %v3308_v6  ;;  %v6344_v13 = vpack.c.bf16 %v3341_v59, %v3340_v60  ;;  %v3313_v57 = vld [vmem:[%s7427_s9 + $0x2a8] sm:$0xff]  ;;  %v3344_v6 = vld [vmem:[%s7427_s9 + $0x3a0] sm:$0xff] }
 0xb5f   :  { %v3345_v49 = vld [vmem:[%s7427_s9 + $0x3a8] sm:$0xff] }
 0xb60   :  { %6263 = vmatpush3.bf16.msra.mxu1 %v6262_v15  ;;  %6295 = vmatpush3.bf16.msra.mxu0 %v6294_v16  ;;  %v7554_v15 = vld [vmem:[%s7550_s13] sm:$0xff]  ;;  %v2441_v16 = vsub.s32 3, %v7071_v35 }
 0xb61   :  { %6265 = vmatprep.subr.bf16.mxu1 %v6264_v19  ;;  %6297 = vmatprep.subr.bf16.mxu0 %v6296_v20  ;;  %v7559_v17 = vrot.slane %v7554_v15, %v7074_v36  ;;  %v7564_v18 = vrot.slane %v7554_v15, %v2437_v14  ;;  %v7568_v19 = vrot.slane %v7554_v15, %v7077_v38 }
 0xb62   :  { %v7573_v20 = vrot.slane %v7554_v15, %v2441_v16 }
 0xb64   :  { %6267 = vmatpush3.bf16.msra.mxu1 %v6266_v28  ;;  %6299 = vmatpush3.bf16.msra.mxu0 %v6298_v29  ;;  %v3310_v28 = vld [vmem:[%s7427_s9 + $0x290] sm:$0xff] }
 0xb65   :  { %6269 = vmatprep.subr.bf16.mxu1 %v6268_v32  ;;  %6301 = vmatprep.subr.bf16.mxu0 %v6300_v37  ;;  %v3311_v37 = vld [vmem:[%s7427_s9 + $0x298] sm:$0xff] }
 0xb68   :  { %6271 = vmatpush3.bf16.msra.mxu1 %v6270_v10  ;;  %6303 = vmatpush3.bf16.msra.mxu0 %v6302_v25  ;;  %v3294_v10 = vld [vmem:[%s7427_s9 + $0x210] sm:$0xff] }
 0xb69   :  { %6273 = vmatprep.subr.bf16.mxu1 %v6272_v47  ;;  %6305 = vmatprep.subr.bf16.mxu0 %v6304_v51  ;;  %v6316_v51 = vpack.c.bf16 %v3311_v37, %v3310_v28  ;;  %v3314_v28 = vld [vmem:[%s7427_s9 + $0x2b0] sm:$0xff]  ;;  %v6354_v37 = vpack.c.bf16 %v3329_v27, %v3328_v24 }
 0xb6c   :  { %6275 = vmatpush3.bf16.msra.mxu1 %v6274_v58  ;;  %6307 = vmatpush3.bf16.msra.mxu0 %v6306_v61 }
 0xb6d   :  { %6277 = vmatprep.subr.bf16.mxu1 %v6276_v3  ;;  %6309 = vmatprep.subr.bf16.mxu0 %v6308_v4  ;;  %v3312_v3 = vld [vmem:[%s7427_s9 + $0x2a0] sm:$0xff] }
 0xb70   :  { %6279 = vmatpush3.bf16.msra.mxu1 %v6278_v8  ;;  %6311 = vmatpush3.bf16.msra.mxu0 %v6310_v5  ;;  %v6318_v8 = vpack.c.bf16 %v3295_v52, %v3294_v10  ;;  %v6350_v5 = vpack.c.bf16 %v3327_v2, %v3326_v12  ;;  %v3316_v10 = vld [vmem:[%s7427_s9 + $0x2c0] sm:$0xff]  ;;  %v3301_v52 = vld [vmem:[%s7427_s9 + $0x248] sm:$0xff]  ;;  %v3351_v2 = vld [vmem:[%s7427_s9 + $0x3d8] sm:$0xff] }
 0xb71   :  { %6313 = vmatprep.subr.bf16.mxu1 %v6312_v11  ;;  %6345 = vmatprep.subr.bf16.mxu0 %v6344_v13  ;;  %v3296_v11 = vld [vmem:[%s7427_s9 + $0x220] sm:$0xff]  ;;  %v3297_v13 = vld [vmem:[%s7427_s9 + $0x228] sm:$0xff] }
 0xbd4   :  { %v2582_v22 = vpop.f32.mrb[56].mxu1  ;;  %v2665_v23 = vpop.f32.mrb[58].mxu0 }
 0xbd5   :  { %v2583_v29 = vadd.f32 %v2582_v22, %v7559_v17  ;;  %v2666_v30 = vadd.f32 %v2665_v23, %v7564_v18  ;;  %v2584_v31 = vpop.f32.mrb[57].mxu1  ;;  %v2667_v32 = vpop.f32.mrb[59].mxu0  ;;  %v6320_v22 = vpack.c.bf16 %v3313_v57, %v3312_v3  ;;  %v6352_v23 = vpack.c.bf16 %v3345_v49, %v3344_v6  ;;  %v3303_v57 = vld [vmem:[%s7427_s9 + $0x258] sm:$0xff] }
 0xbd6   :  { %v2585_v42 = vadd.f32 %v2584_v31, %v7568_v19  ;;  %v2668_v7 = vadd.f32 %v2667_v32, %v7573_v20  ;;  %v3347_v31 = vld [vmem:[%s7427_s9 + $0x3b8] sm:$0xff]  ;;  %v6322_v32 = vpack.c.bf16 %v3297_v13, %v3296_v11  ;;  %v3352_v11 = vld [vmem:[%s7427_s9 + $0x3e0] sm:$0xff]  ;;  %v3353_v13 = vld [vmem:[%s7427_s9 + $0x3e8] sm:$0xff] }
 0xbd7   :  { %v3180_v55 = vmax.f32 %v2583_v29, 0.0  ;;  %v3182_v56 = vmax.f32 %v2666_v30, 0.0  ;;  %v3315_v29 = vld [vmem:[%s7427_s9 + $0x2b8] sm:$0xff]  ;;  %v3346_v30 = vld [vmem:[%s7427_s9 + $0x3b0] sm:$0xff]  ;;  %v6368_v27 = vpack.c.bf16 %v3353_v13, %v3352_v11  ;;  %v3388_v11 = vld [vmem:[%s7427_s9 + $0x500] sm:$0xff] }
 0xbd8   :  { %v3181_v25 = vmax.f32 %v2585_v42, 0.0  ;;  %v3183_v46 = vmax.f32 %v2668_v7, 0.0  ;;  %v2588_v26 = vpop.f32.mrb[58].mxu1  ;;  %v2671_v47 = vpop.f32.mrb[60].mxu0  ;;  %v6324_v42 = vpack.c.bf16 %v3315_v29, %v3314_v28  ;;  %v6356_v7 = vpack.c.bf16 %v3347_v31, %v3346_v30  ;;  %v3336_v28 = vld [vmem:[%s7427_s9 + $0x360] sm:$0xff]  ;;  %v3337_v29 = vld [vmem:[%s7427_s9 + $0x368] sm:$0xff] }
 0xbd9   :  { %v2589_v9 = vadd.f32 %v2588_v26, %v7559_v17  ;;  %v2672_v58 = vadd.f32 %v2671_v47, %v7564_v18  ;;  %v2590_v61 = vpop.f32.mrb[59].mxu1  ;;  %v2673_v63 = vpop.f32.mrb[61].mxu0  ;;  %v3349_v26 = vld [vmem:[%s7427_s9 + $0x3c8] sm:$0xff]  ;;  %v6326_v47 = vpack.c.bf16 %v3299_v40, %v3298_v39  ;;  %v3322_v30 = vld [vmem:[%s7427_s9 + $0x2f0] sm:$0xff]  ;;  %v3323_v31 = vld [vmem:[%s7427_s9 + $0x2f8] sm:$0xff]  ;;  %v6370_v40 = vpack.c.bf16 %v3337_v29, %v3336_v28 }
 0xbda   :  { %v2591_v4 = vadd.f32 %v2590_v61, %v7568_v19  ;;  %v2674_v50 = vadd.f32 %v2673_v63, %v7573_v20  ;;  %3555 = vmatprep.mubr.f32.mxu1 %v3181_v25  ;;  %3635 = vmatprep.mubr.f32.mxu0 %v3183_v46  ;;  %v3317_v25 = vld [vmem:[%s7427_s9 + $0x2c8] sm:$0xff]  ;;  %v3348_v46 = vld [vmem:[%s7427_s9 + $0x3c0] sm:$0xff]  ;;  %v3319_v61 = vld [vmem:[%s7427_s9 + $0x2d8] sm:$0xff] }
 0xbdb   :  { %3556 = vmatmul.mubr.f32.vlgmr.msra.gmra.mrb[80].mxu1 %v3180_v55  ;;  %3636 = vmatmul.mubr.f32.vlgmr.msra.gmra.mrb[82].mxu0 %v3182_v56  ;;  %v3196_v54 = vmax.f32 %v2589_v9, 0.0  ;;  %v3198_v21 = vmax.f32 %v2672_v58, 0.0  ;;  %v6328_v12 = vpack.c.bf16 %v3317_v25, %v3316_v10  ;;  %v6360_v55 = vpack.c.bf16 %v3349_v26, %v3348_v46  ;;  %v3332_v56 = vld [vmem:[%s7427_s9 + $0x340] sm:$0xff]  ;;  %v3333_v9 = vld [vmem:[%s7427_s9 + $0x348] sm:$0xff]  ;;  %v3318_v58 = vld [vmem:[%s7427_s9 + $0x2d0] sm:$0xff] }
 0xbdc   :  { %v3197_v60 = vmax.f32 %v2591_v4, 0.0  ;;  %v3199_v59 = vmax.f32 %v2674_v50, 0.0  ;;  %6315 = vmatpush3.bf16.msra.mxu1 %v6314_v44  ;;  %6347 = vmatpush3.bf16.msra.mxu0 %v6346_v45  ;;  %v3330_v44 = vld [vmem:[%s7427_s9 + $0x330] sm:$0xff]  ;;  %v3331_v45 = vld [vmem:[%s7427_s9 + $0x338] sm:$0xff]  ;;  %v6362_v4 = vpack.c.bf16 %v3333_v9, %v3332_v56  ;;  %v6332_v6 = vpack.c.bf16 %v3319_v61, %v3318_v58  ;;  %v3372_v46 = vld [vmem:[%s7427_s9 + $0x480] sm:$0xff] }
 0xbdd   :  { %6317 = vmatprep.subr.bf16.mxu1 %v6316_v51  ;;  %6349 = vmatprep.subr.bf16.mxu0 %v6348_v53  ;;  %v6358_v51 = vpack.c.bf16 %v3331_v45, %v3330_v44  ;;  %v3300_v53 = vld [vmem:[%s7427_s9 + $0x240] sm:$0xff]  ;;  %v3350_v63 = vld [vmem:[%s7427_s9 + $0x3d0] sm:$0xff]  ;;  %v6340_v44 = vpack.c.bf16 %v3323_v31, %v3322_v30  ;;  %v3339_v25 = vld [vmem:[%s7427_s9 + $0x378] sm:$0xff]  ;;  %v2445_v56 = vsub.s32 4, %v7071_v35  ;;  %v2453_v9 = vsub.s32 6, %v7071_v35 }
 0xbde   :  { %3560 = vmatprep.mubr.f32.mxu1 %v3197_v60  ;;  %3640 = vmatprep.mubr.f32.mxu0 %v3199_v59  ;;  %v6330_v3 = vpack.c.bf16 %v3301_v52, %v3300_v53  ;;  %v3302_v50 = vld [vmem:[%s7427_s9 + $0x250] sm:$0xff]  ;;  %v6364_v49 = vpack.c.bf16 %v3351_v2, %v3350_v63  ;;  %v3335_v59 = vld [vmem:[%s7427_s9 + $0x358] sm:$0xff]  ;;  %v3373_v26 = vld [vmem:[%s7427_s9 + $0x488] sm:$0xff]  ;;  %v2449_v58 = vsub.s32 5, %v7071_v35  ;;  %v2457_v61 = vsub.s32 7, %v7071_v35 }
 0xbdf   :  { %3561 = vmatmul.mubr.f32.gmra.mrb[82].mxu1 %v3196_v54  ;;  %3641 = vmatmul.mubr.f32.gmra.mrb[84].mxu0 %v3198_v21  ;;  %v3334_v60 = vld [vmem:[%s7427_s9 + $0x350] sm:$0xff]  ;;  %v6334_v54 = vpack.c.bf16 %v3303_v57, %v3302_v50  ;;  %v3389_v13 = vld [vmem:[%s7427_s9 + $0x508] sm:$0xff] }
 0xbe0   :  { %6319 = vmatpush3.bf16.msra.mxu1 %v6318_v8  ;;  %6351 = vmatpush3.bf16.msra.mxu0 %v6350_v5  ;;  %v3320_v8 = vld [vmem:[%s7427_s9 + $0x2e0] sm:$0xff]  ;;  %v3321_v5 = vld [vmem:[%s7427_s9 + $0x2e8] sm:$0xff]  ;;  %v6366_v21 = vpack.c.bf16 %v3335_v59, %v3334_v60  ;;  %v3338_v10 = vld [vmem:[%s7427_s9 + $0x370] sm:$0xff]  ;;  %v7673_v59 = vrot.slane %v7554_v15, %v2457_v61 }
 0xbe1   :  { %6321 = vmatprep.subr.bf16.mxu1 %v6320_v22  ;;  %6353 = vmatprep.subr.bf16.mxu0 %v6352_v23  ;;  %v3304_v22 = vld [vmem:[%s7427_s9 + $0x260] sm:$0xff]  ;;  %v3305_v23 = vld [vmem:[%s7427_s9 + $0x268] sm:$0xff]  ;;  %v6336_v24 = vpack.c.bf16 %v3321_v5, %v3320_v8  ;;  %v6374_v52 = vpack.c.bf16 %v3339_v25, %v3338_v10  ;;  %v3406_v31 = vld [vmem:[%s7427_s9 + $0x590] sm:$0xff] }
 0xbe2   :  { %v6338_v39 = vpack.c.bf16 %v3305_v23, %v3304_v22  ;;  %v3356_v8 = vld [vmem:[%s7427_s9 + $0x400] sm:$0xff]  ;;  %v3357_v5 = vld [vmem:[%s7427_s9 + $0x408] sm:$0xff]  ;;  %v7680_v22 = vld [vmem:[%s7427_s9 + $0x490] sm:$0xff] }
 0xbe3   :  { %v7683_v23 = vld [vmem:[%s7427_s9 + $0x498] sm:$0xff] }
 0xbe4   :  { %6323 = vmatpush3.bf16.msra.mxu1 %v6322_v32  ;;  %6355 = vmatpush3.bf16.msra.mxu0 %v6354_v37  ;;  %v3354_v32 = vld [vmem:[%s7427_s9 + $0x3f0] sm:$0xff]  ;;  %v3355_v37 = vld [vmem:[%s7427_s9 + $0x3f8] sm:$0xff] }
 0xbe5   :  { %6325 = vmatprep.subr.bf16.mxu1 %v6324_v42  ;;  %6357 = vmatprep.subr.bf16.mxu0 %v6356_v7  ;;  %v3306_v42 = vld [vmem:[%s7427_s9 + $0x270] sm:$0xff]  ;;  %v3307_v7 = vld [vmem:[%s7427_s9 + $0x278] sm:$0xff]  ;;  %v6372_v45 = vpack.c.bf16 %v3355_v37, %v3354_v32 }
 0xbe6   :  { %v6342_v53 = vpack.c.bf16 %v3307_v7, %v3306_v42  ;;  %v3407_v32 = vld [vmem:[%s7427_s9 + $0x598] sm:$0xff]  ;;  %v6378_v42 = vpack.c.bf16 %v3357_v5, %v3356_v8  ;;  %v6410_v7 = vpack.c.bf16 %v3389_v13, %v3388_v11  ;;  %v3360_v13 = vld [vmem:[%s7427_s9 + $0x420] sm:$0xff] }
 0xbe7   :  { %v3391_v10 = vld [vmem:[%s7427_s9 + $0x518] sm:$0xff] }
 0xbe8   :  { %6327 = vmatpush3.bf16.msra.mxu1 %v6326_v47  ;;  %6359 = vmatpush3.bf16.msra.mxu0 %v6358_v51  ;;  %v3404_v47 = vld [vmem:[%s7427_s9 + $0x580] sm:$0xff]  ;;  %v3405_v51 = vld [vmem:[%s7427_s9 + $0x588] sm:$0xff] }
 0xbe9   :  { %6329 = vmatprep.subr.bf16.mxu1 %v6328_v12  ;;  %6361 = vmatprep.subr.bf16.mxu0 %v6360_v55  ;;  %v6376_v12 = vpack.c.bf16 %v3373_v26, %v3372_v46  ;;  %v6408_v55 = vpack.c.bf16 %v3405_v51, %v3404_v47  ;;  %v6380_v51 = vpack.c.bf16 %v7683_v23, %v7680_v22 }
 0xbec   :  { %6331 = vmatpush3.bf16.msra.mxu1 %v6330_v3  ;;  %6363 = vmatpush3.bf16.msra.mxu0 %v6362_v4 }
 0xbed   :  { %6333 = vmatprep.subr.bf16.mxu1 %v6332_v6  ;;  %6365 = vmatprep.subr.bf16.mxu0 %v6364_v49  ;;  %v7656_v6 = vrot.slane %v7554_v15, %v2445_v56  ;;  %v7661_v49 = vrot.slane %v7554_v15, %v2453_v9 }
 0xbf0   :  { %6335 = vmatpush3.bf16.msra.mxu1 %v6334_v54  ;;  %6367 = vmatpush3.bf16.msra.mxu0 %v6366_v21 }
 0xbf1   :  { %6337 = vmatprep.subr.bf16.mxu1 %v6336_v24  ;;  %6369 = vmatprep.subr.bf16.mxu0 %v6368_v27 }
 0xbf4   :  { %6339 = vmatpush3.bf16.msra.mxu1 %v6338_v39  ;;  %6371 = vmatpush3.bf16.msra.mxu0 %v6370_v40  ;;  %v7692_v40 = vld [vmem:[%s7427_s9 + $0x410] sm:$0xff] }
 0xbf5   :  { %6341 = vmatprep.subr.bf16.mxu1 %v6340_v44  ;;  %6373 = vmatprep.subr.bf16.mxu0 %v6372_v45  ;;  %v3359_v44 = vld [vmem:[%s7427_s9 + $0x418] sm:$0xff]  ;;  %v3390_v45 = vld [vmem:[%s7427_s9 + $0x510] sm:$0xff] }
 0xbf6   :  { %v6382_v5 = vpack.c.bf16 %v3359_v44, %v7692_v40  ;;  %v6414_v11 = vpack.c.bf16 %v3391_v10, %v3390_v45  ;;  %v3378_v40 = vld [vmem:[%s7427_s9 + $0x4b0] sm:$0xff]  ;;  %v3379_v44 = vld [vmem:[%s7427_s9 + $0x4b8] sm:$0xff] }
 0xbf7   :  { %v3410_v45 = vld [vmem:[%s7427_s9 + $0x5b0] sm:$0xff]  ;;  %v3411_v10 = vld [vmem:[%s7427_s9 + $0x5b8] sm:$0xff] }
 0xbf8   :  { %6343 = vmatpush3.bf16.msra.mxu1 %v6342_v53  ;;  %6375 = vmatpush3.bf16.msra.mxu0 %v6374_v52  ;;  %v6412_v53 = vpack.c.bf16 %v3407_v32, %v3406_v31  ;;  %v3376_v52 = vld [vmem:[%s7427_s9 + $0x4a0] sm:$0xff] }
 0xbf9   :  { %6377 = vmatprep.subr.bf16.mxu1 %v6376_v12  ;;  %6409 = vmatprep.subr.bf16.mxu0 %v6408_v55  ;;  %v3377_v12 = vld [vmem:[%s7427_s9 + $0x4a8] sm:$0xff] }
 0xbfa   :  { %v6384_v23 = vpack.c.bf16 %v3377_v12, %v3376_v52  ;;  %v6420_v52 = vpack.c.bf16 %v3411_v10, %v3410_v45  ;;  %v3394_v12 = vld [vmem:[%s7427_s9 + $0x530] sm:$0xff] }
 0xc01   :  { %v2594_v63 = vpop.f32.mrb[60].mxu1  ;;  %v2677_v2 = vpop.f32.mrb[62].mxu0 }
 0xc02   :  { %v2595_v3 = vadd.f32 %v2594_v63, %v7559_v17  ;;  %v2678_v4 = vadd.f32 %v2677_v2, %v7564_v18  ;;  %v2596_v50 = vpop.f32.mrb[61].mxu1  ;;  %v2679_v57 = vpop.f32.mrb[63].mxu0  ;;  %v7668_v18 = vrot.slane %v7554_v15, %v2449_v58 }
 0xc03   :  { %v2597_v60 = vadd.f32 %v2596_v50, %v7568_v19  ;;  %v2680_v17 = vadd.f32 %v2679_v57, %v7573_v20  ;;  %v3408_v57 = vld [vmem:[%s7427_s9 + $0x5a0] sm:$0xff] }
 0xc04   :  { %v3212_v24 = vmax.f32 %v2595_v3, 0.0  ;;  %v3214_v27 = vmax.f32 %v2678_v4, 0.0 }
 0xc05   :  { %v3213_v54 = vmax.f32 %v2597_v60, 0.0  ;;  %v3215_v19 = vmax.f32 %v2680_v17, 0.0  ;;  %v2748_v21 = vpop.f32.mrb[62].mxu1  ;;  %v2831_v20 = vpop.f32.mrb[64].mxu0  ;;  %v3409_v60 = vld [vmem:[%s7427_s9 + $0x5a8] sm:$0xff] }
 0xc06   :  { %v2749_v15 = vadd.f32 %v2748_v21, %v7656_v6  ;;  %v2832_v28 = vadd.f32 %v2831_v20, %v7661_v49  ;;  %v2750_v29 = vpop.f32.mrb[63].mxu1  ;;  %v2833_v30 = vpop.f32.mrb[65].mxu0 }
 0xc07   :  { %v2751_v37 = vadd.f32 %v2750_v29, %v7668_v18  ;;  %v2834_v39 = vadd.f32 %v2833_v30, %v7673_v59  ;;  %3565 = vmatprep.mubr.f32.mxu1 %v3213_v54  ;;  %3645 = vmatprep.mubr.f32.mxu0 %v3215_v19  ;;  %v3361_v54 = vld [vmem:[%s7427_s9 + $0x428] sm:$0xff] }
 0xc08   :  { %3566 = vmatmul.mubr.f32.gmra.mrb[84].mxu1 %v3212_v24  ;;  %3646 = vmatmul.mubr.f32.gmra.mrb[86].mxu0 %v3214_v27  ;;  %v3184_v55 = vmax.f32 %v2749_v15, 0.0  ;;  %v3186_v63 = vmax.f32 %v2832_v28, 0.0  ;;  %v6416_v24 = vpack.c.bf16 %v3409_v60, %v3408_v57  ;;  %v7711_v27 = vld [vmem:[%s7550_s13 + $0x8] sm:$0xff]  ;;  %v3392_v15 = vld [vmem:[%s7427_s9 + $0x520] sm:$0xff]  ;;  %s6713_s13 = smov 33  }
 0xc09   :  { %v3185_v25 = vmax.f32 %v2751_v37, 0.0  ;;  %v3187_v46 = vmax.f32 %v2834_v39, 0.0  ;;  %v2754_v26 = vpop.f32.mrb[64].mxu1  ;;  %v2837_v47 = vpop.f32.mrb[66].mxu0  ;;  %v3393_v39 = vld [vmem:[%s7427_s9 + $0x528] sm:$0xff]  ;;  %s8041_s16 = sld [smem:[%s8107_s0 + %s6713_s13]]  }
 0xc0a   :  { %v2755_v2 = vadd.f32 %v2754_v26, %v7656_v6  ;;  %v2838_v3 = vadd.f32 %v2837_v47, %v7661_v49  ;;  %v2756_v4 = vpop.f32.mrb[65].mxu1  ;;  %v2839_v50 = vpop.f32.mrb[67].mxu0  ;;  %v3363_v26 = vld [vmem:[%s7427_s9 + $0x438] sm:$0xff] }
 0xc0b   :  { %v2757_v17 = vadd.f32 %v2756_v4, %v7668_v18  ;;  %v2840_v8 = vadd.f32 %v2839_v50, %v7673_v59  ;;  %3715 = vmatprep.mubr.f32.mxu1 %v3185_v25  ;;  %3795 = vmatprep.mubr.f32.mxu0 %v3187_v46  ;;  %v3362_v46 = vld [vmem:[%s7427_s9 + $0x430] sm:$0xff]  ;;  %v3412_v4 = vld [vmem:[%s7427_s9 + $0x5c0] sm:$0xff]  ;;  %v3413_v50 = vld [vmem:[%s7427_s9 + $0x5c8] sm:$0xff] }
 0xc0c   :  { %3716 = vmatmul.mubr.f32.vlgmr.msra.gmra.mrb[86].mxu1 %v3184_v55  ;;  %3796 = vmatmul.mubr.f32.vlgmr.msra.gmra.mrb[88].mxu0 %v3186_v63  ;;  %v3200_v28 = vmax.f32 %v2755_v2, 0.0  ;;  %v3202_v29 = vmax.f32 %v2838_v3, 0.0  ;;  %v3395_v55 = vld [vmem:[%s7427_s9 + $0x538] sm:$0xff]  ;;  %v3380_v63 = vld [vmem:[%s7427_s9 + $0x4c0] sm:$0xff]  ;;  %v7740_v2 = vrot.slane %v7711_v27, %v2441_v16  ;;  %v3381_v3 = vld [vmem:[%s7427_s9 + $0x4c8] sm:$0xff] }
 0xc0d   :  { %v3201_v19 = vmax.f32 %v2757_v17, 0.0  ;;  %v3203_v21 = vmax.f32 %v2840_v8, 0.0  ;;  %6379 = vmatpush3.bf16.msra.mxu1 %v6378_v42  ;;  %6411 = vmatpush3.bf16.msra.mxu0 %v6410_v7  ;;  %v2760_v20 = vpop.f32.mrb[66].mxu1  ;;  %v2843_v22 = vpop.f32.mrb[68].mxu0  ;;  %v6422_v17 = vpack.c.bf16 %v3395_v55, %v3394_v12  ;;  %v3364_v8 = vld [vmem:[%s7427_s9 + $0x440] sm:$0xff]  ;;  %v3365_v16 = vld [vmem:[%s7427_s9 + $0x448] sm:$0xff] }
 0xc0e   :  { %v2761_v30 = vadd.f32 %v2760_v20, %v7656_v6  ;;  %v2844_v31 = vadd.f32 %v2843_v22, %v7661_v49  ;;  %v2762_v32 = vpop.f32.mrb[67].mxu1  ;;  %v2845_v37 = vpop.f32.mrb[69].mxu0  ;;  %6381 = vmatprep.subr.bf16.mxu1 %v6380_v51  ;;  %6413 = vmatprep.subr.bf16.mxu0 %v6412_v53  ;;  %v6386_v6 = vpack.c.bf16 %v3361_v54, %v3360_v13  ;;  %v3397_v20 = vld [vmem:[%s7427_s9 + $0x548] sm:$0xff]  ;;  %v3382_v22 = vld [vmem:[%s7427_s9 + $0x4d0] sm:$0xff] }
 0xc0f   :  { %v2763_v42 = vadd.f32 %v2762_v32, %v7668_v18  ;;  %v2846_v7 = vadd.f32 %v2845_v37, %v7673_v59  ;;  %3720 = vmatprep.mubr.f32.mxu1 %v3201_v19  ;;  %3800 = vmatprep.mubr.f32.mxu0 %v3203_v21  ;;  %v7726_v18 = vrot.slane %v7711_v27, %v2437_v14  ;;  %v3396_v21 = vld [vmem:[%s7427_s9 + $0x540] sm:$0xff] }
 0xc10   :  { %3721 = vmatmul.mubr.f32.gmra.mrb[88].mxu1 %v3200_v28  ;;  %3801 = vmatmul.mubr.f32.gmra.mrb[90].mxu0 %v3202_v29  ;;  %v6418_v59 = vpack.c.bf16 %v3393_v39, %v3392_v15  ;;  %v3216_v47 = vmax.f32 %v2761_v30, 0.0  ;;  %v3218_v51 = vmax.f32 %v2844_v31, 0.0  ;;  %v6388_v53 = vpack.c.bf16 %v3379_v44, %v3378_v40  ;;  %v3383_v15 = vld [vmem:[%s7427_s9 + $0x4d8] sm:$0xff]  ;;  %v3414_v28 = vld [vmem:[%s7427_s9 + $0x5d0] sm:$0xff] }
 0xc11   :  { %v3217_v49 = vmax.f32 %v2763_v42, 0.0  ;;  %v3219_v25 = vmax.f32 %v2846_v7, 0.0  ;;  %6383 = vmatpush3.bf16.msra.mxu1 %v6382_v5  ;;  %6415 = vmatpush3.bf16.msra.mxu0 %v6414_v11  ;;  %v7735_v14 = vrot.slane %v7711_v27, %v7077_v38  ;;  %v6390_v38 = vpack.c.bf16 %v3363_v26, %v3362_v46  ;;  %v3415_v29 = vld [vmem:[%s7427_s9 + $0x5d8] sm:$0xff]  ;;  %v3366_v42 = vld [vmem:[%s7427_s9 + $0x450] sm:$0xff]  ;;  %v3384_v46 = vld [vmem:[%s7427_s9 + $0x4e0] sm:$0xff] }
 0xc12   :  { %6385 = vmatprep.subr.bf16.mxu1 %v6384_v23  ;;  %6417 = vmatprep.subr.bf16.mxu0 %v6416_v24  ;;  %v6392_v54 = vpack.c.bf16 %v3381_v3, %v3380_v63  ;;  %v6424_v19 = vpack.c.bf16 %v3413_v50, %v3412_v4  ;;  %v6394_v39 = vpack.c.bf16 %v3365_v16, %v3364_v8  ;;  %v3367_v7 = vld [vmem:[%s7427_s9 + $0x458] sm:$0xff]  ;;  %v3368_v3 = vld [vmem:[%s7427_s9 + $0x460] sm:$0xff]  ;;  %v3369_v4 = vld [vmem:[%s7427_s9 + $0x468] sm:$0xff] }
 0xc13   :  { %3725 = vmatprep.mubr.f32.mxu1 %v3217_v49  ;;  %3805 = vmatprep.mubr.f32.mxu0 %v3219_v25  ;;  %v6426_v40 = vpack.c.bf16 %v3397_v20, %v3396_v21  ;;  %v6428_v49 = vpack.c.bf16 %v3415_v29, %v3414_v28  ;;  %v3398_v25 = vld [vmem:[%s7427_s9 + $0x550] sm:$0xff]  ;;  %v6398_v55 = vpack.c.bf16 %v3367_v7, %v3366_v42  ;;  %v3400_v16 = vld [vmem:[%s7427_s9 + $0x560] sm:$0xff]  ;;  %v3419_v21 = vld [vmem:[%s7427_s9 + $0x5f8] sm:$0xff] }
 0xc14   :  { %3726 = vmatmul.mubr.f32.gmra.mrb[90].mxu1 %v3216_v47  ;;  %3806 = vmatmul.mubr.f32.gmra.mrb[92].mxu0 %v3218_v51  ;;  %v3385_v47 = vld [vmem:[%s7427_s9 + $0x4e8] sm:$0xff]  ;;  %v3416_v51 = vld [vmem:[%s7427_s9 + $0x5e0] sm:$0xff]  ;;  %v7798_v20 = vrot.slane %v7711_v27, %v7074_v36  ;;  %v3402_v28 = vld [vmem:[%s7427_s9 + $0x570] sm:$0xff]  ;;  %v7813_v36 = vrot.slane %v7711_v27, %v2453_v9 }
 0xc15   :  { %v7745_v57 = vpop.f32.mrb[68].mxu1  ;;  %v2997_v60 = vpop.f32.mrb[70].mxu0  ;;  %6387 = vmatpush3.bf16.msra.mxu1 %v6386_v6  ;;  %6419 = vmatpush3.bf16.msra.mxu0 %v6418_v59  ;;  %v6396_v6 = vpack.c.bf16 %v3383_v15, %v3382_v22  ;;  %v3399_v59 = vld [vmem:[%s7427_s9 + $0x558] sm:$0xff]  ;;  %v3370_v22 = vld [vmem:[%s7427_s9 + $0x470] sm:$0xff]  ;;  %v3420_v9 = vld [vmem:[%s7427_s9 + $0x600] sm:$0xff] }
 0xc16   :  { %v7750_v5 = vadd.f32 %v2997_v60, %v7726_v18  ;;  %v2916_v11 = vpop.f32.mrb[69].mxu1  ;;  %v2999_v13 = vpop.f32.mrb[71].mxu0  ;;  %6389 = vmatprep.subr.bf16.mxu1 %v6388_v53  ;;  %6421 = vmatprep.subr.bf16.mxu0 %v6420_v52  ;;  %v3417_v53 = vld [vmem:[%s7427_s9 + $0x5e8] sm:$0xff]  ;;  %v6430_v63 = vpack.c.bf16 %v3399_v59, %v3398_v25  ;;  %v3403_v29 = vld [vmem:[%s7427_s9 + $0x578] sm:$0xff] }
 0xc17   :  { %v2917_v23 = vadd.f32 %v2916_v11, %v7735_v14  ;;  %v3000_v24 = vadd.f32 %v2999_v13, %v7740_v2  ;;  %v6432_v8 = vpack.c.bf16 %v3417_v53, %v3416_v51  ;;  %v3401_v11 = vld [vmem:[%s7427_s9 + $0x568] sm:$0xff]  ;;  %v3386_v13 = vld [vmem:[%s7427_s9 + $0x4f0] sm:$0xff] }
 0xc18   :  { %v6434_v15 = vpack.c.bf16 %v3401_v11, %v3400_v16  ;;  %v3421_v59 = vld [vmem:[%s7427_s9 + $0x608] sm:$0xff]  ;;  %v7848_v16 = vrot.slane %v7711_v27, %v2457_v61  ;;  %v3455_v61 = vld [vmem:[%s7427_s9 + $0x718] sm:$0xff] }
 0xc19   :  { %v3189_v30 = vmax.f32 %v2917_v23, 0.0  ;;  %v3191_v31 = vmax.f32 %v3000_v24, 0.0  ;;  %v7760_v32 = vpop.f32.mrb[70].mxu1  ;;  %v3003_v37 = vpop.f32.mrb[72].mxu0  ;;  %6391 = vmatpush3.bf16.msra.mxu1 %v6390_v38  ;;  %6423 = vmatpush3.bf16.msra.mxu0 %v6422_v17  ;;  %v6400_v17 = vpack.c.bf16 %v3385_v47, %v3384_v46  ;;  %v3371_v23 = vld [vmem:[%s7427_s9 + $0x478] sm:$0xff]  ;;  %v7805_v24 = vrot.slane %v7711_v27, %v2445_v56  ;;  %v3468_v56 = vld [vmem:[%s7427_s9 + $0x780] sm:$0xff] }
 0xc1a   :  { %v7765_v44 = vadd.f32 %v3003_v37, %v7726_v18  ;;  %v7767_v45 = vpop.f32.mrb[71].mxu1  ;;  %v3005_v10 = vpop.f32.mrb[73].mxu0  ;;  %6393 = vmatprep.subr.bf16.mxu1 %v6392_v54  ;;  %6425 = vmatprep.subr.bf16.mxu0 %v6424_v19  ;;  %v3387_v19 = vld [vmem:[%s7427_s9 + $0x4f8] sm:$0xff]  ;;  %v6406_v42 = vpack.c.bf16 %v3371_v23, %v3370_v22  ;;  %v3452_v46 = vld [vmem:[%s7427_s9 + $0x700] sm:$0xff]  ;;  %v2915_v47 = vadd.f32 %v7745_v57, %v7798_v20  ;;  %v3441_v23 = vld [vmem:[%s7427_s9 + $0x6a8] sm:$0xff] }
 0xc1b   :  { %v7773_v26 = vadd.f32 %v3005_v10, %v7740_v2  ;;  %3875 = vmatprep.mubr.f32.mxu1 %v3189_v30  ;;  %3955 = vmatprep.mubr.f32.mxu0 %v3191_v31  ;;  %v3436_v30 = vld [vmem:[%s7427_s9 + $0x680] sm:$0xff]  ;;  %v6404_v31 = vpack.c.bf16 %v3387_v19, %v3386_v13  ;;  %v2923_v57 = vadd.f32 %v7767_v45, %v7735_v14  ;;  %v7851_v13 = vld [vmem:[%s7427_s9 + $0x610] sm:$0xff]  ;;  %v7854_v19 = vld [vmem:[%s7427_s9 + $0x618] sm:$0xff] }
 0xc1c   :  { %v6442_v11 = vpack.c.bf16 %v3421_v59, %v3420_v9  ;;  %v7857_v45 = vld [vmem:[%s7427_s9 + $0x710] sm:$0xff] }
 0xc1d   :  { %v7778_v52 = vpop.f32.mrb[72].mxu1  ;;  %v3009_v12 = vpop.f32.mrb[74].mxu0  ;;  %6395 = vmatpush3.bf16.msra.mxu1 %v6394_v39  ;;  %6427 = vmatpush3.bf16.msra.mxu0 %v6426_v40  ;;  %v3437_v39 = vld [vmem:[%s7427_s9 + $0x688] sm:$0xff] }
 0xc1e   :  { %v7783_v50 = vadd.f32 %v3009_v12, %v7726_v18  ;;  %v7785_v60 = vpop.f32.mrb[73].mxu1  ;;  %v3011_v38 = vpop.f32.mrb[75].mxu0  ;;  %6397 = vmatprep.subr.bf16.mxu1 %v6396_v6  ;;  %6429 = vmatprep.subr.bf16.mxu0 %v6428_v49  ;;  %v3418_v18 = vld [vmem:[%s7427_s9 + $0x5f0] sm:$0xff]  ;;  %v3469_v40 = vld [vmem:[%s7427_s9 + $0x788] sm:$0xff]  ;;  %v6438_v6 = vpack.c.bf16 %v3403_v29, %v3402_v28  ;;  %v6440_v49 = vpack.c.bf16 %v3437_v39, %v3436_v30  ;;  %v3205_v39 = vmax.f32 %v2923_v57, 0.0 }
 0xc1f   :  { %v7791_v54 = vadd.f32 %v3011_v38, %v7740_v2  ;;  %v6402_v2 = vpack.c.bf16 %v3369_v4, %v3368_v3  ;;  %v6436_v37 = vpack.c.bf16 %v3419_v21, %v3418_v18  ;;  %v6472_v25 = vpack.c.bf16 %v3469_v40, %v3468_v56  ;;  %v3438_v3 = vld [vmem:[%s7427_s9 + $0x690] sm:$0xff]  ;;  %v3439_v4 = vld [vmem:[%s7427_s9 + $0x698] sm:$0xff] }
 0xc20   :  { %v3470_v38 = vld [vmem:[%s7427_s9 + $0x790] sm:$0xff]  ;;  %v2921_v18 = vadd.f32 %v7760_v32, %v7798_v20  ;;  %v3207_v56 = vmax.f32 %v7773_v26, 0.0 }
 0xc21   :  { %6399 = vmatpush3.bf16.msra.mxu1 %v6398_v55  ;;  %6431 = vmatpush3.bf16.msra.mxu0 %v6430_v63  ;;  %v3453_v63 = vld [vmem:[%s7427_s9 + $0x708] sm:$0xff]  ;;  %v3442_v57 = vld [vmem:[%s7427_s9 + $0x6b0] sm:$0xff] }
 0xc22   :  { %6401 = vmatprep.subr.bf16.mxu1 %v6400_v17  ;;  %6433 = vmatprep.subr.bf16.mxu0 %v6432_v8  ;;  %v3471_v17 = vld [vmem:[%s7427_s9 + $0x798] sm:$0xff]  ;;  %v7843_v8 = vrot.slane %v7711_v27, %v2449_v58  ;;  %v6474_v35 = vpack.c.bf16 %v3453_v63, %v3452_v46  ;;  %v6444_v58 = vpack.c.bf16 %v3439_v4, %v3438_v3  ;;  %v7863_v27 = vld [vmem:[%s7427_s9 + $0x6a0] sm:$0xff]  ;;  %v3425_v63 = vld [vmem:[%s7427_s9 + $0x628] sm:$0xff] }
 0xc23   :  { %v6476_v40 = vpack.c.bf16 %v3471_v17, %v3470_v38  ;;  %v6448_v26 = vpack.c.bf16 %v3441_v23, %v7863_v27  ;;  %v3456_v3 = vld [vmem:[%s7427_s9 + $0x720] sm:$0xff]  ;;  %v3457_v4 = vld [vmem:[%s7427_s9 + $0x728] sm:$0xff]  ;;  %v3443_v38 = vld [vmem:[%s7427_s9 + $0x6b8] sm:$0xff] }
 0xc24   :  { %v3474_v17 = vld [vmem:[%s7427_s9 + $0x7b0] sm:$0xff]  ;;  %v3445_v27 = vld [vmem:[%s7427_s9 + $0x6c8] sm:$0xff]  ;;  %v3476_v23 = vld [vmem:[%s7427_s9 + $0x7c0] sm:$0xff] }
 0xc25   :  { %v3080_v7 = vpop.f32.mrb[74].mxu1  ;;  %v3163_v10 = vpop.f32.mrb[76].mxu0  ;;  %6403 = vmatpush3.bf16.msra.mxu1 %v6402_v2  ;;  %6435 = vmatpush3.bf16.msra.mxu0 %v6434_v15  ;;  %v3188_v2 = vmax.f32 %v2915_v47, 0.0  ;;  %v3190_v15 = vmax.f32 %v7750_v5, 0.0  ;;  %v2929_v5 = vadd.f32 %v7785_v60, %v7735_v14  ;;  %v3206_v14 = vmax.f32 %v7765_v44, 0.0  ;;  %v3424_v44 = vld [vmem:[%s7427_s9 + $0x620] sm:$0xff] }
 0xc26   :  { %v7824_v51 = vadd.f32 %v3080_v7, %v7805_v24  ;;  %v7827_v53 = vadd.f32 %v3163_v10, %v7813_v36  ;;  %v7829_v12 = vpop.f32.mrb[75].mxu1  ;;  %v7831_v55 = vpop.f32.mrb[77].mxu0  ;;  %6405 = vmatprep.subr.bf16.mxu1 %v6404_v31  ;;  %6437 = vmatprep.subr.bf16.mxu0 %v6436_v37  ;;  %v3472_v31 = vld [vmem:[%s7427_s9 + $0x7a0] sm:$0xff]  ;;  %v3473_v37 = vld [vmem:[%s7427_s9 + $0x7a8] sm:$0xff]  ;;  %v3204_v7 = vmax.f32 %v2921_v18, 0.0  ;;  %v2927_v60 = vadd.f32 %v7778_v52, %v7798_v20 }
 0xc27   :  { %v3221_v52 = vmax.f32 %v2929_v5, 0.0  ;;  %v3223_v20 = vmax.f32 %v7791_v54, 0.0 }
 0xc28   :  { %v3220_v54 = vmax.f32 %v2927_v60, 0.0  ;;  %v3431_v60 = vld [vmem:[%s7427_s9 + $0x658] sm:$0xff] }
 0xc29   :  { %v3086_v21 = vpop.f32.mrb[76].mxu1  ;;  %v3169_v22 = vpop.f32.mrb[78].mxu0  ;;  %6407 = vmatpush3.bf16.msra.mxu1 %v6406_v42  ;;  %6439 = vmatpush3.bf16.msra.mxu0 %v6438_v6  ;;  %v6446_v42 = vpack.c.bf16 %v7854_v19, %v7851_v13  ;;  %v6482_v13 = vpack.c.bf16 %v3457_v4, %v3456_v3  ;;  %v3426_v19 = vld [vmem:[%s7427_s9 + $0x630] sm:$0xff]  ;;  %v3480_v3 = vld [vmem:[%s7427_s9 + $0x7e0] sm:$0xff]  ;;  %v3481_v4 = vld [vmem:[%s7427_s9 + $0x7e8] sm:$0xff] }
 0xc2a   :  { %v7868_v28 = vadd.f32 %v3086_v21, %v7805_v24  ;;  %v7871_v32 = vadd.f32 %v3169_v22, %v7813_v36  ;;  %v7873_v29 = vpop.f32.mrb[77].mxu1  ;;  %v7875_v30 = vpop.f32.mrb[79].mxu0  ;;  %6441 = vmatprep.subr.bf16.mxu1 %v6440_v49  ;;  %6473 = vmatprep.subr.bf16.mxu0 %v6472_v25  ;;  %v6478_v49 = vpack.c.bf16 %v3455_v61, %v7857_v45  ;;  %v3427_v45 = vld [vmem:[%s7427_s9 + $0x638] sm:$0xff] }
 0xc2b   :  { %v6480_v25 = vpack.c.bf16 %v3473_v37, %v3472_v31  ;;  %v6452_v22 = vpack.c.bf16 %v3443_v38, %v3442_v57  ;;  %v3459_v61 = vld [vmem:[%s7427_s9 + $0x738] sm:$0xff]  ;;  %v3428_v37 = vld [vmem:[%s7427_s9 + $0x640] sm:$0xff] }
 0xc2c   :  { %3876 = vmatmul.mubr.f32.vlgmr.msra.gmra.mrb[92].mxu1 %v3188_v2  ;;  %3956 = vmatmul.mubr.f32.vlgmr.msra.gmra.mrb[94].mxu0 %v3190_v15  ;;  %v3477_v2 = vld [vmem:[%s7427_s9 + $0x7c8] sm:$0xff]  ;;  %v6454_v15 = vpack.c.bf16 %v3427_v45, %v3426_v19  ;;  %v3450_v19 = vld [vmem:[%s7427_s9 + $0x6f0] sm:$0xff]  ;;  %v3451_v45 = vld [vmem:[%s7427_s9 + $0x6f8] sm:$0xff] }
 0xc2d   :  { %v3092_v10 = vpop.f32.mrb[78].mxu1  ;;  %v3175_v6 = vpop.f32.mrb[80].mxu0  ;;  %3880 = vmatprep.mubr.f32.mxu1 %v3205_v39  ;;  %3960 = vmatprep.mubr.f32.mxu0 %v3207_v56  ;;  %v3429_v39 = vld [vmem:[%s7427_s9 + $0x648] sm:$0xff]  ;;  %v6488_v5 = vpack.c.bf16 %v3477_v2, %v3476_v23  ;;  %v3466_v23 = vld [vmem:[%s7427_s9 + $0x770] sm:$0xff]  ;;  %v3467_v2 = vld [vmem:[%s7427_s9 + $0x778] sm:$0xff] }
 0xc2e   :  { %v7890_v9 = vadd.f32 %v3092_v10, %v7805_v24  ;;  %v7893_v59 = vadd.f32 %v3175_v6, %v7813_v36  ;;  %6443 = vmatpush3.bf16.msra.mxu1 %v6442_v11  ;;  %6475 = vmatpush3.bf16.msra.mxu0 %v6474_v35  ;;  %v7895_v46 = vpop.f32.mrb[79].mxu1  ;;  %v7897_v47 = vpop.f32.mrb[81].mxu0  ;;  %v3083_v24 = vadd.f32 %v7829_v12, %v7843_v8  ;;  %v3475_v11 = vld [vmem:[%s7427_s9 + $0x7b8] sm:$0xff]  ;;  %v3222_v12 = vmax.f32 %v7783_v50, 0.0  ;;  %v3444_v50 = vld [vmem:[%s7427_s9 + $0x6c0] sm:$0xff]  ;;  %v3478_v6 = vld [vmem:[%s7427_s9 + $0x7d0] sm:$0xff] }
 0xc2f   :  { %v3166_v36 = vadd.f32 %v7831_v55, %v7848_v16  ;;  %6445 = vmatprep.subr.bf16.mxu1 %v6444_v58  ;;  %6477 = vmatprep.subr.bf16.mxu0 %v6476_v40  ;;  %v6450_v55 = vpack.c.bf16 %v3425_v63, %v3424_v44  ;;  %v6484_v35 = vpack.c.bf16 %v3475_v11, %v3474_v17  ;;  %v3458_v58 = vld [vmem:[%s7427_s9 + $0x730] sm:$0xff]  ;;  %v3460_v40 = vld [vmem:[%s7427_s9 + $0x740] sm:$0xff]  ;;  %v3447_v10 = vld [vmem:[%s7427_s9 + $0x6d8] sm:$0xff] }
 0xc30   :  { %3881 = vmatmul.mubr.f32.gmra.mrb[94].mxu1 %v3204_v7  ;;  %3961 = vmatmul.mubr.f32.gmra.mrb[96].mxu0 %v3206_v14  ;;  %v3193_v18 = vmax.f32 %v3083_v24, 0.0  ;;  %v6486_v31 = vpack.c.bf16 %v3459_v61, %v3458_v58  ;;  %v6456_v56 = vpack.c.bf16 %v3445_v27, %v3444_v50  ;;  %v3446_v7 = vld [vmem:[%s7427_s9 + $0x6d0] sm:$0xff]  ;;  %v3448_v24 = vld [vmem:[%s7427_s9 + $0x6e0] sm:$0xff]  ;;  %v3433_v11 = vld [vmem:[%s7427_s9 + $0x668] sm:$0xff]  ;;  %v6468_v61 = vpack.c.bf16 %v3451_v45, %v3450_v19 }
 0xc31   :  { %3885 = vmatprep.mubr.f32.mxu1 %v3221_v52  ;;  %3965 = vmatprep.mubr.f32.mxu0 %v3223_v20  ;;  %v3195_v21 = vmax.f32 %v3166_v36, 0.0  ;;  %v3430_v14 = vld [vmem:[%s7427_s9 + $0x650] sm:$0xff]  ;;  %v6460_v44 = vpack.c.bf16 %v3447_v10, %v3446_v7  ;;  %v3463_v20 = vld [vmem:[%s7427_s9 + $0x758] sm:$0xff]  ;;  %v3449_v36 = vld [vmem:[%s7427_s9 + $0x6e8] sm:$0xff]  ;;  %v3095_v7 = vadd.f32 %v7895_v46, %v7843_v8 }
 0xc32   :  { %6447 = vmatpush3.bf16.msra.mxu1 %v6446_v42  ;;  %6479 = vmatpush3.bf16.msra.mxu0 %v6478_v49  ;;  %v3461_v42 = vld [vmem:[%s7427_s9 + $0x748] sm:$0xff]  ;;  %v3479_v49 = vld [vmem:[%s7427_s9 + $0x7d8] sm:$0xff]  ;;  %v3462_v52 = vld [vmem:[%s7427_s9 + $0x750] sm:$0xff]  ;;  %v6462_v57 = vpack.c.bf16 %v3431_v60, %v3430_v14 }
 0xc33   :  { %6449 = vmatprep.subr.bf16.mxu1 %v6448_v26  ;;  %6481 = vmatprep.subr.bf16.mxu0 %v6480_v25  ;;  %v6458_v26 = vpack.c.bf16 %v3429_v39, %v3428_v37  ;;  %v6490_v25 = vpack.c.bf16 %v3461_v42, %v3460_v40  ;;  %v6492_v63 = vpack.c.bf16 %v3479_v49, %v3478_v6  ;;  %v3432_v17 = vld [vmem:[%s7427_s9 + $0x660] sm:$0xff]  ;;  %v3434_v58 = vld [vmem:[%s7427_s9 + $0x670] sm:$0xff]  ;;  %v3435_v27 = vld [vmem:[%s7427_s9 + $0x678] sm:$0xff]  ;;  %v3224_v6 = vmax.f32 %v7890_v9, 0.0 }
 0xc34   :  { %3886 = vmatmul.mubr.f32.gmra.mrb[96].mxu1 %v3220_v54  ;;  %3966 = vmatmul.mubr.f32.gmra.mrb[98].mxu0 %v3222_v12  ;;  %v6494_v38 = vpack.c.bf16 %v3463_v20, %v3462_v52  ;;  %v6464_v54 = vpack.c.bf16 %v3449_v36, %v3448_v24  ;;  %v6496_v12 = vpack.c.bf16 %v3481_v4, %v3480_v3 }
 0xc35   :  { %4035 = vmatprep.mubr.f32.mxu1 %v3193_v18  ;;  %4115 = vmatprep.mubr.f32.mxu0 %v3195_v21  ;;  %v3482_v18 = vld [vmem:[%s7427_s9 + $0x7f0] sm:$0xff]  ;;  %v3483_v21 = vld [vmem:[%s7427_s9 + $0x7f8] sm:$0xff]  ;;  %v3089_v37 = vadd.f32 %v7873_v29, %v7843_v8  ;;  %v3172_v39 = vadd.f32 %v7875_v30, %v7848_v16  ;;  %v3178_v29 = vadd.f32 %v7897_v47, %v7848_v16  ;;  %v3225_v30 = vmax.f32 %v3095_v7, 0.0 }
 0xc36   :  { %6451 = vmatpush3.bf16.msra.mxu1 %v6450_v55  ;;  %6483 = vmatpush3.bf16.msra.mxu0 %v6482_v13  ;;  %v3464_v55 = vld [vmem:[%s7427_s9 + $0x760] sm:$0xff]  ;;  %v3465_v13 = vld [vmem:[%s7427_s9 + $0x768] sm:$0xff]  ;;  %v6500_v50 = vpack.c.bf16 %v3483_v21, %v3482_v18  ;;  %v3226_v8 = vmax.f32 %v7893_v59, 0.0 }
 0xc37   :  { %6453 = vmatprep.subr.bf16.mxu1 %v6452_v22  ;;  %6485 = vmatprep.subr.bf16.mxu0 %v6484_v35  ;;  %v6466_v22 = vpack.c.bf16 %v3433_v11, %v3432_v17  ;;  %v6498_v35 = vpack.c.bf16 %v3465_v13, %v3464_v55  ;;  %v3209_v40 = vmax.f32 %v3089_v37, 0.0  ;;  %v3211_v42 = vmax.f32 %v3172_v39, 0.0 }
 0xc38   :  { %v3227_v10 = vmax.f32 %v3178_v29, 0.0 }
 0xc3a   :  { %6455 = vmatpush3.bf16.msra.mxu1 %v6454_v15  ;;  %6487 = vmatpush3.bf16.msra.mxu0 %v6486_v31  ;;  %v6470_v15 = vpack.c.bf16 %v3435_v27, %v3434_v58  ;;  %v6502_v31 = vpack.c.bf16 %v3467_v2, %v3466_v23 }
 0xc3b   :  { %6457 = vmatprep.subr.bf16.mxu1 %v6456_v56  ;;  %6489 = vmatprep.subr.bf16.mxu0 %v6488_v5  ;;  %v3192_v56 = vmax.f32 %v7824_v51, 0.0  ;;  %v3194_v5 = vmax.f32 %v7827_v53, 0.0  ;;  %v3208_v51 = vmax.f32 %v7868_v28, 0.0  ;;  %v3210_v53 = vmax.f32 %v7871_v32, 0.0  ;;  %v4844_v32 = vld [vmem:[%s4720_s17] ss:$0 sm:$0xff] }
 0xc3c   :  { %s6714_s17 = smov 16  }
 0xc3d   :  { %s4710_s20 = sld [smem:[%s8107_s0 + %s6714_s17]]  }
 0xc3e   :  { %6459 = vmatpush3.bf16.msra.mxu1 %v6458_v26  ;;  %6491 = vmatpush3.bf16.msra.mxu0 %v6490_v25 }
 0xc3f   :  { %6461 = vmatprep.subr.bf16.mxu1 %v6460_v44  ;;  %6493 = vmatprep.subr.bf16.mxu0 %v6492_v63 }
 0xc42   :  { %6463 = vmatpush3.bf16.msra.mxu1 %v6462_v57  ;;  %6495 = vmatpush3.bf16.msra.mxu0 %v6494_v38 }
 0xc43   :  { %6465 = vmatprep.subr.bf16.mxu1 %v6464_v54  ;;  %6497 = vmatprep.subr.bf16.mxu0 %v6496_v12 }
 0xc46   :  { %6467 = vmatpush3.bf16.msra.mxu1 %v6466_v22  ;;  %6499 = vmatpush3.bf16.msra.mxu0 %v6498_v35 }
 0xc47   :  { %6469 = vmatprep.subr.bf16.mxu1 %v6468_v61  ;;  %6501 = vmatprep.subr.bf16.mxu0 %v6500_v50 }
 0xc4a   :  { %6471 = vmatpush3.bf16.msra.mxu1 %v6470_v15  ;;  %6503 = vmatpush3.bf16.msra.mxu0 %v6502_v31 }
 0xc4b   :  { %6504 = vmatprep.subr.bf16.mxu1 %v6677_v0  ;;  %6507 = vmatprep.subr.bf16.mxu0 %v6677_v0 }
 0xc4d   :  { %4036 = vmatmul.mubr.f32.vlgmr.msra.gmra.mrb[98].mxu1 %v3192_v56  ;;  %4116 = vmatmul.mubr.f32.vlgmr.msra.gmra.mrb[100].mxu0 %v3194_v5 }
 0xc4e   :  { %4040 = vmatprep.mubr.f32.mxu1 %v3209_v40  ;;  %4120 = vmatprep.mubr.f32.mxu0 %v3211_v42 }
 0xc51   :  { %4041 = vmatmul.mubr.f32.gmra.mrb[100].mxu1 %v3208_v51  ;;  %4121 = vmatmul.mubr.f32.gmra.mrb[102].mxu0 %v3210_v53 }
 0xc52   :  { %4045 = vmatprep.mubr.f32.mxu1 %v3225_v30  ;;  %4125 = vmatprep.mubr.f32.mxu0 %v3227_v10 }
 0xc55   :  { %4046 = vmatmul.mubr.f32.gmra.mrb[102].mxu1 %v3224_v6  ;;  %4126 = vmatmul.mubr.f32.gmra.mrb[104].mxu0 %v3226_v8 }
 0xc56   :  { %5829 = vmatprep.mubr.msk.f32.mxu1 %vm6679_vm0, %v6680_v1  ;;  %5864 = vmatprep.mubr.msk.f32.mxu0 %vm6679_vm0, %v6680_v1 }
 0xcae   :  { %v5077_v16 = vpop.f32.mrb[80].mxu1  ;;  %v5118_v28 = vpop.f32.mrb[82].mxu0 }
 0xcaf   :  { %v5078_v46 = vpop.f32.mrb[81].mxu1  ;;  %v5119_v9 = vpop.f32.mrb[83].mxu0 }
 0xcb0   :  { %v5079_v47 = vadd.f32 %v5078_v46, %v5077_v16  ;;  %v5120_v59 = vadd.f32 %v5119_v9, %v5118_v28 }
 0xcb2   :  { %v3558_v49 = vadd.f32 %v5079_v47, %v4844_v32  ;;  %v5080_v26 = vpop.f32.mrb[82].mxu1  ;;  %v5121_v25 = vpop.f32.mrb[84].mxu0 }
 0xcb3   :  { %v5081_v14 = vpop.f32.mrb[83].mxu1  ;;  %v5122_v60 = vpop.f32.mrb[85].mxu0 }
 0xcb4   :  { %v3638_v44 = vadd.f32 %v5120_v59, %v3558_v49  ;;  %v5082_v63 = vadd.f32 %v5081_v14, %v5080_v26  ;;  %v5123_v52 = vadd.f32 %v5122_v60, %v5121_v25 }
 0xcb6   :  { %v3563_v20 = vadd.f32 %v5082_v63, %v4844_v32 }
 0xcb8   :  { %v3643_v24 = vadd.f32 %v5123_v52, %v3563_v20 }
 0xcdb   :  { %v5083_v36 = vpop.f32.mrb[84].mxu1  ;;  %v5124_v3 = vpop.f32.mrb[86].mxu0 }
 0xcdc   :  { %v5084_v4 = vpop.f32.mrb[85].mxu1  ;;  %v5125_v57 = vpop.f32.mrb[87].mxu0 }
 0xcdd   :  { %v5085_v38 = vadd.f32 %v5084_v4, %v5083_v36  ;;  %v5126_v17 = vadd.f32 %v5125_v57, %v5124_v3 }
 0xcdf   :  { %v3568_v11 = vadd.f32 %v5085_v38, %v4844_v32  ;;  %v5159_v54 = vpop.f32.mrb[86].mxu1  ;;  %v5200_v12 = vpop.f32.mrb[88].mxu0 }
 0xce0   :  { %v5160_v55 = vpop.f32.mrb[87].mxu1  ;;  %v5201_v13 = vpop.f32.mrb[89].mxu0 }
 0xce1   :  { %v3648_v19 = vadd.f32 %v5126_v17, %v3568_v11  ;;  %v5161_v45 = vadd.f32 %v5160_v55, %v5159_v54  ;;  %v5202_v18 = vadd.f32 %v5201_v13, %v5200_v12 }
 0xce3   :  { %v3718_v21 = vadd.f32 %v5161_v45, %v3638_v44  ;;  %v5162_v22 = vpop.f32.mrb[88].mxu1  ;;  %v5203_v35 = vpop.f32.mrb[90].mxu0 }
 0xce4   :  { %v5163_v58 = vpop.f32.mrb[89].mxu1  ;;  %v5204_v61 = vpop.f32.mrb[91].mxu0 }
 0xce5   :  { %v3798_v50 = vadd.f32 %v5202_v18, %v3718_v21  ;;  %v5164_v27 = vadd.f32 %v5163_v58, %v5162_v22  ;;  %v5205_v23 = vadd.f32 %v5204_v61, %v5203_v35 }
 0xce7   :  { %v3723_v2 = vadd.f32 %v5164_v27, %v3643_v24  ;;  %v5165_v15 = vpop.f32.mrb[90].mxu1  ;;  %v5206_v31 = vpop.f32.mrb[92].mxu0 }
 0xce8   :  { %v5166_v37 = vpop.f32.mrb[91].mxu1  ;;  %v5207_v39 = vpop.f32.mrb[93].mxu0 }
 0xce9   :  { %v3803_v56 = vadd.f32 %v5205_v23, %v3723_v2  ;;  %v5167_v5 = vadd.f32 %v5166_v37, %v5165_v15  ;;  %v5208_v40 = vadd.f32 %v5207_v39, %v5206_v31 }
 0xceb   :  { %v3728_v42 = vadd.f32 %v5167_v5, %v3648_v19 }
 0xced   :  { %v3808_v7 = vadd.f32 %v5208_v40, %v3728_v42 }
 0xcff   :  { %v5241_v29 = vpop.f32.mrb[92].mxu1  ;;  %v5282_v51 = vpop.f32.mrb[94].mxu0 }
 0xd00   :  { %v5242_v53 = vpop.f32.mrb[93].mxu1  ;;  %v5283_v30 = vpop.f32.mrb[95].mxu0 }
 0xd01   :  { %v5243_v10 = vadd.f32 %v5242_v53, %v5241_v29  ;;  %v5284_v6 = vadd.f32 %v5283_v30, %v5282_v51 }
 0xd03   :  { %v3878_v8 = vadd.f32 %v5243_v10, %v3798_v50  ;;  %v5244_v16 = vpop.f32.mrb[94].mxu1  ;;  %v5285_v28 = vpop.f32.mrb[96].mxu0 }
 0xd04   :  { %v5245_v32 = vpop.f32.mrb[95].mxu1  ;;  %v5286_v46 = vpop.f32.mrb[97].mxu0 }
 0xd05   :  { %v3958_v9 = vadd.f32 %v5284_v6, %v3878_v8  ;;  %v5246_v47 = vadd.f32 %v5245_v32, %v5244_v16  ;;  %v5287_v59 = vadd.f32 %v5286_v46, %v5285_v28 }
 0xd07   :  { %v3883_v49 = vadd.f32 %v5246_v47, %v3803_v56  ;;  %v5247_v26 = vpop.f32.mrb[96].mxu1  ;;  %v5288_v25 = vpop.f32.mrb[98].mxu0 }
 0xd08   :  { %v5248_v14 = vpop.f32.mrb[97].mxu1  ;;  %v5289_v60 = vpop.f32.mrb[99].mxu0 }
 0xd09   :  { %v3963_v44 = vadd.f32 %v5287_v59, %v3883_v49  ;;  %v5249_v63 = vadd.f32 %v5248_v14, %v5247_v26  ;;  %v5290_v52 = vadd.f32 %v5289_v60, %v5288_v25 }
 0xd0b   :  { %v3888_v20 = vadd.f32 %v5249_v63, %v3808_v7 }
 0xd0d   :  { %v3968_v24 = vadd.f32 %v5290_v52, %v3888_v20  ;;  %v4845_v52 = vld [vmem:[%s4721_s21] ss:$0 sm:$0xff]  ;;  %s6715_s21 = smov 35  }
 0xd0e   :  { %s4729_s24 = sld [smem:[%s8107_s0 + %s6715_s21]]  }
 0xd20   :  { %v5323_v36 = vpop.f32.mrb[98].mxu1  ;;  %v5364_v3 = vpop.f32.mrb[100].mxu0 }
 0xd21   :  { %v5324_v4 = vpop.f32.mrb[99].mxu1  ;;  %v5365_v57 = vpop.f32.mrb[101].mxu0 }
 0xd22   :  { %v5325_v38 = vadd.f32 %v5324_v4, %v5323_v36  ;;  %v5366_v17 = vadd.f32 %v5365_v57, %v5364_v3  ;;  %v4846_v3 = vld [vmem:[%s4722_s25] ss:$0 sm:$0xff] }
 0xd24   :  { %v4038_v11 = vadd.f32 %v5325_v38, %v3958_v9  ;;  %v5326_v54 = vpop.f32.mrb[100].mxu1  ;;  %v5367_v12 = vpop.f32.mrb[102].mxu0 }
 0xd25   :  { %v5327_v55 = vpop.f32.mrb[101].mxu1  ;;  %v5368_v13 = vpop.f32.mrb[103].mxu0 }
 0xd26   :  { %v4118_v19 = vadd.f32 %v5366_v17, %v4038_v11  ;;  %v5328_v45 = vadd.f32 %v5327_v55, %v5326_v54  ;;  %v5369_v18 = vadd.f32 %v5368_v13, %v5367_v12  ;;  %v4193_v13 = vld [vmem:[%s4698_s30] sm:$0x3] }
 0xd28   :  { %v4043_v21 = vadd.f32 %v5328_v45, %v3963_v44  ;;  %v5329_v22 = vpop.f32.mrb[102].mxu1  ;;  %v5370_v35 = vpop.f32.mrb[104].mxu0  ;;  %v4131_v58 = vadd.f32 %v4118_v19, %v7308_v43  ;;  %v4273_v19 = vld [vmem:[%s7998_s5] sm:$0xff]  ;;  %v4274_v45 = vld [vmem:[%s7998_s5 + $0x8] sm:$0xff] }
 0xd29   :  { %v5330_v61 = vpop.f32.mrb[103].mxu1  ;;  %v5371_v50 = vpop.f32.mrb[105].mxu0 }
 0xd2a   :  { %v4123_v27 = vadd.f32 %v5369_v18, %v4043_v21  ;;  %v5331_v23 = vadd.f32 %v5330_v61, %v5329_v22  ;;  %v5372_v2 = vadd.f32 %v5371_v50, %v5370_v35  ;;  %v4136_v15 = vsel %vm179_vm1, %v4131_v58, 0.0  ;;  %v4275_v18 = vld [vmem:[%s7998_s5 + $0x10] sm:$0xff]  ;;  %v4276_v22 = vld [vmem:[%s7998_s5 + $0x18] sm:$0xff]  ;;  %v4278_v61 = vld [vmem:[%s7998_s5 + $0x28] sm:$0xff] }
 0xd2b   :  { %4137 = vadd.xlane.f32.xlu1 %v4136_v15  ;;  %v6508_v21 = vpack.c.bf16 %v4274_v45, %v4273_v19  ;;  %v6511_v35 = vpack.c.bf16 %v4276_v22, %v4275_v18  ;;  %v4281_v15 = vld [vmem:[%s7998_s5 + $0x40] sm:$0xff]  ;;  %v4464_v45 = vld [vmem:[%s8041_s16 + $0x68] sm:$0xff]  ;;  %v4465_v22 = vld [vmem:[%s8041_s16 + $0x70] sm:$0xff] }
 0xd2c   :  { %v4048_v31 = vadd.f32 %v5331_v23, %v3968_v24  ;;  %v4132_v37 = vadd.f32 %v4123_v27, %v7327_v62  ;;  %v4279_v27 = vld [vmem:[%s7998_s5 + $0x30] sm:$0xff]  ;;  %v4280_v23 = vld [vmem:[%s7998_s5 + $0x38] sm:$0xff]  ;;  %v4463_v19 = vld [vmem:[%s8041_s16 + $0x60] sm:$0xff] }
 0xd2d   :  { %6509 = vmatpush3.bf16.msra.mxu0 %v6508_v21  ;;  %v6556_v18 = vpack.c.bf16 %v4464_v45, %v4463_v19  ;;  %v4755_v21 = vld [vmem:[%s4710_s20] ss:$0 sm:$0xff] }
 0xd2e   :  { %v4128_v39 = vadd.f32 %v5372_v2, %v4048_v31  ;;  %v4139_v56 = vsel %vm179_vm1, %v4132_v37, 0.0  ;;  %6510 = vmatprep.subr.bf16.mxu0 %v6677_v0  ;;  %v6517_v2 = vpack.c.bf16 %v4280_v23, %v4279_v27  ;;  %v4282_v31 = vld [vmem:[%s7998_s5 + $0x48] sm:$0xff] }
 0xd2f   :  { %4140 = vadd.xlane.f32.xlu0 %v4139_v56  ;;  %v4284_v56 = vld [vmem:[%s7998_s5 + $0x58] sm:$0xff]  ;;  %v4546_v23 = vld [vmem:[%s4729_s24 + $0x8] sm:$0xff] }
 0xd30   :  { %v4133_v5 = vadd.f32 %v4128_v39, %v7355_v41  ;;  %v4283_v39 = vld [vmem:[%s7998_s5 + $0x50] sm:$0xff] }
 0xd31   :  { %6512 = vmatpush3.bf16.msra.mxu0 %v6511_v35  ;;  %v4466_v35 = vld [vmem:[%s8041_s16 + $0x78] sm:$0xff] }
 0xd32   :  { %v4142_v40 = vsel %vm179_vm1, %v4133_v5, 0.0  ;;  %6513 = vmatprep.subr.bf16.mxu0 %v6677_v0 }
 0xd33   :  { %4143 = vadd.xlane.f32.xlu1 %v4142_v40  ;;  %v4285_v40 = vld [vmem:[%s7998_s5 + $0x60] sm:$0xff] }
 0xdb8   :  { %v4138_v43 = vpop.xlane.xlu1 %4137 }
 0xdb9   :  { %v4145_v42 = vmul.f32 0.015625, %v4138_v43  ;;  %v4286_v43 = vld [vmem:[%s7998_s5 + $0x68] sm:$0xff] }
 0xdbb   :  { %v4148_v7 = vsub.f32 %v4131_v58, %v4145_v42  ;;  %v4277_v58 = vld [vmem:[%s7998_s5 + $0x20] sm:$0xff]  ;;  %v6526_v42 = vpack.c.bf16 %v4286_v43, %v4285_v40 }
 0xdbc   :  { %v4141_v29 = vpop.xlane.xlu0 %4140  ;;  %v6514_v50 = vpack.c.bf16 %v4278_v61, %v4277_v58  ;;  %v796_v58 = vadd.f32 %v4755_v21, %v7054_v48  ;;  %v6559_v61 = vpack.c.bf16 %v4466_v35, %v4465_v22  ;;  %v4545_v48 = vld [vmem:[%s4729_s24] sm:$0xff] }
 0xdbd   :  { %v4146_v51 = vmul.f32 0.015625, %v4141_v29  ;;  %v4151_v53 = vmul.f32 %v4148_v7, %v4148_v7  ;;  %v4288_v29 = vld [vmem:[%s7998_s5 + $0x78] sm:$0xff] }
 0xdbe   :  { %6515 = vmatpush3.bf16.msra.mxu0 %v6514_v50  ;;  %v799_v50 = vmax.f32 %v796_v58, 0.0 }
 0xdbf   :  { %v4149_v30 = vsub.f32 %v4132_v37, %v4146_v51  ;;  %v4154_v10 = vsel %vm179_vm1, %v4151_v53, 0.0  ;;  %6516 = vmatprep.subr.bf16.mxu0 %v6677_v0  ;;  %v6520_v37 = vpack.c.bf16 %v4282_v31, %v4281_v15  ;;  %v4367_v53 = vld [vmem:[%s4725_s10] sm:$0xff]  ;;  %v4547_v15 = vld [vmem:[%s4729_s24 + $0x10] sm:$0xff]  ;;  %v4548_v31 = vld [vmem:[%s4729_s24 + $0x18] sm:$0xff] }
 0xdc0   :  { %4155 = vadd.xlane.f32.xlu0 %v4154_v10  ;;  %v4144_v62 = vpop.xlane.xlu1 %4143 }
 0xdc1   :  { %v4147_v6 = vmul.f32 0.015625, %v4144_v62  ;;  %v4152_v8 = vmul.f32 %v4149_v30, %v4149_v30 }
 0xdc2   :  { %6518 = vmatpush3.bf16.msra.mxu0 %v6517_v2  ;;  %v6562_v2 = vpack.c.bf16 %v4546_v23, %v4545_v48 }
 0xdc3   :  { %v4150_v16 = vsub.f32 %v4133_v5, %v4147_v6  ;;  %v4157_v28 = vsel %vm179_vm1, %v4152_v8, 0.0  ;;  %6519 = vmatprep.subr.bf16.mxu0 %v6677_v0  ;;  %v6523_v5 = vpack.c.bf16 %v4284_v56, %v4283_v39  ;;  %v6676_v8 = vld [vmem:[%s7027_s27] ss:$0 sm:$0xff]  ;;  %s4724_s27 = sld [smem:[%s8107_s0 + %s6712_s11]]  }
 0xdc4   :  { %4158 = vadd.xlane.f32.xlu1 %v4157_v28  ;;  %v4849_v39 = vld [vmem:[%s4726_s28] ss:$0 sm:$0xff]  ;;  %s4731_s11 = sld [smem:[%s8107_s0 + %s6718_s7]]  }
 0xdc5   :  { %v4153_v41 = vmul.f32 %v4150_v16, %v4150_v16 }
 0xdc6   :  { %6521 = vmatpush3.bf16.msra.mxu0 %v6520_v37  ;;  %v6565_v37 = vpack.c.bf16 %v4548_v31, %v4547_v15 }
 0xdc7   :  { %v4160_v32 = vsel %vm179_vm1, %v4153_v41, 0.0  ;;  %6522 = vmatprep.subr.bf16.mxu0 %v6677_v0 }
 0xdc8   :  { %4161 = vadd.xlane.f32.xlu0 %v4160_v32 }
 0xdca   :  { %6524 = vmatpush3.bf16.msra.mxu0 %v6523_v5  ;;  %4687 = vst [vmem:[%s4731_s11] sm:$0x3] %v6680_v1 }
 0xdcb   :  { %6525 = vmatprep.subr.bf16.mxu0 %v6677_v0 }
 0xdce   :  { %6527 = vmatpush3.bf16.msra.mxu0 %v6526_v42 }
 0xdcf   :  { %6528 = vmatprep.subr.bf16.mxu0 %v6677_v0 }
 0xe4d   :  { %v4156_v46 = vpop.xlane.xlu0 %4155 }
 0xe4e   :  { %v4163_v9 = vmul.f32 0.015625, %v4156_v46  ;;  %v4369_v46 = vld [vmem:[%s4725_s10 + $0x10] sm:$0xff] }
 0xe50   :  { %v4166_v47 = vadd.f32 1e-05, %v4163_v9  ;;  %v4370_v9 = vld [vmem:[%s4725_s10 + $0x18] sm:$0xff] }
 0xe51   :  { %v4159_v59 = vpop.xlane.xlu1 %4158 }
 0xe52   :  { %6658 = vrsqrt.f32 %v4166_v47  ;;  %v4164_v49 = vmul.f32 0.015625, %v4159_v59  ;;  %v6535_v47 = vpack.c.bf16 %v4370_v9, %v4369_v46  ;;  %v4451_v59 = vld [vmem:[%s8041_s16] sm:$0xff] }
 0xe54   :  { %v4167_v26 = vadd.f32 1e-05, %v4164_v49  ;;  %v4452_v49 = vld [vmem:[%s8041_s16 + $0x8] sm:$0xff] }
 0xe55   :  { %v4162_v25 = vpop.xlane.xlu0 %4161 }
 0xe56   :  { %6660 = vrsqrt.f32 %v4167_v26  ;;  %v4165_v14 = vmul.f32 0.015625, %v4162_v25 }
 0xe58   :  { %v4168_v60 = vadd.f32 1e-05, %v4165_v14 }
 0xe5a   :  { %6662 = vrsqrt.f32 %v4168_v60  ;;  %v6538_v60 = vpack.c.bf16 %v4452_v49, %v4451_v59 }
 0xe5c   :  { %v6659_v44 = vpop.eup %6658 }
 0xe5d   :  { %v4172_v63 = vmul.f32 %v6659_v44, %v4148_v7  ;;  %v4287_v7 = vld [vmem:[%s7998_s5 + $0x70] sm:$0xff] }
 0xe5e   :  { %v6529_v51 = vpack.c.bf16 %v4288_v29, %v4287_v7 }
 0xe5f   :  { %v4181_v36 = vmul.f32 %v4845_v52, %v4172_v63  ;;  %v4453_v63 = vld [vmem:[%s8041_s16 + $0x10] sm:$0xff] }
 0xe60   :  { %v6661_v20 = vpop.eup %6660  ;;  %6530 = vmatpush3.bf16.msra.mxu0 %v6529_v51 }
 0xe61   :  { %v4173_v24 = vmul.f32 %v6661_v20, %v4149_v30  ;;  %v4190_v38 = vadd.f32 %v4846_v3, %v4181_v36  ;;  %v4368_v30 = vld [vmem:[%s4725_s10 + $0x8] sm:$0xff] }
 0xe62   :  { %v6532_v10 = vpack.c.bf16 %v4368_v30, %v4367_v53  ;;  %v4456_v36 = vld [vmem:[%s8041_s16 + $0x28] sm:$0xff] }
 0xe63   :  { %v4182_v4 = vmul.f32 %v4845_v52, %v4173_v24  ;;  %v4455_v24 = vld [vmem:[%s8041_s16 + $0x20] sm:$0xff] }
 0xe64   :  { %v6663_v57 = vpop.eup %6662 }
 0xe65   :  { %v4191_v17 = vadd.f32 %v4846_v3, %v4182_v4  ;;  %v4174_v11 = vmul.f32 %v6663_v57, %v4150_v16  ;;  %v415_v16 = vadd.f32 %v6676_v8, %v6874_v34  ;;  %v4848_v34 = vld [vmem:[%s4724_s27] ss:$0 sm:$0xff]  ;;  %v4457_v4 = vld [vmem:[%s8041_s16 + $0x30] sm:$0xff]  ;;  %v4458_v57 = vld [vmem:[%s8041_s16 + $0x38] sm:$0xff] }
 0xe67   :  { %v6505_v54 = vpack.c.bf16 %v4191_v17, %v4190_v38  ;;  %v4183_v12 = vmul.f32 %v4845_v52, %v4174_v11  ;;  %v418_v28 = vmax.f32 %v415_v16, 0.0  ;;  %v4454_v52 = vld [vmem:[%s8041_s16 + $0x18] sm:$0xff]  ;;  %v6547_v38 = vpack.c.bf16 %v4458_v57, %v4457_v4  ;;  %v4459_v17 = vld [vmem:[%s8041_s16 + $0x40] sm:$0xff]  ;;  %v4460_v11 = vld [vmem:[%s8041_s16 + $0x48] sm:$0xff] }
 0xe68   :  { %v6541_v20 = vpack.c.bf16 %v4454_v52, %v4453_v63 }
 0xe69   :  { %6506 = vmatpush3.bf16.msra.mxu1 %v6505_v54  ;;  %v4192_v55 = vadd.f32 %v4846_v3, %v4183_v12  ;;  %v6544_v3 = vpack.c.bf16 %v4456_v36, %v4455_v24  ;;  %v6550_v54 = vpack.c.bf16 %v4460_v11, %v4459_v17  ;;  %v4461_v12 = vld [vmem:[%s8041_s16 + $0x50] sm:$0xff] }
 0xe6a   :  { %5827 = vmatprep.subr.mxu1 %v6680_v1 }
 0xe6d   :  { %5828 = vmatpush3.msra.mxu1 %v4192_v55  ;;  %v4462_v55 = vld [vmem:[%s8041_s16 + $0x58] sm:$0xff] }
 0xe6e   :  { %5830 = vmatmul.mubr.msk.f32.vlgmr.msra.gmra.mrb[104].mxu1 %vm1677_vm12, %v4193_v13  ;;  %6531 = vmatprep.subr.bf16.mxu1 %v6677_v0  ;;  %v6553_v13 = vpack.c.bf16 %v4462_v55, %v4461_v12 }
 0xe6f   :  { %5875 = vmatprep.mubr.msk.f32.mxu1 %vm6679_vm0, %v6680_v1  ;;  %6533 = vmatpush3.bf16.msra.mxu1 %v6532_v10 }
 0xe70   :  { %6534 = vmatprep.subr.bf16.mxu1 %v6677_v0 }
 0xe73   :  { %6536 = vmatpush3.bf16.msra.mxu1 %v6535_v47 }
 0xe74   :  { %6537 = vmatprep.subr.bf16.mxu1 %v6677_v0 }
 0xf41   :  { %v4263_v62 = vpop.f32.mrb[104].mxu1 }
 0xf42   :  { %4268 = vrot.lane.b32.xlu1 %v4263_v62, %s6694_s2  ;;  %v5831_v6 = vpop.f32.mrb[105].mxu1  ;;  %v4852_v62 = vld [vmem:[%s4730_s6] ss:$0 sm:$0xff] }
 0xfb4   :  { %v8030_v41 = vpop.permute.xlu1 %4268 }
 0xfb5   :  { %v4271_v32 = vsel %vm179_vm1, %v418_v28, %v8030_v41  ;;  %v4272_v27 = vsel %vm179_vm1, %v799_v50, %v8030_v41 }
 0xfb6   :  { %5865 = vmatmul.mubr.f32.vlgmr.msra.gmra.mrb[106].mxu0 %v4271_v32 }
0x1089   :  { %v4362_v26 = vpop.f32.mrb[106].mxu0 }
0x108a   :  { %v4363_v25 = vadd.f32 %v4848_v34, %v4362_v26  ;;  %v5866_v14 = vpop.f32.mrb[107].mxu0 }
0x108c   :  { %v4366_v44 = vmax.f32 %v4363_v25, 0.0 }
0x108e   :  { %5876 = vmatmul.mubr.msk.f32.vlgmr.msra.gmra.mrb[106].mxu1 %vm1578_vm10, %v4366_v44 }
0x108f   :  { %6539 = vmatpush3.bf16.msra.mxu1 %v6538_v60  ;;  %5910 = vmatprep.mubr.msk.f32.mxu1 %vm6679_vm0, %v6680_v1 }
0x1090   :  { %6540 = vmatprep.subr.bf16.mxu1 %v6677_v0 }
0x1093   :  { %6542 = vmatpush3.bf16.msra.mxu1 %v6541_v20 }
0x1094   :  { %6543 = vmatprep.subr.bf16.mxu1 %v6677_v0 }
0x1097   :  { %6545 = vmatpush3.bf16.msra.mxu1 %v6544_v3 }
0x1098   :  { %6546 = vmatprep.subr.bf16.mxu1 %v6677_v0 }
0x109b   :  { %6548 = vmatpush3.bf16.msra.mxu1 %v6547_v38 }
0x109c   :  { %6549 = vmatprep.subr.bf16.mxu1 %v6677_v0 }
0x109f   :  { %6551 = vmatpush3.bf16.msra.mxu1 %v6550_v54  ;;  %v4665_v54 = vand.u32 127, %v1456_v33 }
0x10a0   :  { %6552 = vmatprep.subr.bf16.mxu1 %v6677_v0 }
0x10a3   :  { %6554 = vmatpush3.bf16.msra.mxu1 %v6553_v13 }
0x10a4   :  { %6555 = vmatprep.subr.bf16.mxu1 %v6677_v0 }
0x10a7   :  { %6557 = vmatpush3.bf16.msra.mxu1 %v6556_v18 }
0x10a8   :  { %6558 = vmatprep.subr.bf16.mxu1 %v6677_v0 }
0x10ab   :  { %6560 = vmatpush3.bf16.msra.mxu1 %v6559_v61 }
0x10ac   :  { %6561 = vmatprep.subr.bf16.mxu1 %v6677_v0 }
0x10ae   :  { %5911 = vmatmul.mubr.f32.vlgmr.msra.gmra.mrb[108].mxu1 %v4272_v27 }
0x10af   :  { %5921 = vmatprep.mubr.msk.f32.mxu1 %vm6679_vm0, %v6680_v1  ;;  %6563 = vmatpush3.bf16.msra.mxu1 %v6562_v2  ;;  %vm4689_vm0 = vcmask 25624  }
0x10b0   :  { %6564 = vmatprep.subr.bf16.mxu1 %v6677_v0  ;;  %v4851_v0 = vld [vmem:[%s4728_s3] ss:$0 sm:$0xff] }
0x10b3   :  { %6566 = vmatpush3.bf16.msra.mxu1 %v6565_v37 }
0x1161   :  { %v4447_v56 = vpop.f32.mrb[106].mxu1 }
0x1162   :  { %v4448_v5 = vadd.f32 %v4849_v39, %v4447_v56  ;;  %v5877_v40 = vpop.f32.mrb[107].mxu1 }
0x1164   :  { %v4630_v43 = vsel %vm4629_vm13, %v4448_v5, -inf }
0x1165   :  { %4631 = vmax.xlane.f32.xlu0 %v4630_v43 }
0x1181   :  { %v4540_v42 = vpop.f32.mrb[108].mxu1 }
0x1182   :  { %v4541_v7 = vadd.f32 %v4851_v0, %v4540_v42  ;;  %v5912_v29 = vpop.f32.mrb[109].mxu1 }
0x1184   :  { %v4544_v51 = vmax.f32 %v4541_v7, 0.0 }
0x1186   :  { %5922 = vmatmul.mubr.msk.f32.vlgmr.msra.gmra.mrb[110].mxu1 %vm1578_vm10, %v4544_v51 }
0x11f2   :  { %v4632_v53 = vpop.xlane.xlu0 %4631 }
0x11f3   :  { %v4633_v30 = vsub.f32 %v4448_v5, %v4632_v53 }
0x11f5   :  { %v4634_v10 = vmul.f32 1.442695, %v4633_v30 }
0x11f7   :  { %6664 = vpow2.f32 %v4634_v10 }
0x1201   :  { %v6665_v41 = vpop.eup %6664 }
0x1202   :  { %v4636_v32 = vsel %vm4629_vm13, %v6665_v41, 0.0 }
0x1259   :  { %v4625_v6 = vpop.f32.mrb[110].mxu1 }
0x125a   :  { %v4626_v8 = vadd.f32 %v4852_v62, %v4625_v6  ;;  %v5923_v16 = vpop.f32.mrb[111].mxu1 }
0x125c   :  { %v4641_v28 = vsel %vm4629_vm13, %v4626_v8, -inf }
0x125d   :  { %4642 = vmax.xlane.f32.xlu0 %v4641_v28 }
0x1261   :  { %4637 = vadd.xlane.f32.xlu0 %v4636_v32 }
0x12ea   :  { %v4643_v46 = vpop.xlane.xlu0 %4642 }
0x12eb   :  { %v4644_v9 = vsub.f32 %v4626_v8, %v4643_v46 }
0x12ed   :  { %v4645_v47 = vmul.f32 1.442695, %v4644_v9 }
0x12ee   :  { %v4638_v49 = vpop.xlane.xlu0 %4637 }
0x12ef   :  { %6666 = vpow2.f32 %v4645_v47 }
0x12f0   :  { %6668 = vrcp.f32 %v4638_v49 }
0x12f9   :  { %v6667_v34 = vpop.eup %6666 }
0x12fa   :  { %v4647_v59 = vsel %vm4629_vm13, %v6667_v34, 0.0  ;;  %v6669_v25 = vpop.eup %6668 }
0x12fb   :  { %4648 = vadd.xlane.f32.xlu0 %v4647_v59  ;;  %v4640_v60 = vmul.f32 %v6669_v25, %v6665_v41 }
0x1388   :  { %v4649_v26 = vpop.xlane.xlu0 %4648 }
0x1389   :  { %6670 = vrcp.f32 %v4649_v26 }
0x1393   :  { %v6671_v14 = vpop.eup %6670 }
0x1394   :  { %v4651_v44 = vmul.f32 %v6671_v14, %v6667_v34 }
0x1396   :  { %v4652_v63 = vadd.f32 %v4651_v44, %v4640_v60 }
0x1398   :  { %v4653_v52 = vsel %vm4629_vm13, %v4652_v63, -inf }
0x1399   :  { %4654 = vmax.xlane.f32.xlu1 %v4653_v52 }
0x1426   :  { %v4655_v20 = vpop.xlane.xlu1 %4654 }
0x1427   :  { %v4656_v24 = vsub.f32 %v4652_v63, %v4655_v20 }
0x1429   :  { %v4657_v36 = vmul.f32 1.442695, %v4656_v24 }
0x142b   :  { %6672 = vpow2.f32 %v4657_v36 }
0x1435   :  { %v6673_v3 = vpop.eup %6672 }
0x1436   :  { %v4659_v4 = vsel %vm4629_vm13, %v6673_v3, 0.0 }
0x1437   :  { %4660 = vadd.xlane.f32.xlu0 %v4659_v4 }
0x14c4   :  { %v4661_v57 = vpop.xlane.xlu0 %4660 }
0x14c5   :  { %6674 = vrcp.f32 %v4661_v57 }
0x14cf   :  { %v6675_v38 = vpop.eup %6674 }
0x14d0   :  { %v4663_v17 = vmul.f32 %v6675_v38, %v6673_v3 }
0x14d2   :  { %v4666_v11 = vsel %vm4629_vm13, %v4663_v17, -inf  ;;  %4688 = vst.msk [vmem:[%s4731_s11] sm:$0x3] %vm4629_vm13, %v4663_v17 }
0x14d3   :  { %4667 = vmax.xlane.f32.xlu0 %v4666_v11 }
0x1560   :  { %v4668_v12 = vpop.xlane.xlu0 %4667 }
0x1561   :  { %vm4669_vm14 = vcmp.eq.f32.partialorder %v4663_v17, %v4668_v12 }
0x1562   :  { %v4670_v55 = vsel %vm4669_vm14, %v4665_v54, 3 }
0x1563   :  { %v4671_v13 = vsel %vm4629_vm13, %v4670_v55, 2147483647 }
0x1564   :  { %v4673_v19 = vshra.s32 %v4671_v13, 16  ;;  %v4672_v1 = vand.u32 65535, %v4671_v13 }
0x1566   :  { %v4675_v45 = vcvt.s32.f32 %v4673_v19  ;;  %v4674_v21 = vcvt.s32.f32 %v4672_v1 }
0x1568   :  { %4676 = vmin.xlane.f32.xlu0 %v4675_v45 }
0x15f5   :  { %v4677_v18 = vpop.xlane.xlu0 %4676 }
0x15f6   :  { %vm4678_vm15 = vcmp.eq.f32.partialorder %v4675_v45, %v4677_v18  ;;  %v4683_v35 = vcvt.f32.s32 %v4677_v18 }
0x15f7   :  { %v4679_v22 = vsel %vm4678_vm15, %v4674_v21, inf }
0x15f8   :  { %4680 = vmin.xlane.f32.xlu0 %v4679_v22  ;;  %v4684_v61 = vshll.u32 %v4683_v35, 16 }
0x1685   :  { %v4681_v58 = vpop.xlane.xlu0 %4680 }
0x1686   :  { %v4682_v50 = vcvt.f32.s32 %v4681_v58 }
0x1688   :  { %v4685_v27 = vadd.s32 %v4684_v61, %v4682_v50 }
0x168a   :  { %v4686_v33 = vcvt.s32.f32 %v4685_v27 }
0x168c   :  { %4690 = vst.msk [vmem:[%s4731_s11] sm:$0x3] %vm4689_vm0, %v4686_v33 }

</bundles_post_ra>
